<compile_context>
chip_gen: v7x
topology: tpu7x:2x2x1
jax: 0.10.0
libtpu: 0.0.40
codegen_flags: <defaults>
</compile_context>

<pallas_src>
import jax
import jax.numpy as jnp
from jax.experimental import pallas as pl
from jax.experimental.pallas import tpu as pltpu

_LANE = 128
_PAD_L = 8   # sublane-aligned start column of the conv2 scratch interior


def _round_up(x, m):
    return ((x + m - 1) // m) * m


def _make_bottleneck_kernel(H, W, Cin_p, Cmid_p, Cout_p, stride,
                            has_downsample, W_buf):
    Ho = (H - 1) // stride + 1
    Wo = (W - 1) // stride + 1
    H_span = (Ho - 1) * stride + 1
    W_span = (Wo - 1) * stride + 1

    def kernel(*refs):
        if has_downsample:
            (x_ref, w1_ref, b1_ref, w2_ref, b2_ref, w3_ref, wd_ref, b3_ref,
             out_ref, pad_ref) = refs
        else:
            (x_ref, w1_ref, b1_ref, w2_ref, b2_ref, w3_ref, b3_ref,
             out_ref, pad_ref) = refs
            wd_ref = None

        x = x_ref[0]                                    # (H, W, Cin_p) bf16
        xf = x.reshape(H * W, Cin_p)

        # ---- conv1 (1x1, BN scale folded) + bias + relu --------------------
        o1 = jnp.dot(xf, w1_ref[...], preferred_element_type=jnp.float32)
        o1 = jnp.maximum(o1 + b1_ref[...], 0.0)         # (H*W, Cmid_p) f32

        # ---- conv2 (3x3, stride, pad=1) -------------------------------------
        # Write the interior into the persistent bf16 scratch; zero only the
        # 1-wide halo (interior fully overwritten every step).  The halo is
        # re-zeroed per step because gating on program_id==0 would leave the
        # scratch uninitialized for cores whose first iteration is not 0
        # under megacore "parallel" sharding.
        pad_ref[1:H + 1, _PAD_L:_PAD_L + W, :] = (
            o1.reshape(H, W, Cmid_p).astype(jnp.bfloat16))
        zrow = jnp.zeros((1, W_buf, Cmid_p), jnp.bfloat16)
        zcol = jnp.zeros((H, 1, Cmid_p), jnp.bfloat16)
        pad_ref[0:1, :, :] = zrow
        pad_ref[H + 1:H + 2, :, :] = zrow
        pad_ref[1:H + 1, _PAD_L - 1:_PAD_L, :] = zcol
        pad_ref[1:H + 1, _PAD_L + W:_PAD_L + W + 1, :] = zcol

        # 9 accumulating per-tap dots (no materialized im2col).  Each tap is
        # sliced directly from the scratch ref; the matching K-slice of w2 is
        # a static sublane-aligned slice.
        # TODO(synk): on v6e, pair two taps per dot (K=256) to fill the
        #             256-deep MXU; K=128 per tap is exact on v5e and the
        #             accumulation is free on v7x (MRB).
        o2 = None
        tap = 0
        for dy in range(3):
            for dx in range(3):
                c0 = _PAD_L - 1 + dx
                patch = pad_ref[dy:dy + H_span, c0:c0 + W_span, :]
                if stride != 1:
                    patch = jax.lax.slice(
                        patch, (0, 0, 0), (H_span, W_span, Cmid_p),
                        (stride, stride, 1))
                d = jnp.dot(patch.reshape(Ho * Wo, Cmid_p),
                            w2_ref[tap * Cmid_p:(tap + 1) * Cmid_p, :],
                            preferred_element_type=jnp.float32)
                o2 = d if o2 is None else o2 + d
                tap += 1
        o2 = jnp.maximum(o2 + b2_ref[...], 0.0)         # (Ho*Wo, Cmid_p) f32
        o2b = o2.astype(jnp.bfloat16)

        # ---- conv3 (1x1) + separate 1x1 downsample dot + residual + relu ----
        o3 = (jnp.dot(o2b, w3_ref[...], preferred_element_type=jnp.float32)
              + b3_ref[...])                            # b3 includes bd
        if has_downsample:
            if stride == 1:
                xs = xf
            else:
                xs = jax.lax.slice(
                    x, (0, 0, 0), (H_span, W_span, Cin_p),
                    (stride, stride, 1)).reshape(Ho * Wo, Cin_p)
            o3 = o3 + jnp.dot(xs, wd_ref[...],
                              preferred_element_type=jnp.float32)
            out = jnp.maximum(o3, 0.0)
        else:
            out = jnp.maximum(o3 + xf.astype(jnp.float32), 0.0)

        out_ref[0] = out.reshape(Ho, Wo, Cout_p).astype(out_ref.dtype)

    return kernel


# ----------------------------- weight folding --------------------------------

def fold_params(params, Cin):
    """Fold eval-mode BN scales into conv weights (f32), pad channel dims to
    multiples of 128, cast matmul operands to bf16 (biases stay f32)."""
    has_downsample = 'wd' in params
    Cmid = params['w1'].shape[0]
    Cout = params['w3'].shape[0]
    Cin_p = _round_up(Cin, _LANE)
    Cmid_p = _round_up(Cmid, _LANE)
    Cout_p = _round_up(Cout, _LANE)

    def pad2(a, r, c):
        return jnp.zeros((r, c), jnp.float32).at[:a.shape[0], :a.shape[1]].set(a)

    w1 = params['w1'][:, :, 0, 0].T * params['s1'][None, :]        # (Cin, Cmid)
    w2 = (jnp.transpose(params['w2'], (2, 3, 1, 0))
          * params['s2'][None, None, None, :])                     # (3,3,Ci,Co)
    w3 = params['w3'][:, :, 0, 0].T * params['s3'][None, :]        # (Cmid, Cout)

    folded = {
        'w1': pad2(w1, Cin_p, Cmid_p).astype(jnp.bfloat16),
        'b1': pad2(params['b1'][None, :], 1, Cmid_p),
        'w2': (jnp.zeros((3, 3, Cmid_p, Cmid_p), jnp.float32)
               .at[:, :, :Cmid, :Cmid].set(w2)
               .reshape(9 * Cmid_p, Cmid_p).astype(jnp.bfloat16)),
        'b2': pad2(params['b2'][None, :], 1, Cmid_p),
        'w3': pad2(w3, Cmid_p, Cout_p).astype(jnp.bfloat16),
    }
    if has_downsample:
        wd = params['wd'][:, :, 0, 0].T * params['sd'][None, :]    # (Cin, Cout)
        folded['wd'] = pad2(wd, Cin_p, Cout_p).astype(jnp.bfloat16)
        folded['b3'] = pad2((params['b3'] + params['bd'])[None, :], 1, Cout_p)
    else:
        folded['b3'] = pad2(params['b3'][None, :], 1, Cout_p)

    meta = dict(Cin=Cin, Cmid=Cmid, Cout=Cout, Cin_p=Cin_p, Cmid_p=Cmid_p,
                Cout_p=Cout_p, has_downsample=has_downsample)
    return folded, meta


# --------------------------- padded-NHWC entry point --------------------------

def bottleneck_nhwc(xb, folded, meta, stride=1):
    """Fused bottleneck on padded NHWC bf16 input (N, H, W, Cin_p).
    Returns padded NHWC bf16 (N, Ho, Wo, Cout_p) — chainable block-to-block
    with no layout / pad / cast round-trips."""
    N, H, W, Cin_p = xb.shape
    assert Cin_p == meta['Cin_p']
    Cmid_p, Cout_p = meta['Cmid_p'], meta['Cout_p']
    has_downsample = meta['has_downsample']
    assert has_downsample or (stride == 1 and meta['Cin'] == meta['Cout'])

    Ho = (H - 1) // stride + 1
    Wo = (W - 1) // stride + 1
    W_buf = _round_up(W + _PAD_L + 2, 8)   # interior at cols [_PAD_L, _PAD_L+W)

    kernel = _make_bottleneck_kernel(H, W, Cin_p, Cmid_p, Cout_p, stride,
                                     has_downsample, W_buf)

    if has_downsample:
        wargs = [folded['w1'], folded['b1'], folded['w2'], folded['b2'],
                 folded['w3'], folded['wd'], folded['b3']]
    else:
        wargs = [folded['w1'], folded['b1'], folded['w2'], folded['b2'],
                 folded['w3'], folded['b3']]

    in_specs = [pl.BlockSpec((1, H, W, Cin_p), lambda n: (n, 0, 0, 0))]
    for a in wargs:
        in_specs.append(pl.BlockSpec(a.shape, lambda n: (0, 0)))
    # NOTE: weight/bias block indices never change across the grid, so Pallas
    # does not re-fetch them each step.

    scratch = [pltpu.VMEM((H + 2, W_buf, Cmid_p), jnp.bfloat16)]

    # Explicit VMEM budget: blocks + weights + scratch + live values, with
    # headroom, capped against device capacity.
    weight_bytes = sum(int(a.size) * a.dtype.itemsize for a in wargs)
    block_bytes = (
        2 * H * W * Cin_p * 2 +                  # x block (bf16) x2 buffers
        2 * Ho * Wo * Cout_p * 2 +               # out block (bf16) x2 buffers
        2 * weight_bytes +                       # weights/biases (worst case 2x)
        (H + 2) * W_buf * Cmid_p * 2 +           # conv2 pad scratch (bf16)
        H * W * Cin_p * 2 +                      # live x value (bf16)
        H * W * Cmid_p * 4 +                     # o1 (f32)
        Ho * Wo * Cmid_p * 8 +                   # o2 acc (f32) + tap/o2b (bf16)
        Ho * Wo * Cout_p * 4)                    # o3 / out (f32)
    try:
        vmem_cap = int(pltpu.get_tpu_info().vmem_capacity_bytes)
    except Exception:
        vmem_cap = 64 * 1024 * 1024              # conservative fallback
    vmem_limit = max(16 * 1024 * 1024,
                     min(block_bytes + (8 << 20), vmem_cap * 3 // 4))

    return pl.pallas_call(
        kernel,
        out_shape=jax.ShapeDtypeStruct((N, Ho, Wo, Cout_p), jnp.bfloat16),
        grid=(N,),
        in_specs=in_specs,
        out_specs=pl.BlockSpec((1, Ho, Wo, Cout_p), lambda n: (n, 0, 0, 0)),
        scratch_shapes=scratch,
        compiler_params=pltpu.CompilerParams(
            dimension_semantics=("parallel",),
            vmem_limit_bytes=int(vmem_limit)),
    )(xb, *wargs)


# ----------------------- PyTorch-interface (NCHW) wrapper ---------------------

def bottleneck_forward(x_nchw, params, stride=1):
    """NCHW f32 in -> NCHW f32 out, matching the nn.Module interface.
    The transpose/pad/cast round-trips here exist only for interface
    compatibility; chained blocks should use bottleneck_nhwc directly."""
    N, Cin, H, W = x_nchw.shape
    folded, meta = fold_params(params, Cin)
    x = jnp.transpose(x_nchw, (0, 2, 3, 1)).astype(jnp.float32)    # NHWC
    xb = jnp.pad(x, ((0, 0), (0, 0), (0, 0), (0, meta['Cin_p'] - Cin))
                 ).astype(jnp.bfloat16)
    out = bottleneck_nhwc(xb, folded, meta, stride)
    out = out[..., :meta['Cout']].astype(jnp.float32)              # drop pad
    return jnp.transpose(out, (0, 3, 1, 2))                        # NCHW


# ------------------------- parameter construction ---------------------------

def make_params(key, inplanes, planes, stride, expansion=4, eps=1e-5):
    """Deterministic synthetic weights; BN folded to eval-mode scale/bias."""
    cout = planes * expansion
    keys = jax.random.split(key, 20)
    p = {}

    def bn_fold(k, c):
        k1, k2, k3, k4 = jax.random.split(k, 4)
        gamma = 1.0 + 0.1 * jax.random.normal(k1, (c,), jnp.float32)
        beta = 0.1 * jax.random.normal(k2, (c,), jnp.float32)
        rmean = 0.1 * jax.random.normal(k3, (c,), jnp.float32)
        rvar = 1.0 + 0.1 * jnp.abs(jax.random.normal(k4, (c,), jnp.float32))
        scale = gamma / jnp.sqrt(rvar + eps)
        bias = beta - rmean * scale
        return scale, bias

    p['w1'] = 0.1 * jax.random.normal(keys[0], (planes, inplanes, 1, 1), jnp.float32)
    p['s1'], p['b1'] = bn_fold(keys[1], planes)
    p['w2'] = 0.1 * jax.random.normal(keys[2], (planes, planes, 3, 3), jnp.float32)
    p['s2'], p['b2'] = bn_fold(keys[3], planes)
    p['w3'] = 0.1 * jax.random.normal(keys[4], (cout, planes, 1, 1), jnp.float32)
    p['s3'], p['b3'] = bn_fold(keys[5], cout)
    if stride != 1 or cout != inplanes:
        p['wd'] = 0.1 * jax.random.normal(keys[6], (cout, inplanes, 1, 1),
                                          jnp.float32)
        p['sd'], p['bd'] = bn_fold(keys[7], cout)
    return p


# -------------------------- pure-JAX reference -------------------------------

def reference_forward(x, p, stride):
    def conv(x, w, s=1, pad=0):
        return jax.lax.conv_general_dilated(
            x, w, (s, s), [(pad, pad), (pad, pad)],
            dimension_numbers=('NCHW', 'OIHW', 'NCHW'))

    def bn(x, scale, bias):
        return x * scale[None, :, None, None] + bias[None, :, None, None]

    out = jax.nn.relu(bn(conv(x, p['w1']), p['s1'], p['b1']))
    out = jax.nn.relu(bn(conv(out, p['w2'], stride, 1), p['s2'], p['b2']))
    out = bn(conv(out, p['w3']), p['s3'], p['b3'])
    if 'wd' in p:
        res = bn(conv(x, p['wd'], stride), p['sd'], p['bd'])
    else:
        res = x
    return jax.nn.relu(out + res)


if __name__ == "__main__":
    key = jax.random.PRNGKey(0)

    # Test 1: BottleNeck(inplanes=16, planes=8, stride=1) — downsample path
    # exercised because expansion*planes (=32) != inplanes (=16).
    N, inplanes, planes, H, W, stride = 2, 16, 8, 16, 16, 1
    kx, kp, key = jax.random.split(key, 3)
    x = jax.random.normal(kx, (N, inplanes, H, W), jnp.float32)    # NCHW
    params = make_params(kp, inplanes, planes, stride)
    out = jax.block_until_ready(bottleneck_forward(x, params, stride=stride))
    ref = jax.block_until_ready(reference_forward(x, params, stride))
    assert out.shape == (N, 4 * planes, H, W), out.shape
    # bf16 matmuls + bf16 output => loosened tolerance vs the f32 reference.
    max_err = float(jnp.max(jnp.abs(out - ref)))
    assert jnp.allclose(out, ref, atol=4e-2, rtol=4e-2), max_err

    # Test 2: identity-residual path — BottleNeck(inplanes=32, planes=8,
    # stride=1): expansion*planes == inplanes, so no downsample.
    N2, inplanes2, planes2, H2, W2 = 2, 32, 8, 8, 8
    kx2, kp2 = jax.random.split(key)
    x2 = jax.random.normal(kx2, (N2, inplanes2, H2, W2), jnp.float32)
    params2 = make_params(kp2, inplanes2, planes2, 1)
    assert 'wd' not in params2
    out2 = jax.block_until_ready(bottleneck_forward(x2, params2, stride=1))
    ref2 = jax.block_until_ready(reference_forward(x2, params2, 1))
    assert out2.shape == (N2, 4 * planes2, H2, W2), out2.shape
    max_err2 = float(jnp.max(jnp.abs(out2 - ref2)))
    assert jnp.allclose(out2, ref2, atol=4e-2, rtol=4e-2), max_err2

    print("KERNEL_OK")
</pallas_src>

<mosaic_0001>
module attributes {stable_mosaic.version = 11 : i64} {
  func.func @kernel(%arg0: i32, %arg1: memref<1x16x16x128xbf16, #tpu.memory_space<vmem>>, %arg2: memref<128x128xbf16, #tpu.memory_space<vmem>>, %arg3: memref<1x128xf32, #tpu.memory_space<vmem>>, %arg4: memref<1152x128xbf16, #tpu.memory_space<vmem>>, %arg5: memref<1x128xf32, #tpu.memory_space<vmem>>, %arg6: memref<128x128xbf16, #tpu.memory_space<vmem>>, %arg7: memref<128x128xbf16, #tpu.memory_space<vmem>>, %arg8: memref<1x128xf32, #tpu.memory_space<vmem>>, %arg9: memref<1x16x16x128xbf16, #tpu.memory_space<vmem>>, %arg10: memref<18x32x128xbf16, #tpu.memory_space<vmem>>) attributes {dimension_semantics = [#tpu.dimension_semantics<parallel>], iteration_bounds = array<i64: 2>, scalar_prefetch = 0 : i64, scratch_operands = 1 : i64, tpu.core_type = #tpu.core_type<tc>, window_params = [{transform_indices = @transform_0, window_bounds = array<i64: 1, 16, 16, 128>}, {pipeline_mode = #tpu.pipeline_mode<synchronous>, transform_indices = @transform_1, window_bounds = array<i64: 128, 128>}, {pipeline_mode = #tpu.pipeline_mode<synchronous>, transform_indices = @transform_2, window_bounds = array<i64: 1, 128>}, {pipeline_mode = #tpu.pipeline_mode<synchronous>, transform_indices = @transform_3, window_bounds = array<i64: 1152, 128>}, {pipeline_mode = #tpu.pipeline_mode<synchronous>, transform_indices = @transform_4, window_bounds = array<i64: 1, 128>}, {pipeline_mode = #tpu.pipeline_mode<synchronous>, transform_indices = @transform_5, window_bounds = array<i64: 128, 128>}, {pipeline_mode = #tpu.pipeline_mode<synchronous>, transform_indices = @transform_6, window_bounds = array<i64: 128, 128>}, {pipeline_mode = #tpu.pipeline_mode<synchronous>, transform_indices = @transform_7, window_bounds = array<i64: 1, 128>}, {transform_indices = @transform_8, window_bounds = array<i64: 1, 16, 16, 128>}]} {
    %c0 = arith.constant 0 : index
    %c0_0 = arith.constant 0 : index
    %c0_1 = arith.constant 0 : index
    %c0_2 = arith.constant 0 : index
    %0 = vector.load %arg1[%c0, %c0_0, %c0_1, %c0_2] : memref<1x16x16x128xbf16, #tpu.memory_space<vmem>>, vector<1x16x16x128xbf16>
    %1 = vector.shape_cast %0 : vector<1x16x16x128xbf16> to vector<16x16x128xbf16>
    %2 = vector.shape_cast %1 : vector<16x16x128xbf16> to vector<256x128xbf16>
    %c0_3 = arith.constant 0 : index
    %c0_4 = arith.constant 0 : index
    %3 = vector.load %arg2[%c0_3, %c0_4] : memref<128x128xbf16, #tpu.memory_space<vmem>>, vector<128x128xbf16>
    %cst = arith.constant dense<0.000000e+00> : vector<256x128xf32>
    %4 = tpu.matmul %2, %3, %cst {dimension_numbers = #tpu.dot_dimension_numbers<[1], [0], [0], [1], [0, 0, 1, 1], [], []>} : vector<256x128xbf16>, vector<128x128xbf16>, vector<256x128xf32> -> vector<256x128xf32>
    %c0_5 = arith.constant 0 : index
    %c0_6 = arith.constant 0 : index
    %5 = vector.load %arg3[%c0_5, %c0_6] : memref<1x128xf32, #tpu.memory_space<vmem>>, vector<1x128xf32>
    %6 = vector.broadcast %5 : vector<1x128xf32> to vector<256x128xf32>
    %7 = arith.addf %4, %6 : vector<256x128xf32>
    %cst_7 = arith.constant 0.000000e+00 : f32
    %8 = vector.broadcast %cst_7 : f32 to vector<256x128xf32>
    %9 = arith.maximumf %7, %8 : vector<256x128xf32>
    %10 = vector.shape_cast %9 : vector<256x128xf32> to vector<16x16x128xf32>
    %11 = arith.truncf %10 : vector<16x16x128xf32> to vector<16x16x128xbf16>
    %c1 = arith.constant 1 : index
    %c8 = arith.constant 8 : index
    %c0_8 = arith.constant 0 : index
    %12 = vector.load %arg10[%c1, %c8, %c0_8] : memref<18x32x128xbf16, #tpu.memory_space<vmem>>, vector<16x16x128xbf16>
    tpu.vector_store %arg10[%c1, %c8, %c0_8], %11 {strides = array<i32>} : memref<18x32x128xbf16, #tpu.memory_space<vmem>>, vector<16x16x128xbf16>,
    %cst_9 = arith.constant 0.000000e+00 : bf16
    %13 = vector.broadcast %cst_9 : bf16 to vector<1x32x128xbf16>
    %cst_10 = arith.constant 0.000000e+00 : bf16
    %14 = vector.broadcast %cst_10 : bf16 to vector<16x1x128xbf16>
    %c0_11 = arith.constant 0 : index
    %c0_12 = arith.constant 0 : index
    %c0_13 = arith.constant 0 : index
    %15 = vector.load %arg10[%c0_11, %c0_12, %c0_13] : memref<18x32x128xbf16, #tpu.memory_space<vmem>>, vector<1x32x128xbf16>
    tpu.vector_store %arg10[%c0_11, %c0_12, %c0_13], %13 {strides = array<i32>} : memref<18x32x128xbf16, #tpu.memory_space<vmem>>, vector<1x32x128xbf16>,
    %c17 = arith.constant 17 : index
    %c0_14 = arith.constant 0 : index
    %c0_15 = arith.constant 0 : index
    %16 = vector.load %arg10[%c17, %c0_14, %c0_15] : memref<18x32x128xbf16, #tpu.memory_space<vmem>>, vector<1x32x128xbf16>
    tpu.vector_store %arg10[%c17, %c0_14, %c0_15], %13 {strides = array<i32>} : memref<18x32x128xbf16, #tpu.memory_space<vmem>>, vector<1x32x128xbf16>,
    %c1_16 = arith.constant 1 : index
    %c7 = arith.constant 7 : index
    %c0_17 = arith.constant 0 : index
    %17 = vector.load %arg10[%c1_16, %c7, %c0_17] : memref<18x32x128xbf16, #tpu.memory_space<vmem>>, vector<16x1x128xbf16>
    tpu.vector_store %arg10[%c1_16, %c7, %c0_17], %14 {strides = array<i32>} : memref<18x32x128xbf16, #tpu.memory_space<vmem>>, vector<16x1x128xbf16>,
    %c1_18 = arith.constant 1 : index
    %c24 = arith.constant 24 : index
    %c0_19 = arith.constant 0 : index
    %18 = vector.load %arg10[%c1_18, %c24, %c0_19] : memref<18x32x128xbf16, #tpu.memory_space<vmem>>, vector<16x1x128xbf16>
    tpu.vector_store %arg10[%c1_18, %c24, %c0_19], %14 {strides = array<i32>} : memref<18x32x128xbf16, #tpu.memory_space<vmem>>, vector<16x1x128xbf16>,
    %c0_20 = arith.constant 0 : index
    %c7_21 = arith.constant 7 : index
    %c0_22 = arith.constant 0 : index
    %19 = vector.load %arg10[%c0_20, %c7_21, %c0_22] : memref<18x32x128xbf16, #tpu.memory_space<vmem>>, vector<16x16x128xbf16>
    %20 = vector.shape_cast %19 : vector<16x16x128xbf16> to vector<256x128xbf16>
    %c0_23 = arith.constant 0 : index
    %c0_24 = arith.constant 0 : index
    %21 = vector.load %arg4[%c0_23, %c0_24] : memref<1152x128xbf16, #tpu.memory_space<vmem>>, vector<128x128xbf16>
    %cst_25 = arith.constant dense<0.000000e+00> : vector<256x128xf32>
    %22 = tpu.matmul %20, %21, %cst_25 {dimension_numbers = #tpu.dot_dimension_numbers<[1], [0], [0], [1], [0, 0, 1, 1], [], []>} : vector<256x128xbf16>, vector<128x128xbf16>, vector<256x128xf32> -> vector<256x128xf32>
    %c0_26 = arith.constant 0 : index
    %c8_27 = arith.constant 8 : index
    %c0_28 = arith.constant 0 : index
    %23 = vector.load %arg10[%c0_26, %c8_27, %c0_28] : memref<18x32x128xbf16, #tpu.memory_space<vmem>>, vector<16x16x128xbf16>
    %24 = vector.shape_cast %23 : vector<16x16x128xbf16> to vector<256x128xbf16>
    %c128 = arith.constant 128 : index
    %c0_29 = arith.constant 0 : index
    %25 = vector.load %arg4[%c128, %c0_29] : memref<1152x128xbf16, #tpu.memory_space<vmem>>, vector<128x128xbf16>
    %cst_30 = arith.constant dense<0.000000e+00> : vector<256x128xf32>
    %26 = tpu.matmul %24, %25, %cst_30 {dimension_numbers = #tpu.dot_dimension_numbers<[1], [0], [0], [1], [0, 0, 1, 1], [], []>} : vector<256x128xbf16>, vector<128x128xbf16>, vector<256x128xf32> -> vector<256x128xf32>
    %27 = arith.addf %22, %26 : vector<256x128xf32>
    %c0_31 = arith.constant 0 : index
    %c9 = arith.constant 9 : index
    %c0_32 = arith.constant 0 : index
    %28 = vector.load %arg10[%c0_31, %c9, %c0_32] : memref<18x32x128xbf16, #tpu.memory_space<vmem>>, vector<16x16x128xbf16>
    %29 = vector.shape_cast %28 : vector<16x16x128xbf16> to vector<256x128xbf16>
    %c256 = arith.constant 256 : index
    %c0_33 = arith.constant 0 : index
    %30 = vector.load %arg4[%c256, %c0_33] : memref<1152x128xbf16, #tpu.memory_space<vmem>>, vector<128x128xbf16>
    %cst_34 = arith.constant dense<0.000000e+00> : vector<256x128xf32>
    %31 = tpu.matmul %29, %30, %cst_34 {dimension_numbers = #tpu.dot_dimension_numbers<[1], [0], [0], [1], [0, 0, 1, 1], [], []>} : vector<256x128xbf16>, vector<128x128xbf16>, vector<256x128xf32> -> vector<256x128xf32>
    %32 = arith.addf %27, %31 : vector<256x128xf32>
    %c1_35 = arith.constant 1 : index
    %c7_36 = arith.constant 7 : index
    %c0_37 = arith.constant 0 : index
    %33 = vector.load %arg10[%c1_35, %c7_36, %c0_37] : memref<18x32x128xbf16, #tpu.memory_space<vmem>>, vector<16x16x128xbf16>
    %34 = vector.shape_cast %33 : vector<16x16x128xbf16> to vector<256x128xbf16>
    %c384 = arith.constant 384 : index
    %c0_38 = arith.constant 0 : index
    %35 = vector.load %arg4[%c384, %c0_38] : memref<1152x128xbf16, #tpu.memory_space<vmem>>, vector<128x128xbf16>
    %cst_39 = arith.constant dense<0.000000e+00> : vector<256x128xf32>
    %36 = tpu.matmul %34, %35, %cst_39 {dimension_numbers = #tpu.dot_dimension_numbers<[1], [0], [0], [1], [0, 0, 1, 1], [], []>} : vector<256x128xbf16>, vector<128x128xbf16>, vector<256x128xf32> -> vector<256x128xf32>
    %37 = arith.addf %32, %36 : vector<256x128xf32>
    %c1_40 = arith.constant 1 : index
    %c8_41 = arith.constant 8 : index
    %c0_42 = arith.constant 0 : index
    %38 = vector.load %arg10[%c1_40, %c8_41, %c0_42] : memref<18x32x128xbf16, #tpu.memory_space<vmem>>, vector<16x16x128xbf16>
    %39 = vector.shape_cast %38 : vector<16x16x128xbf16> to vector<256x128xbf16>
    %c512 = arith.constant 512 : index
    %c0_43 = arith.constant 0 : index
    %40 = vector.load %arg4[%c512, %c0_43] : memref<1152x128xbf16, #tpu.memory_space<vmem>>, vector<128x128xbf16>
    %cst_44 = arith.constant dense<0.000000e+00> : vector<256x128xf32>
    %41 = tpu.matmul %39, %40, %cst_44 {dimension_numbers = #tpu.dot_dimension_numbers<[1], [0], [0], [1], [0, 0, 1, 1], [], []>} : vector<256x128xbf16>, vector<128x128xbf16>, vector<256x128xf32> -> vector<256x128xf32>
    %42 = arith.addf %37, %41 : vector<256x128xf32>
    %c1_45 = arith.constant 1 : index
    %c9_46 = arith.constant 9 : index
    %c0_47 = arith.constant 0 : index
    %43 = vector.load %arg10[%c1_45, %c9_46, %c0_47] : memref<18x32x128xbf16, #tpu.memory_space<vmem>>, vector<16x16x128xbf16>
    %44 = vector.shape_cast %43 : vector<16x16x128xbf16> to vector<256x128xbf16>
    %c640 = arith.constant 640 : index
    %c0_48 = arith.constant 0 : index
    %45 = vector.load %arg4[%c640, %c0_48] : memref<1152x128xbf16, #tpu.memory_space<vmem>>, vector<128x128xbf16>
    %cst_49 = arith.constant dense<0.000000e+00> : vector<256x128xf32>
    %46 = tpu.matmul %44, %45, %cst_49 {dimension_numbers = #tpu.dot_dimension_numbers<[1], [0], [0], [1], [0, 0, 1, 1], [], []>} : vector<256x128xbf16>, vector<128x128xbf16>, vector<256x128xf32> -> vector<256x128xf32>
    %47 = arith.addf %42, %46 : vector<256x128xf32>
    %c2 = arith.constant 2 : index
    %c7_50 = arith.constant 7 : index
    %c0_51 = arith.constant 0 : index
    %48 = vector.load %arg10[%c2, %c7_50, %c0_51] : memref<18x32x128xbf16, #tpu.memory_space<vmem>>, vector<16x16x128xbf16>
    %49 = vector.shape_cast %48 : vector<16x16x128xbf16> to vector<256x128xbf16>
    %c768 = arith.constant 768 : index
    %c0_52 = arith.constant 0 : index
    %50 = vector.load %arg4[%c768, %c0_52] : memref<1152x128xbf16, #tpu.memory_space<vmem>>, vector<128x128xbf16>
    %cst_53 = arith.constant dense<0.000000e+00> : vector<256x128xf32>
    %51 = tpu.matmul %49, %50, %cst_53 {dimension_numbers = #tpu.dot_dimension_numbers<[1], [0], [0], [1], [0, 0, 1, 1], [], []>} : vector<256x128xbf16>, vector<128x128xbf16>, vector<256x128xf32> -> vector<256x128xf32>
    %52 = arith.addf %47, %51 : vector<256x128xf32>
    %c2_54 = arith.constant 2 : index
    %c8_55 = arith.constant 8 : index
    %c0_56 = arith.constant 0 : index
    %53 = vector.load %arg10[%c2_54, %c8_55, %c0_56] : memref<18x32x128xbf16, #tpu.memory_space<vmem>>, vector<16x16x128xbf16>
    %54 = vector.shape_cast %53 : vector<16x16x128xbf16> to vector<256x128xbf16>
    %c896 = arith.constant 896 : index
    %c0_57 = arith.constant 0 : index
    %55 = vector.load %arg4[%c896, %c0_57] : memref<1152x128xbf16, #tpu.memory_space<vmem>>, vector<128x128xbf16>
    %cst_58 = arith.constant dense<0.000000e+00> : vector<256x128xf32>
    %56 = tpu.matmul %54, %55, %cst_58 {dimension_numbers = #tpu.dot_dimension_numbers<[1], [0], [0], [1], [0, 0, 1, 1], [], []>} : vector<256x128xbf16>, vector<128x128xbf16>, vector<256x128xf32> -> vector<256x128xf32>
    %57 = arith.addf %52, %56 : vector<256x128xf32>
    %c2_59 = arith.constant 2 : index
    %c9_60 = arith.constant 9 : index
    %c0_61 = arith.constant 0 : index
    %58 = vector.load %arg10[%c2_59, %c9_60, %c0_61] : memref<18x32x128xbf16, #tpu.memory_space<vmem>>, vector<16x16x128xbf16>
    %59 = vector.shape_cast %58 : vector<16x16x128xbf16> to vector<256x128xbf16>
    %c1024 = arith.constant 1024 : index
    %c0_62 = arith.constant 0 : index
    %60 = vector.load %arg4[%c1024, %c0_62] : memref<1152x128xbf16, #tpu.memory_space<vmem>>, vector<128x128xbf16>
    %cst_63 = arith.constant dense<0.000000e+00> : vector<256x128xf32>
    %61 = tpu.matmul %59, %60, %cst_63 {dimension_numbers = #tpu.dot_dimension_numbers<[1], [0], [0], [1], [0, 0, 1, 1], [], []>} : vector<256x128xbf16>, vector<128x128xbf16>, vector<256x128xf32> -> vector<256x128xf32>
    %62 = arith.addf %57, %61 : vector<256x128xf32>
    %c0_64 = arith.constant 0 : index
    %c0_65 = arith.constant 0 : index
    %63 = vector.load %arg5[%c0_64, %c0_65] : memref<1x128xf32, #tpu.memory_space<vmem>>, vector<1x128xf32>
    %64 = vector.broadcast %63 : vector<1x128xf32> to vector<256x128xf32>
    %65 = arith.addf %62, %64 : vector<256x128xf32>
    %cst_66 = arith.constant 0.000000e+00 : f32
    %66 = vector.broadcast %cst_66 : f32 to vector<256x128xf32>
    %67 = arith.maximumf %65, %66 : vector<256x128xf32>
    %68 = arith.truncf %67 : vector<256x128xf32> to vector<256x128xbf16>
    %c0_67 = arith.constant 0 : index
    %c0_68 = arith.constant 0 : index
    %69 = vector.load %arg6[%c0_67, %c0_68] : memref<128x128xbf16, #tpu.memory_space<vmem>>, vector<128x128xbf16>
    %cst_69 = arith.constant dense<0.000000e+00> : vector<256x128xf32>
    %70 = tpu.matmul %68, %69, %cst_69 {dimension_numbers = #tpu.dot_dimension_numbers<[1], [0], [0], [1], [0, 0, 1, 1], [], []>} : vector<256x128xbf16>, vector<128x128xbf16>, vector<256x128xf32> -> vector<256x128xf32>
    %c0_70 = arith.constant 0 : index
    %c0_71 = arith.constant 0 : index
    %71 = vector.load %arg8[%c0_70, %c0_71] : memref<1x128xf32, #tpu.memory_space<vmem>>, vector<1x128xf32>
    %72 = vector.broadcast %71 : vector<1x128xf32> to vector<256x128xf32>
    %73 = arith.addf %70, %72 : vector<256x128xf32>
    %c0_72 = arith.constant 0 : index
    %c0_73 = arith.constant 0 : index
    %74 = vector.load %arg7[%c0_72, %c0_73] : memref<128x128xbf16, #tpu.memory_space<vmem>>, vector<128x128xbf16>
    %cst_74 = arith.constant dense<0.000000e+00> : vector<256x128xf32>
    %75 = tpu.matmul %2, %74, %cst_74 {dimension_numbers = #tpu.dot_dimension_numbers<[1], [0], [0], [1], [0, 0, 1, 1], [], []>} : vector<256x128xbf16>, vector<128x128xbf16>, vector<256x128xf32> -> vector<256x128xf32>
    %76 = arith.addf %73, %75 : vector<256x128xf32>
    %cst_75 = arith.constant 0.000000e+00 : f32
    %77 = vector.broadcast %cst_75 : f32 to vector<256x128xf32>
    %78 = arith.maximumf %76, %77 : vector<256x128xf32>
    %79 = vector.shape_cast %78 : vector<256x128xf32> to vector<16x16x128xf32>
    %80 = arith.truncf %79 : vector<16x16x128xf32> to vector<16x16x128xbf16>
    %c0_76 = arith.constant 0 : index
    %c0_77 = arith.constant 0 : index
    %c0_78 = arith.constant 0 : index
    %c0_79 = arith.constant 0 : index
    %81 = vector.load %arg9[%c0_76, %c0_77, %c0_78, %c0_79] : memref<1x16x16x128xbf16, #tpu.memory_space<vmem>>, vector<1x16x16x128xbf16>
    %82 = vector.shape_cast %81 : vector<1x16x16x128xbf16> to vector<16x16x128xbf16>
    %83 = vector.shape_cast %80 : vector<16x16x128xbf16> to vector<1x16x16x128xbf16>
    tpu.vector_store %arg9[%c0_76, %c0_77, %c0_78, %c0_79], %83 {strides = array<i32>} : memref<1x16x16x128xbf16, #tpu.memory_space<vmem>>, vector<1x16x16x128xbf16>,
    return
  }
  func.func @transform_0(%arg0: i32) -> (i32, i32, i32, i32) {
    %c0_i32 = arith.constant 0 : i32
    %c0_i32_0 = arith.constant 0 : i32
    %c0_i32_1 = arith.constant 0 : i32
    %c0_i32_2 = arith.constant 0 : i32
    return %arg0, %c0_i32, %c0_i32_0, %c0_i32_1 : i32, i32, i32, i32
  }
  func.func @transform_1(%arg0: i32) -> (i32, i32) {
    %c0_i32 = arith.constant 0 : i32
    %c0_i32_0 = arith.constant 0 : i32
    %c0_i32_1 = arith.constant 0 : i32
    return %c0_i32, %c0_i32_0 : i32, i32
  }
  func.func @transform_2(%arg0: i32) -> (i32, i32) {
    %c0_i32 = arith.constant 0 : i32
    %c0_i32_0 = arith.constant 0 : i32
    %c0_i32_1 = arith.constant 0 : i32
    return %c0_i32, %c0_i32_0 : i32, i32
  }
  func.func @transform_3(%arg0: i32) -> (i32, i32) {
    %c0_i32 = arith.constant 0 : i32
    %c0_i32_0 = arith.constant 0 : i32
    %c0_i32_1 = arith.constant 0 : i32
    return %c0_i32, %c0_i32_0 : i32, i32
  }
  func.func @transform_4(%arg0: i32) -> (i32, i32) {
    %c0_i32 = arith.constant 0 : i32
    %c0_i32_0 = arith.constant 0 : i32
    %c0_i32_1 = arith.constant 0 : i32
    return %c0_i32, %c0_i32_0 : i32, i32
  }
  func.func @transform_5(%arg0: i32) -> (i32, i32) {
    %c0_i32 = arith.constant 0 : i32
    %c0_i32_0 = arith.constant 0 : i32
    %c0_i32_1 = arith.constant 0 : i32
    return %c0_i32, %c0_i32_0 : i32, i32
  }
  func.func @transform_6(%arg0: i32) -> (i32, i32) {
    %c0_i32 = arith.constant 0 : i32
    %c0_i32_0 = arith.constant 0 : i32
    %c0_i32_1 = arith.constant 0 : i32
    return %c0_i32, %c0_i32_0 : i32, i32
  }
  func.func @transform_7(%arg0: i32) -> (i32, i32) {
    %c0_i32 = arith.constant 0 : i32
    %c0_i32_0 = arith.constant 0 : i32
    %c0_i32_1 = arith.constant 0 : i32
    return %c0_i32, %c0_i32_0 : i32, i32
  }
  func.func @transform_8(%arg0: i32) -> (i32, i32, i32, i32) {
    %c0_i32 = arith.constant 0 : i32
    %c0_i32_0 = arith.constant 0 : i32
    %c0_i32_1 = arith.constant 0 : i32
    %c0_i32_2 = arith.constant 0 : i32
    return %arg0, %c0_i32, %c0_i32_0, %c0_i32_1 : i32, i32, i32, i32
  }
}

</mosaic_0001>

<bundles_post_ra>
// kernel: tpu_custom_call.1
= control target key start
LH: loop header
LB: loop body
LE: loop exit
PB: predicated region body
PF: predicated region fallthrough
CT: control target
= control target key end

     0   :  { %13 = vsyncpa [#allocation4], 0  ;;  %s9610_s0 = inlined_call_operand.hbm [shape: bf16[2,16,16,128], index: 0, kind: input, shape index: {}]   ;;  %s9611_s1 = inlined_call_operand.hbm [shape: bf16[128,128], index: 1, kind: input, shape index: {}]   ;;  %s9612_s2 = inlined_call_operand.vmem [shape: f32[1,128], index: 2, kind: input, shape index: {}]   ;;  %s9613_s3 = inlined_call_operand.hbm [shape: bf16[1152,128], index: 3, kind: input, shape index: {}]   ;;  %s9614_s4 = inlined_call_operand.vmem [shape: f32[1,128], index: 4, kind: input, shape index: {}]   ;;  %s9615_s5 = inlined_call_operand.hbm [shape: bf16[128,128], index: 5, kind: input, shape index: {}]   ;;  %s9616_s6 = inlined_call_operand.hbm [shape: bf16[128,128], index: 6, kind: input, shape index: {}]   ;;  %s9617_s7 = inlined_call_operand.vmem [shape: f32[1,128], index: 7, kind: input, shape index: {}]   ;;  %s9618_s8 = inlined_call_operand.hbm [shape: bf16[2,16,16,128], index: 8, kind: output, shape index: {}]  }
   0x1   :  { %15 = vsyncpa [#allocation4 + $0x1], 0 }
   0x2   :  { %16 = vsyncpa [#allocation7], 0 }
   0x3   :  { %17 = vsyncpa [#allocation10], 0 }
   0x4   :  { %18 = vsyncpa [#allocation5], 0 }
   0x5   :  { %20 = vsyncpa [#allocation5 + $0x1], 0  ;;  %s8324_s27 = smov 0   ;;  %s8326_s28 = smov 0  }
   0x6   :  { %s8328_s29 = smov 0   ;;  %s8330_s30 = smov 0  }
   0x7 LB: > { %9624 = sst [smem:[#allocation17_spill]] %s8254_s27  ;;  %s8345_s9 = sadd.s32 4294967295, %s8266_s30   ;;  %s8266_s30 = sphi %s8330_s30, %s9651_s30   ;;  %s8262_s29 = sphi %s8328_s29, %s9650_s29   ;;  %s8258_s28 = sphi %s8326_s28, %s9649_s28   ;;  %s8254_s27 = sphi %s8324_s27, %s9648_s27  }
   0x8   : > { %s6332_s10 = sadd.s32 4294967294, %s8266_s30   ;;  %p46_p0 = scmp.ne.s32.totalorder %s8258_s28, %s8254_s27 }
   0x9   : > { %p9619_p1 = scmp.eq.s32.totalorder %s8345_s9, 0  ;;  %p223_p3 = scmp.eq.s32.totalorder %s6332_s10, 1 }
   0xa   : > { %p6333_p5 = scmp.ge.s32.totalorder %s8266_s30, 1  ;;  %p230_p7 = scmp.lt.s32.totalorder %s8266_s30, 3 }
   0xb   : > { %p8354_p4 = por %p9619_p1, %p46_p0  ;;  %p8359_p6 = por %p223_p3, %p46_p0 }
   0xc   : > { %p8364_p8 = pnand %p6333_p5, %p230_p7  ;;  %s8268_s14 = smov [#allocation6]  }
   0xd   : > { %s9625_s11 = scalar_select %p8354_p4, 1, 0 }
   0xe   : > { %s9626_s12 = scalar_select %p8359_p6, 1, 0 }
   0xf   : > { %s9628_s13 = scalar_select %p8364_p8, 1, 0 }
  0x10   : > { %9627 = sst [smem:[#allocation18_spill]] %s9626_s12  ;;  %s242_s15 = sshll.u32 %s8268_s14, 4  ;;  %s8368_s15 = int_to_ptr.vmem [resolvable:$true] %s242_s15 }
  0x11   : > { %p7834_p9 = pneg %p8364_p8  ;;  %s8269_s17 = smov [#allocation9]  }
  0x12   : > { %s274_s18 = sshll.u32 %s8269_s17, 4  ;;  %s8270_s19 = smov [#allocation8]   ;;  %s8379_s18 = int_to_ptr.vmem [resolvable:$true] %s274_s18 }
  0x13   : > { %p8375_p11 = pnand %p7834_p9, %p9619_p1  ;;  %s8381_s20 = sshll.u32 %s8270_s19, 4  ;;  %s259_s20 = int_to_ptr.vmem [resolvable:$true] %s8381_s20 }
  0x14   : > { %s8050_s23 = scalar_lea.hbm %s9611_s1, 1024 }
  0x15   : > { %p8051_p12 = scmp.ne.s32.totalorder %s9611_s1, %s8050_s23  ;;  %p8391_p13 = pneg %p8375_p11 }
  0x16   : > { %p8057_p5 = scmp.lt.u32.totalorder %s8050_s23, %s9611_s1 }
  0x17   : > { %p8053_p0 = pnand %p8391_p13, %p8051_p12 }
  0x19   : > { %p8054_p3 = pneg %p8053_p0 }
  0x1b   : > { %p8059_p7 = pnand %p8057_p5, %p8054_p3 }
  0x1d   : > { %8062 = shalt.err (!%p8059_p7)
}
  0x1e   : > { %s8063_s17 = scalar_lea.vmem %s8368_s15, 1024  ;;  %p8071_p2 = scmp.lt.s32.totalorder %s8368_s15, %s8368_s15 }
  0x1f   : > { %p8064_p9 = scmp.ne.s32.totalorder %s8368_s15, %s8063_s17  ;;  %p8072_p6 = scmp.lt.s32.totalorder %s8063_s17, %s8063_s17 }
  0x21   : > { %p8066_p10 = pnand %p8064_p9, %p8391_p13  ;;  %p8073_p12 = por %p8072_p6, %p8071_p2 }
  0x23   : > { %p8067_p1 = pneg %p8066_p10 }
  0x25   : > { %p8074_p0 = pnand %p8073_p12, %p8067_p1 }
  0x27   : > { %8077 = shalt.err (!%p8074_p0)
}
  0x28   : > { %s8271_s19 = smov 64   ;;  %s8272_s21 = smov 4  }
  0x29   : > { %7837 = dma.hbm_to_vmem [thread:$0]  (!%p8375_p11), %s9611_s1, 1024, %s8368_s15, [#allocation7], %s8271_s19, %s8271_s19, %s8272_s21  }
  0x2a   : > { %s8078_s10 = scalar_lea.hbm %s9615_s5, 1024 }
  0x2b   : > { %p8079_p1 = scmp.ne.s32.totalorder %s9615_s5, %s8078_s10  ;;  %p8085_p10 = scmp.lt.u32.totalorder %s8078_s10, %s9615_s5 }
  0x2d   : > { %p8081_p2 = pnand %p8079_p1, %p8391_p13 }
  0x2f   : > { %p8082_p6 = pneg %p8081_p2 }
  0x31   : > { %p8087_p3 = pnand %p8085_p10, %p8082_p6 }
  0x33   : > { %8090 = shalt.err (!%p8087_p3)
}
  0x34   : > { %s8091_s15 = scalar_lea.vmem %s8379_s18, 1024  ;;  %p8099_p12 = scmp.lt.s32.totalorder %s8379_s18, %s8379_s18 }
  0x35   : > { %p8092_p5 = scmp.ne.s32.totalorder %s8379_s18, %s8091_s15  ;;  %p8100_p0 = scmp.lt.s32.totalorder %s8091_s15, %s8091_s15 }
  0x37   : > { %p8094_p7 = pnand %p8092_p5, %p8391_p13  ;;  %p8101_p1 = por %p8100_p0, %p8099_p12 }
  0x39   : > { %p8095_p9 = pneg %p8094_p7 }
  0x3b   : > { %p8102_p2 = pnand %p8101_p1, %p8095_p9 }
  0x3d   : > { %8105 = shalt.err (!%p8102_p2)
}
  0x3e   : > { %7843 = dma.hbm_to_vmem [thread:$0]  (!%p8375_p11), %s9615_s5, 1024, %s8379_s18, [#allocation10], %s8271_s19, %s8271_s19, %s8272_s21  }
  0x3f   : > { %s8106_s24 = scalar_lea.hbm %s9613_s3, 9216 }
  0x40   : > { %p8107_p6 = scmp.ne.s32.totalorder %s9613_s3, %s8106_s24  ;;  %p8113_p5 = scmp.lt.u32.totalorder %s8106_s24, %s9613_s3 }
  0x42   : > { %p8109_p10 = pnand %p8107_p6, %p8391_p13 }
  0x44   : > { %p8110_p3 = pneg %p8109_p10 }
  0x46   : > { %p8115_p7 = pnand %p8113_p5, %p8110_p3 }
  0x48   : > { %8118 = shalt.err (!%p8115_p7)
}
  0x49   : > { %s8119_s15 = scalar_lea.vmem %s259_s20, 9216  ;;  %p8127_p1 = scmp.lt.s32.totalorder %s259_s20, %s259_s20 }
  0x4a   : > { %p8120_p9 = scmp.ne.s32.totalorder %s259_s20, %s8119_s15  ;;  %p8128_p2 = scmp.lt.s32.totalorder %s8119_s15, %s8119_s15 }
  0x4c   : > { %p8122_p12 = pnand %p8120_p9, %p8391_p13  ;;  %p8129_p4 = por %p8128_p2, %p8127_p1 }
  0x4e   : > { %p8123_p0 = pneg %p8122_p12 }
  0x50   : > { %p8130_p8 = pnand %p8129_p4, %p8123_p0 }
  0x52   : > { %8133 = shalt.err (!%p8130_p8)
}
  0x53   : > { %7840 = dma.hbm_to_vmem [thread:$0]  (!%p8375_p11), %s9613_s3, 9216, %s259_s20, [#allocation7], %s8271_s19, %s8271_s19, %s8272_s21  }
  0x54   : > { %s8273_s12 = smov [#allocation11]   ;;  %s8134_s25 = scalar_lea.hbm %s9616_s6, 1024 }
  0x55   : > { %s287_s22 = sshll.u32 %s8273_s12, 4  ;;  %p8135_p4 = scmp.ne.s32.totalorder %s9616_s6, %s8134_s25  ;;  %s288_s22 = int_to_ptr.vmem [resolvable:$true] %s287_s22 }
  0x56   : > { %p8141_p10 = scmp.lt.u32.totalorder %s8134_s25, %s9616_s6 }
  0x57   : > { %p8137_p8 = pnand %p8135_p4, %p8391_p13 }
  0x59   : > { %p8138_p6 = pneg %p8137_p8 }
  0x5b   : > { %p8143_p3 = pnand %p8141_p10, %p8138_p6 }
  0x5d   : > { %8146 = shalt.err (!%p8143_p3)
}
  0x5e   : > { %s8147_s20 = scalar_lea.vmem %s288_s22, 1024  ;;  %p8155_p12 = scmp.lt.s32.totalorder %s288_s22, %s288_s22 }
  0x5f   : > { %p8148_p5 = scmp.ne.s32.totalorder %s288_s22, %s8147_s20  ;;  %p8156_p0 = scmp.lt.s32.totalorder %s8147_s20, %s8147_s20 }
  0x61   : > { %p8150_p7 = pnand %p8148_p5, %p8391_p13  ;;  %p8157_p1 = por %p8156_p0, %p8155_p12 }
  0x63   : > { %p8151_p9 = pneg %p8150_p7 }
  0x65   : > { %p8158_p2 = pnand %p8157_p1, %p8151_p9 }
  0x67   : > { %8161 = shalt.err (!%p8158_p2)
}
  0x68   : > { %7846 = dma.hbm_to_vmem [thread:$0]  (!%p8375_p11), %s9616_s6, 1024, %s288_s22, [#allocation10], %s8271_s19, %s8271_s19, %s8272_s21  }
  0x69   : > { %s8485_s26 = sadd.s32 1, %s8266_s30   ;;  %s33_s16 = sadd.s32 1, %s8262_s29 }
  0x6a   : > { %s30_s12 = ssub.s32 %s8266_s30, %s8485_s26  ;;  %p40_p13 = scmp.ne.s32.totalorder %s8262_s29, %s8258_s28 }
  0x6b   : > { %p31_p4 = scmp.eq.s32.totalorder %s30_s12, 0  ;;  %p41_p8 = scmp.eq.s32.totalorder %s8266_s30, 0 }
  0x6c   : > { %p9631_p6 = scmp.eq.s32.totalorder %s8345_s9, 1  ;;  %p7859_p3 = scmp.lt.s32.totalorder %s8266_s30, 2 }
  0x6d   : > { %s8501_s24 = scalar_select %p31_p4, %s8262_s29, %s33_s16  }
  0x6e   : > { %p8495_p10 = por %p9631_p6, %p40_p13  ;;  %p42_p5 = por %p41_p8, %p40_p13 }
  0x6f   : > { %s304_s25 = sand.u32 1, %s8262_s29   ;;  %s6501_s22 = sshll.u32 %s8266_s30, 11 }
  0x70   : > { %s6339_s10 = sshll.u32 %s304_s25, 7  ;;  %s8508_s15 = scalar_lea.hbm %s9610_s0, %s6501_s22 }
  0x71   : > { %s308_s20 = scalar_lea.vmem [#allocation3], %s6339_s10  ;;  %p8512_p11 = pnand %p7859_p3, %p42_p5 }
  0x72   : > { %s315_s18 = sshll.u32 %s308_s20, 4  ;;  %s8516_s16 = scalar_lea.sflag [#allocation4], %s304_s25  ;;  %s8510_s18 = int_to_ptr.vmem [resolvable:$true] %s315_s18 }
  0x73   : > { %s8162_s12 = scalar_lea.hbm %s8508_s15, 2048  ;;  %p8164_p9 = pneg %p8512_p11 }
  0x74   : > { %p8163_p7 = scmp.ne.s32.totalorder %s8508_s15, %s8162_s12  ;;  %s8167_s14 = scalar_lea.hbm %s9610_s0, 4096 }
  0x75   : > { %p8168_p1 = scmp.lt.u32.totalorder %s8508_s15, %s9610_s0  ;;  %p8169_p2 = scmp.lt.u32.totalorder %s8167_s14, %s8162_s12 }
  0x76   : > { %p8165_p12 = pnand %p8164_p9, %p8163_p7  ;;  %p8171_p4 = scmp.lt.u32.totalorder %s8162_s12, %s8508_s15 }
  0x77   : > { %p8170_p13 = por %p8169_p2, %p8168_p1 }
  0x78   : > { %p8166_p0 = pneg %p8165_p12 }
  0x79   : > { %p8172_p8 = por %p8171_p4, %p8170_p13 }
  0x7b   : > { %p8173_p6 = pnand %p8172_p8, %p8166_p0 }
  0x7d   : > { %8176 = shalt.err (!%p8173_p6)
}
  0x7e   : > { %s8177_s25 = scalar_lea.vmem %s8510_s18, 2048  ;;  %s8274_s10 = smov [#allocation3]  }
  0x7f   : > { %p8178_p3 = scmp.ne.s32.totalorder %s8510_s18, %s8177_s25  ;;  %s8182_s22 = sshll.u32 %s8274_s10, 4  ;;  %s8183_s22 = int_to_ptr.vmem [resolvable:$false] %s8182_s22 }
  0x80   : > { %s8184_s17 = scalar_lea.vmem %s8183_s22, 4096  ;;  %p8185_p12 = scmp.lt.s32.totalorder %s8510_s18, %s8183_s22 }
  0x81   : > { %p8180_p5 = pnand %p8178_p3, %p8164_p9  ;;  %p8186_p1 = scmp.lt.s32.totalorder %s8184_s17, %s8177_s25 }
  0x83   : > { %p8181_p7 = pneg %p8180_p5  ;;  %p8187_p2 = por %p8186_p1, %p8185_p12 }
  0x85   : > { %p8188_p13 = pnand %p8187_p2, %p8181_p7 }
  0x87   : > { %8191 = shalt.err (!%p8188_p13)
}
  0x88   : > { %7850 = dma.hbm_to_vmem [thread:$0]  (!%p8512_p11), %s8508_s15, 2048, %s8510_s18, %s8516_s16, %s8271_s19, %s8271_s19, %s8272_s21  }
  0x89   : > { %p9634_p9 = scmp.ne.s32.totalorder %s9628_s13, 0 }
  0x8a   : > { %s8550_s12 = sand.u32 (!%p9634_p9), 1, %s8258_s28   ;;  %p9635_p0 = scmp.ne.s32.totalorder (!%p9634_p9), %s9625_s11, 0 }
  0x8b   : > { %327 = sbr.rel (%p9634_p9) target bundleno = 1360 (0x550), region = 52  ;;  %s6343_s14 = sshll.u32 (!%p9634_p9), %s8550_s12, 7 }
  0x8c   : > { %s330_s20 = scalar_lea.sflag (!%p9634_p9), [#allocation4], %s8550_s12  ;;  %s8556_s27 = scalar_lea.vmem (!%p9634_p9), [#allocation3], %s6343_s14 }
  0x92   : > { %8237 = dma.done.wait (%p9635_p0), %s330_s20, 2048  }
  0x93   : > { %8239 = vsyncadd (%p9635_p0), %s330_s20, 4294965248  ;;  %p9636_p11 = scmp.eq.s32.totalorder %s8345_s9, 0 }
  0x95   : > { %8241 = dma.done.wait (%p9636_p11), [#allocation7], 10240   ;;  %p9637_p4 = pmov %p9636_p11 }
  0x97   : > { %8243 = vsyncadd (%p9637_p4), [#allocation7], 4294957056  ;;  %p9638_p8 = pmov %p9637_p4 }
  0x98   : > { %p9639_p6 = pmov %p9637_p4 }
  0x99   : > { %8245 = dma.done.wait (%p9638_p8), [#allocation10], 2048  }
  0x9a   : > { %8247 = vsyncadd (%p9639_p6), [#allocation10], 4294965248  ;;  %v7906_v0 = vld [vmem:[#allocation6] sm:$0xff]   ;;  %v7907_v1 = vld [vmem:[#allocation6 + $0x8] sm:$0xff]   ;;  %vm877_vm0 = vcmask 1043459   ;;  %v8275_v35 = vmov 0  }
  0x9b   : > { %6918 = vmatprep.subr.bf16.mxu0 %v7906_v0  ;;  %v7908_v2 = vld [vmem:[#allocation6 + $0x10] sm:$0xff]   ;;  %v7909_v3 = vld [vmem:[#allocation6 + $0x18] sm:$0xff]   ;;  %v7914_v4 = vld [vmem:[%s8556_s27] sm:$0xff]   ;;  %vm878_vm1 = vsmask.f32 7950  ;;  %872 = vst [vmem:[#allocation2] sm:$0xff] %v8275_v35 }
  0x9c   : > { %6919 = vmatpush3.bf16.msra.mxu0 %v7906_v0  ;;  %6934 = vmatprep.mubr.bf16.mxu0 %v7914_v4  ;;  %v7910_v5 = vld [vmem:[#allocation6 + $0x20] sm:$0xff]   ;;  %v7911_v6 = vld [vmem:[#allocation6 + $0x28] sm:$0xff]   ;;  %v7912_v7 = vld [vmem:[#allocation6 + $0x30] sm:$0xff]   ;;  %873 = vst [vmem:[#allocation2 + $0x8] sm:$0xff] %v8275_v35  ;;  %vm1363_vm3 = vcmask 1043456   ;;  %vm928_vm5 = vcmask 1044484  }
  0x9d   : > { %6920 = vmatprep.subr.bf16.mxu0 %v7907_v1  ;;  %v7913_v8 = vld [vmem:[#allocation6 + $0x38] sm:$0xff]   ;;  %v7932_v9 = vld [vmem:[#allocation8 + $0xc0] sm:$0xff]   ;;  %v7915_v11 = vld [vmem:[%s8556_s27 + $0x8] sm:$0xff]   ;;  %875 = vst [vmem:[#allocation2 + $0x110] sm:$0xff] %v8275_v35  ;;  %vm929_vm4 = vsmask.f32 4352 }
  0x9e   : > { %v7930_v10 = vld [vmem:[#allocation8 + $0x40] sm:$0xff]   ;;  %7110 = vmatprep.subr.bf16.mxu1 %v7932_v9  ;;  %v7934_v12 = vld [vmem:[#allocation8 + $0xc8] sm:$0xff]   ;;  %v7916_v13 = vld [vmem:[%s8556_s27 + $0x10] sm:$0xff]   ;;  %876 = vst [vmem:[#allocation2 + $0x118] sm:$0xff] %v8275_v35  ;;  %vm1878_vm7 = vsmask.f32 3328 }
  0x9f   : > { %7111 = vmatpush3.bf16.msra.mxu1 %v7932_v9  ;;  %v7931_v14 = vld [vmem:[#allocation8 + $0x48] sm:$0xff]   ;;  %v7933_v15 = vld [vmem:[#allocation8 + $0x50] sm:$0xff]   ;;  %v7917_v16 = vld [vmem:[%s8556_s27 + $0x18] sm:$0xff]   ;;  %s9513_s16 = scalar_lea.vmem [#allocation12], %s6343_s14  ;;  %s6534_s25 = sshll.u32 %s8345_s9, 11 }
  0xa0   : > { %6921 = vmatpush3.bf16.msra.mxu0 %v7907_v1  ;;  %7112 = vmatprep.subr.bf16.mxu1 %v7934_v12  ;;  %v7918_v17 = vld [vmem:[%s8556_s27 + $0x20] sm:$0xff]   ;;  %v7919_v18 = vld [vmem:[%s8556_s27 + $0x28] sm:$0xff]   ;;  %v7920_v19 = vld [vmem:[%s8556_s27 + $0x30] sm:$0xff]   ;;  %s6221_s10 = sshll.u32 %s9513_s16, 4  ;;  %s9562_s14 = scalar_lea.hbm %s9618_s8, %s6534_s25  ;;  %s9564_s10 = int_to_ptr.vmem [resolvable:$true] %s6221_s10 }
  0xa1   : > { %6922 = vmatprep.subr.bf16.mxu0 %v7908_v2  ;;  %v7921_v20 = vld [vmem:[%s8556_s27 + $0x38] sm:$0xff]   ;;  %v7922_v21 = vld [vmem:[%s8556_s27 + $0x40] sm:$0xff]   ;;  %v7923_v22 = vld [vmem:[%s8556_s27 + $0x48] sm:$0xff]   ;;  %s6208_s9 = scalar_lea.sflag [#allocation5], %s8550_s12  ;;  %s8192_s20 = scalar_lea.vmem %s9564_s10, 2048 }
  0xa2   : > { %v7924_v23 = vld [vmem:[%s8556_s27 + $0x50] sm:$0xff]   ;;  %v7925_v24 = vld [vmem:[%s8556_s27 + $0x58] sm:$0xff]   ;;  %v7926_v25 = vld [vmem:[%s8556_s27 + $0x60] sm:$0xff]   ;;  %p8193_p3 = scmp.ne.s32.totalorder %s9564_s10, %s8192_s20 }
  0xa3   : > { %7113 = vmatpush3.bf16.msra.mxu1 %v7934_v12  ;;  %v7927_v26 = vld [vmem:[%s8556_s27 + $0x68] sm:$0xff]   ;;  %v7928_v27 = vld [vmem:[%s8556_s27 + $0x70] sm:$0xff]   ;;  %v7929_v28 = vld [vmem:[%s8556_s27 + $0x78] sm:$0xff]  }
  0xa4   : > { %6923 = vmatpush3.bf16.msra.mxu0 %v7908_v2  ;;  %v7935_v29 = vld [vmem:[#allocation8 + $0x58] sm:$0xff]   ;;  %v7936_v30 = vld [vmem:[#allocation8 + $0xd0] sm:$0xff]   ;;  %v7937_v31 = vld [vmem:[#allocation8 + $0x60] sm:$0xff]   ;;  %p8194_p5 = pnand %p8193_p3, %p8495_p10 }
  0xa5   : > { %6924 = vmatprep.subr.bf16.mxu0 %v7909_v3  ;;  %7114 = vmatprep.subr.bf16.mxu1 %v7936_v30  ;;  %v7938_v32 = vld [vmem:[#allocation8 + $0xd8] sm:$0xff]   ;;  %v7939_v33 = vld [vmem:[#allocation8 + $0x68] sm:$0xff]   ;;  %v7940_v34 = vld [vmem:[#allocation8 + $0xe0] sm:$0xff]  }
  0xa6   : > { %vm8586_vm2 = vmand %vm877_vm0, %vm878_vm1  ;;  %v880_v37 = vld [vmem:[#allocation2 + $0x10] sm:$0x8]  ;;  %v883_v38 = vld [vmem:[#allocation2 + $0x20] sm:$0x8]  ;;  %p8195_p7 = pneg %p8194_p5 }
  0xa7   : > { %7115 = vmatpush3.bf16.msra.mxu1 %v7936_v30  ;;  %v7941_v39 = vld [vmem:[#allocation8 + $0x70] sm:$0xff]   ;;  %v881_v40 = vsel %vm8586_vm2, 0, %v880_v37  ;;  %v884_v41 = vsel %vm8586_vm2, 0, %v883_v38  ;;  %v7942_v42 = vld [vmem:[#allocation8 + $0xe8] sm:$0xff]   ;;  %v7943_v43 = vld [vmem:[#allocation8 + $0x78] sm:$0xff]  }
  0xa8   : > { %6925 = vmatpush3.bf16.msra.mxu0 %v7909_v3  ;;  %7116 = vmatprep.subr.bf16.mxu1 %v7938_v32  ;;  %882 = vst [vmem:[#allocation2 + $0x10] sm:$0x8] %v881_v40  ;;  %885 = vst [vmem:[#allocation2 + $0x20] sm:$0x8] %v884_v41  ;;  %v7944_v44 = vld [vmem:[#allocation8 + $0xf0] sm:$0xff]   ;;  %v7945_v50 = vld [vmem:[#allocation8 + $0xf8] sm:$0xff]  }
  0xa9   : > { %6926 = vmatprep.subr.bf16.mxu0 %v7910_v5  ;;  %v8594_v45 = vld [vmem:[#allocation2 + $0x8] sm:$0xf]  ;;  %v1315_v46 = vld [vmem:[#allocation2] sm:$0xf0]  ;;  %v889_v51 = vld [vmem:[#allocation2 + $0x40] sm:$0x8] }
  0xaa   : > { %v1364_v47 = vrot.slane %v1315_v46, 4  ;;  %v1365_v48 = vrot.slane %v8594_v45, 4  ;;  %v886_v52 = vld [vmem:[#allocation2 + $0x30] sm:$0x8]  ;;  %v890_v53 = vsel %vm8586_vm2, 0, %v889_v51  ;;  %v8602_v55 = vld [vmem:[#allocation8 + $0x100] sm:$0xff]   ;;  %vm8633_vm6 = vmand %vm928_vm5, %vm929_vm4 }
  0xab   : > { %7117 = vmatpush3.bf16.msra.mxu1 %v7938_v32  ;;  %v887_v54 = vsel %vm8586_vm2, 0, %v886_v52  ;;  %891 = vst [vmem:[#allocation2 + $0x40] sm:$0x8] %v890_v53  ;;  %v895_v56 = vld [vmem:[#allocation2 + $0x60] sm:$0x8]  ;;  %v1023_v38 = vshll.u32 %v8594_v45, 16 }
  0xac   : > { %6927 = vmatpush3.bf16.msra.mxu0 %v7910_v5  ;;  %7118 = vmatprep.subr.bf16.mxu1 %v7940_v34  ;;  %v1366_v49 = vsel %vm1363_vm3, %v1364_v47, %v1365_v48  ;;  %888 = vst [vmem:[#allocation2 + $0x30] sm:$0x8] %v887_v54  ;;  %v892_v57 = vld [vmem:[#allocation2 + $0x50] sm:$0x8]  ;;  %v896_v58 = vsel %vm8586_vm2, 0, %v895_v56  ;;  %v8617_v4 = vld [vmem:[#allocation8] sm:$0xff]  }
  0xad   : > { %6928 = vmatprep.subr.bf16.mxu0 %v7911_v6  ;;  %v893_v59 = vsel %vm8586_vm2, 0, %v892_v57  ;;  %897 = vst [vmem:[#allocation2 + $0x60] sm:$0x8] %v896_v58  ;;  %v901_v60 = vld [vmem:[#allocation2 + $0x80] sm:$0x8]  ;;  %v1025_v53 = vrot.slane %v1023_v38, 4 }
  0xae   : > { %894 = vst [vmem:[#allocation2 + $0x50] sm:$0x8] %v893_v59  ;;  %v898_v61 = vld [vmem:[#allocation2 + $0x70] sm:$0x8]  ;;  %v902_v62 = vsel %vm8586_vm2, 0, %v901_v60 }
  0xaf   : > { %7119 = vmatpush3.bf16.msra.mxu1 %v7940_v34  ;;  %v899_v63 = vsel %vm8586_vm2, 0, %v898_v61  ;;  %903 = vst [vmem:[#allocation2 + $0x80] sm:$0x8] %v902_v62  ;;  %v907_v0 = vld [vmem:[#allocation2 + $0xa0] sm:$0x8]  ;;  %v1020_v34 = vshrl.u32 %v8594_v45, 16 }
  0xb0   : > { %6929 = vmatpush3.bf16.msra.mxu0 %v7911_v6  ;;  %7120 = vmatprep.subr.bf16.mxu1 %v7942_v42  ;;  %900 = vst [vmem:[#allocation2 + $0x70] sm:$0x8] %v899_v63  ;;  %v904_v1 = vld [vmem:[#allocation2 + $0x90] sm:$0x8]  ;;  %v908_v2 = vsel %vm8586_vm2, 0, %v907_v0 }
  0xb1   : > { %6930 = vmatprep.subr.bf16.mxu0 %v7912_v7  ;;  %v905_v3 = vsel %vm8586_vm2, 0, %v904_v1  ;;  %909 = vst [vmem:[#allocation2 + $0xa0] sm:$0x8] %v908_v2  ;;  %v913_v5 = vld [vmem:[#allocation2 + $0xc0] sm:$0x8]  ;;  %v1022_v48 = vrot.slane %v1020_v34, 3 }
  0xb2   : > { %906 = vst [vmem:[#allocation2 + $0x90] sm:$0x8] %v905_v3  ;;  %v910_v6 = vld [vmem:[#allocation2 + $0xb0] sm:$0x8]  ;;  %v919_v9 = vld [vmem:[#allocation2 + $0xe0] sm:$0x8] }
  0xb3   : > { %7121 = vmatpush3.bf16.msra.mxu1 %v7942_v42  ;;  %v934_v54 = vld [vmem:[#allocation2 + $0x28] sm:$0x10]  ;;  %v1026_v63 = vor.u32 %v1025_v53, %v1022_v48 }
  0xb4   : > { %6931 = vmatpush3.bf16.msra.mxu0 %v7912_v7  ;;  %7122 = vmatprep.subr.bf16.mxu1 %v7944_v44  ;;  %v914_v7 = vsel %vm8586_vm2, 0, %v913_v5  ;;  %v935_v56 = vsel %vm8633_vm6, 0, %v934_v54 }
  0xb5   : > { %6932 = vmatprep.subr.bf16.mxu0 %v7913_v8  ;;  %915 = vst [vmem:[#allocation2 + $0xc0] sm:$0x8] %v914_v7  ;;  %936 = vst [vmem:[#allocation2 + $0x28] sm:$0x10] %v935_v56 }
  0xb7   : > { %7123 = vmatpush3.bf16.msra.mxu1 %v7944_v44 }
  0xb8   : > { %6933 = vmatpush3.bf16.msra.mxu0 %v7913_v8  ;;  %7124 = vmatprep.subr.bf16.mxu1 %v7945_v50  ;;  %v911_v8 = vsel %vm8586_vm2, 0, %v910_v6 }
  0xb9   : > { %6966 = vmatprep.subr.bf16.mxu0 %v7930_v10  ;;  %912 = vst [vmem:[#allocation2 + $0xb0] sm:$0x8] %v911_v8 }
  0xbb   : > { %6935 = vmatmul.mubr.bf16.vlgmr.msra.gmra.mrb[0].mxu0 %v7915_v11  ;;  %7125 = vmatpush3.bf16.msra.mxu1 %v7945_v50  ;;  %v920_v11 = vsel %vm8586_vm2, 0, %v919_v9 }
  0xbc   : > { %6938 = vmatprep.mubr.bf16.mxu0 %v7916_v13  ;;  %6967 = vmatpush3.bf16.msra.mxu0 %v7930_v10  ;;  %v916_v10 = vld [vmem:[#allocation2 + $0xd0] sm:$0x8]  ;;  %921 = vst [vmem:[#allocation2 + $0xe0] sm:$0x8] %v920_v11  ;;  %v925_v13 = vld [vmem:[#allocation2 + $0x100] sm:$0x8] }
  0xbd   : > { %6968 = vmatprep.subr.bf16.mxu0 %v7931_v14  ;;  %7158 = vmatprep.subr.bf16.mxu1 %v8602_v55  ;;  %v917_v12 = vsel %vm8586_vm2, 0, %v916_v10 }
  0xbe   : > { %918 = vst [vmem:[#allocation2 + $0xd0] sm:$0x8] %v917_v12 }
  0xc0   : > { %6969 = vmatpush3.bf16.msra.mxu0 %v7931_v14  ;;  %v922_v14 = vld [vmem:[#allocation2 + $0xf0] sm:$0x8] }
  0xc1   : > { %6970 = vmatprep.subr.bf16.mxu0 %v7933_v15 }
  0xc3   : > { %6939 = vmatmul.mubr.bf16.gmra.mrb[4].mxu0 %v7917_v16  ;;  %v923_v16 = vsel %vm8586_vm2, 0, %v922_v14 }
  0xc4   : > { %6942 = vmatprep.mubr.bf16.mxu0 %v7918_v17  ;;  %6971 = vmatpush3.bf16.msra.mxu0 %v7933_v15  ;;  %v926_v15 = vsel %vm8586_vm2, 0, %v925_v13  ;;  %924 = vst [vmem:[#allocation2 + $0xf0] sm:$0x8] %v923_v16 }
  0xc5   : > { %6972 = vmatprep.subr.bf16.mxu0 %v7935_v29  ;;  %927 = vst [vmem:[#allocation2 + $0x100] sm:$0x8] %v926_v15 }
  0xc8   : > { %6973 = vmatpush3.bf16.msra.mxu0 %v7935_v29  ;;  %v979_v29 = vld [vmem:[#allocation2] sm:$0xf8] }
  0xc9   : > { %6974 = vmatprep.subr.bf16.mxu0 %v7937_v31  ;;  %v1012_v36 = vshrl.u32 %v979_v29, 16  ;;  %v1015_v37 = vshll.u32 %v979_v29, 16 }
  0xcb   : > { %6943 = vmatmul.mubr.bf16.gmra.mrb[8].mxu0 %v7919_v18  ;;  %v931_v18 = vld [vmem:[#allocation2 + $0x18] sm:$0x10]  ;;  %v1014_v51 = vrot.slane %v1012_v36, 3  ;;  %v1017_v52 = vrot.slane %v1015_v37, 4 }
  0xcc   : > { %6946 = vmatprep.mubr.bf16.mxu0 %v7920_v19  ;;  %6975 = vmatpush3.bf16.msra.mxu0 %v7937_v31  ;;  %v932_v19 = vsel %vm8633_vm6, 0, %v931_v18 }
  0xcd   : > { %6976 = vmatprep.subr.bf16.mxu0 %v7939_v33  ;;  %933 = vst [vmem:[#allocation2 + $0x18] sm:$0x10] %v932_v19  ;;  %v1018_v62 = vor.u32 %v1017_v52, %v1014_v51 }
  0xcf   : > { %v8664_v16 = vsel %vm929_vm4, %v1018_v62, %v1026_v63 }
  0xd0   : > { %6977 = vmatpush3.bf16.msra.mxu0 %v7939_v33 }
  0xd1   : > { %6978 = vmatprep.subr.bf16.mxu0 %v7941_v39 }
  0xd3   : > { %6947 = vmatmul.mubr.bf16.gmra.mrb[12].mxu0 %v7921_v20  ;;  %v8642_v20 = vld [vmem:[%s9612_s2] ss:$0 sm:$0xff] }
  0xd4   : > { %6950 = vmatprep.mubr.bf16.mxu0 %v7922_v21  ;;  %6979 = vmatpush3.bf16.msra.mxu0 %v7941_v39 }
  0xd5   : > { %6980 = vmatprep.subr.bf16.mxu0 %v7943_v43 }
  0xd8   : > { %6981 = vmatpush3.bf16.msra.mxu0 %v7943_v43 }
  0xd9   : > { %7014 = vmatprep.subr.bf16.mxu0 %v8617_v4 }
  0xdb   : > { %6951 = vmatmul.mubr.bf16.gmra.mrb[16].mxu0 %v7923_v22 }
  0xdc   : > { %6954 = vmatprep.mubr.bf16.mxu0 %v7924_v23 }
  0xe3   : > { %6955 = vmatmul.mubr.bf16.gmra.mrb[20].mxu0 %v7925_v24 }
  0xe4   : > { %6958 = vmatprep.mubr.bf16.mxu0 %v7926_v25 }
  0xeb   : > { %6959 = vmatmul.mubr.bf16.gmra.mrb[24].mxu0 %v7927_v26 }
  0xec   : > { %6962 = vmatprep.mubr.bf16.mxu0 %v7928_v27 }
  0xf3   : > { %6963 = vmatmul.mubr.bf16.gmra.mrb[28].mxu0 %v7929_v28 }
  0xf4   : > { %6982 = vmatprep.mubr.bf16.mxu0 %v1366_v49 }
 0x18e   : > { %v6936_v21 = vpop.f32.mrb[0].mxu0 }
 0x18f   : > { %v625_v22 = vadd.f32 %v6936_v21, %v8642_v20  ;;  %v616_v23 = vpop.f32.mrb[1].mxu0 }
 0x190   : > { %v617_v24 = vadd.f32 %v8642_v20, %v616_v23  ;;  %v6937_v25 = vpop.f32.mrb[2].mxu0 }
 0x191   : > { %v628_v26 = vadd.f32 %v6937_v25, %v8642_v20  ;;  %v619_v27 = vpop.f32.mrb[3].mxu0  ;;  %v745_v30 = vmax.f32 %v625_v22, 0.0 }
 0x192   : > { %v620_v28 = vadd.f32 %v8642_v20, %v619_v27  ;;  %v743_v32 = vmax.f32 %v617_v24, 0.0  ;;  %v7951_v24 = vld [vmem:[#allocation8 + $0x8] sm:$0xff]  }
 0x193   : > { %v746_v31 = vmax.f32 %v628_v26, 0.0 }
 0x194   : > { %v744_v33 = vmax.f32 %v620_v28, 0.0 }
 0x195   : > { %v776_v35 = vpack.c.bf16 %v746_v31, %v745_v30 }
 0x196   : > { %v775_v39 = vpack.c.bf16 %v744_v33, %v743_v32  ;;  %v6940_v40 = vpop.f32.mrb[4].mxu0 }
 0x197   : > { %v808_v41 = vrot.slane %v776_v35, 4  ;;  %v641_v42 = vadd.f32 %v6940_v40, %v8642_v20  ;;  %v632_v43 = vpop.f32.mrb[5].mxu0 }
 0x198   : > { %v807_v44 = vrot.slane %v775_v39, 4  ;;  %v633_v46 = vadd.f32 %v8642_v20, %v632_v43  ;;  %v6941_v47 = vpop.f32.mrb[6].mxu0 }
 0x199   : > { %842 = vst [vmem:[#allocation2 + $0x28] ss:$-4 sps:$4 sm:$0xff] %v808_v41   ;;  %v644_v49 = vadd.f32 %v6941_v47, %v8642_v20  ;;  %v635_v50 = vpop.f32.mrb[7].mxu0  ;;  %v749_v57 = vmax.f32 %v641_v42, 0.0 }
 0x19a   : > { %840 = vst [vmem:[#allocation2 + $0x18] ss:$-4 sps:$4 sm:$0xff] %v807_v44   ;;  %v636_v45 = vadd.f32 %v8642_v20, %v635_v50  ;;  %v747_v59 = vmax.f32 %v633_v46, 0.0  ;;  %v7953_v44 = vld [vmem:[#allocation8 + $0x10] sm:$0xff]  }
 0x19b   : > { %v750_v58 = vmax.f32 %v644_v49, 0.0 }
 0x19c   : > { %v748_v60 = vmax.f32 %v636_v45, 0.0 }
 0x19d   : > { %v778_v61 = vpack.c.bf16 %v750_v58, %v749_v57 }
 0x19e   : > { %v777_v0 = vpack.c.bf16 %v748_v60, %v747_v59  ;;  %v6944_v1 = vpop.f32.mrb[8].mxu0 }
 0x19f   : > { %v810_v2 = vrot.slane %v778_v61, 4  ;;  %v657_v3 = vadd.f32 %v6944_v1, %v8642_v20  ;;  %v648_v5 = vpop.f32.mrb[9].mxu0 }
 0x1a0   : > { %v809_v6 = vrot.slane %v777_v0, 4  ;;  %v649_v7 = vadd.f32 %v8642_v20, %v648_v5  ;;  %v6945_v8 = vpop.f32.mrb[10].mxu0  ;;  %v8658_v9 = vld [vmem:[#allocation2 + $0x28] sm:$0xf]  ;;  %v1317_v10 = vld [vmem:[#allocation2 + $0x20] sm:$0xf0] }
 0x1a1   : > { %846 = vst [vmem:[#allocation2 + $0x48] ss:$-4 sps:$4 sm:$0xff] %v810_v2   ;;  %v753_v11 = vmax.f32 %v657_v3, 0.0  ;;  %v660_v12 = vadd.f32 %v6945_v8, %v8642_v20  ;;  %v651_v13 = vpop.f32.mrb[11].mxu0  ;;  %v8661_v14 = vld [vmem:[#allocation2 + $0x18] sm:$0xf] }
 0x1a2   : > { %v1316_v15 = vld [vmem:[#allocation2 + $0x10] sm:$0xf0]  ;;  %844 = vst [vmem:[#allocation2 + $0x38] ss:$-4 sps:$4 sm:$0xff] %v809_v6   ;;  %v751_v18 = vmax.f32 %v649_v7, 0.0  ;;  %v652_v19 = vadd.f32 %v8642_v20, %v651_v13  ;;  %v1368_v22 = vrot.slane %v8661_v14, 4 }
 0x1a3   : > { %v1367_v21 = vrot.slane %v1316_v15, 4  ;;  %v2424_v23 = vld [vmem:[#allocation2 + $0x10] sm:$0xf8]  ;;  %v754_v25 = vmax.f32 %v660_v12, 0.0  ;;  %v1370_v26 = vrot.slane %v1317_v10, 4  ;;  %v1371_v27 = vrot.slane %v8658_v9, 4 }
 0x1a4   : > { %v8669_v28 = vld [vmem:[#allocation2 + $0x18] sm:$0xf]  ;;  %v2457_v29 = vshrl.u32 %v2424_v23, 16  ;;  %v752_v30 = vmax.f32 %v652_v19, 0.0  ;;  %v2460_v32 = vshll.u32 %v2424_v23, 16 }
 0x1a5   : > { %v1369_v31 = vsel %vm1363_vm3, %v1367_v21, %v1368_v22  ;;  %v2465_v33 = vshrl.u32 %v8669_v28, 16  ;;  %v2426_v34 = vld [vmem:[#allocation2 + $0x20] sm:$0xf8]  ;;  %v780_v35 = vpack.c.bf16 %v754_v25, %v753_v11  ;;  %v1372_v36 = vsel %vm1363_vm3, %v1370_v26, %v1371_v27  ;;  %v8677_v50 = vld [vmem:[#allocation2 + $0x28] sm:$0xf]  ;;  %v7954_v5 = vld [vmem:[#allocation8 + $0x18] sm:$0xff]  }
 0x1a6   : > { %6983 = vmatmul.mubr.bf16.vlgmr.msra.gmra.mrb[32].mxu0 %v1369_v31  ;;  %v2459_v37 = vrot.slane %v2457_v29, 3  ;;  %v2468_v38 = vshll.u32 %v8669_v28, 16  ;;  %v779_v39 = vpack.c.bf16 %v752_v30, %v751_v18  ;;  %v6948_v40 = vpop.f32.mrb[12].mxu0  ;;  %v2462_v41 = vrot.slane %v2460_v32, 4  ;;  %v7947_v32 = vld [vmem:[#allocation8 + $0x108] sm:$0xff]  }
 0x1a7   : > { %6986 = vmatprep.mubr.bf16.mxu0 %v1372_v36  ;;  %v2467_v42 = vrot.slane %v2465_v33, 3  ;;  %v2474_v43 = vshrl.u32 %v2426_v34, 16  ;;  %7015 = vmatpush3.bf16.msra.mxu0 %v8617_v4  ;;  %v812_v46 = vrot.slane %v780_v35, 4  ;;  %v673_v47 = vadd.f32 %v6948_v40, %v8642_v20  ;;  %v664_v48 = vpop.f32.mrb[13].mxu0 }
 0x1a8   : > { %v2470_v49 = vrot.slane %v2468_v38, 4  ;;  %v2477_v51 = vshll.u32 %v2426_v34, 16  ;;  %7016 = vmatprep.subr.bf16.mxu0 %v7951_v24  ;;  %v811_v52 = vrot.slane %v779_v39, 4  ;;  %v665_v53 = vadd.f32 %v8642_v20, %v664_v48  ;;  %v6949_v54 = vpop.f32.mrb[14].mxu0  ;;  %v8680_v57 = vld [vmem:[#allocation2 + $0x48] sm:$0xf] }
 0x1a9   : > { %v2463_v45 = vor.u32 %v2462_v41, %v2459_v37  ;;  %v2476_v56 = vrot.slane %v2474_v43, 3  ;;  %850 = vst [vmem:[#allocation2 + $0x68] ss:$-4 sps:$4 sm:$0xff] %v812_v46   ;;  %v757_v4 = vmax.f32 %v673_v47, 0.0  ;;  %v676_v58 = vadd.f32 %v6949_v54, %v8642_v20  ;;  %v667_v59 = vpop.f32.mrb[15].mxu0  ;;  %v7956_v39 = vld [vmem:[#allocation8 + $0x20] sm:$0xff]  }
 0x1aa   : > { %v2471_v60 = vor.u32 %v2470_v49, %v2467_v42  ;;  %v2479_v61 = vrot.slane %v2477_v51, 4  ;;  %v8683_v62 = vld [vmem:[#allocation2 + $0x38] sm:$0xf]  ;;  %848 = vst [vmem:[#allocation2 + $0x58] ss:$-4 sps:$4 sm:$0xff] %v811_v52   ;;  %v755_v63 = vmax.f32 %v665_v53, 0.0  ;;  %v668_v0 = vadd.f32 %v8642_v20, %v667_v59 }
 0x1ab   : > { %v2482_v1 = vshrl.u32 %v8677_v50, 16  ;;  %v2485_v2 = vshll.u32 %v8677_v50, 16  ;;  %v1318_v3 = vld [vmem:[#allocation2 + $0x30] sm:$0xf0]  ;;  %7017 = vmatpush3.bf16.msra.mxu0 %v7951_v24  ;;  %v758_v6 = vmax.f32 %v676_v58, 0.0  ;;  %v1374_v19 = vrot.slane %v8683_v62, 4 }
 0x1ac   : > { %v2472_v7 = vsel %vm929_vm4, %v2463_v45, %v2471_v60  ;;  %v2480_v8 = vor.u32 %v2479_v61, %v2476_v56  ;;  %v1373_v10 = vrot.slane %v1318_v3, 4  ;;  %v1319_v11 = vld [vmem:[#allocation2 + $0x40] sm:$0xf0]  ;;  %v2428_v12 = vld [vmem:[#allocation2 + $0x30] sm:$0xf8]  ;;  %7018 = vmatprep.subr.bf16.mxu0 %v7953_v44  ;;  %v756_v13 = vmax.f32 %v668_v0, 0.0 }
 0x1ad   : > { %7126 = vmatprep.mubr.bf16.mxu1 %v2472_v7  ;;  %v2484_v15 = vrot.slane %v2482_v1, 3  ;;  %v2487_v18 = vrot.slane %v2485_v2, 4  ;;  %v782_v21 = vpack.c.bf16 %v758_v6, %v757_v4  ;;  %v1376_v22 = vrot.slane %v1319_v11, 4  ;;  %v8692_v30 = vld [vmem:[#allocation2 + $0x38] sm:$0xf]  ;;  %v7948_v58 = vld [vmem:[#allocation8 + $0x110] sm:$0xff]  }
 0x1ae   : > { %v1377_v23 = vrot.slane %v8680_v57, 4  ;;  %v2491_v24 = vshrl.u32 %v2428_v12, 16  ;;  %v781_v25 = vpack.c.bf16 %v756_v13, %v755_v63  ;;  %v1375_v27 = vsel %vm1363_vm3, %v1373_v10, %v1374_v19  ;;  %v6952_v29 = vpop.f32.mrb[16].mxu0  ;;  %v2430_v38 = vld [vmem:[#allocation2 + $0x40] sm:$0xf8]  ;;  %v7957_v59 = vld [vmem:[#allocation8 + $0x28] sm:$0xff]  }
 0x1af   : > { %v2488_v26 = vor.u32 %v2487_v18, %v2484_v15  ;;  %v2494_v31 = vshll.u32 %v2428_v12, 16  ;;  %7019 = vmatpush3.bf16.msra.mxu0 %v7953_v44  ;;  %v814_v33 = vrot.slane %v782_v21, 4  ;;  %v689_v34 = vadd.f32 %v6952_v29, %v8642_v20  ;;  %v680_v36 = vpop.f32.mrb[17].mxu0  ;;  %v8701_v52 = vld [vmem:[#allocation2 + $0x48] sm:$0xf]  ;;  %v7949_v29 = vld [vmem:[#allocation8 + $0x118] sm:$0xff]  }
 0x1b0   : > { %6987 = vmatmul.mubr.bf16.gmra.mrb[36].mxu0 %v1375_v27  ;;  %v1378_v35 = vsel %vm1363_vm3, %v1376_v22, %v1377_v23  ;;  %v2493_v37 = vrot.slane %v2491_v24, 3  ;;  %7020 = vmatprep.subr.bf16.mxu0 %v7954_v5  ;;  %v813_v40 = vrot.slane %v781_v25, 4  ;;  %v681_v42 = vadd.f32 %v8642_v20, %v680_v36  ;;  %v6953_v43 = vpop.f32.mrb[18].mxu0  ;;  %v8710_v21 = vld [vmem:[#allocation2 + $0x68] sm:$0xf] }
 0x1b1   : > { %v2489_v41 = vsel %vm929_vm4, %v2480_v8, %v2488_v26  ;;  %6990 = vmatprep.mubr.bf16.mxu0 %v1378_v35  ;;  %v2496_v46 = vrot.slane %v2494_v31, 4  ;;  %854 = vst [vmem:[#allocation2 + $0x88] ss:$-4 sps:$4 sm:$0xff] %v814_v33   ;;  %v761_v44 = vmax.f32 %v689_v34, 0.0  ;;  %v692_v47 = vadd.f32 %v6953_v43, %v8642_v20  ;;  %v683_v48 = vpop.f32.mrb[19].mxu0 }
 0x1b2   : > { %7127 = vmatmul.mubr.bf16.vlgmr.msra.gmra.mrb[0].mxu1 %v2489_v41  ;;  %v2499_v49 = vshrl.u32 %v8692_v30, 16  ;;  %v2502_v51 = vshll.u32 %v8692_v30, 16  ;;  %852 = vst [vmem:[#allocation2 + $0x78] ss:$-4 sps:$4 sm:$0xff] %v813_v40   ;;  %v759_v53 = vmax.f32 %v681_v42, 0.0  ;;  %v684_v54 = vadd.f32 %v8642_v20, %v683_v48 }
 0x1b3   : > { %7159 = vmatpush3.bf16.msra.mxu1 %v8602_v55  ;;  %v2497_v45 = vor.u32 %v2496_v46, %v2493_v37  ;;  %v2508_v56 = vshrl.u32 %v2430_v38, 16  ;;  %v1320_v4 = vld [vmem:[#allocation2 + $0x50] sm:$0xf0]  ;;  %7021 = vmatpush3.bf16.msra.mxu0 %v7954_v5  ;;  %v762_v60 = vmax.f32 %v692_v47, 0.0  ;;  %v2511_v0 = vshll.u32 %v2430_v38, 16 }
 0x1b4   : > { %v2501_v61 = vrot.slane %v2499_v49, 3  ;;  %v2504_v63 = vrot.slane %v2502_v51, 4  ;;  %7160 = vmatprep.subr.bf16.mxu1 %v7947_v32  ;;  %v8705_v1 = vld [vmem:[#allocation2 + $0x58] sm:$0xf]  ;;  %7022 = vmatprep.subr.bf16.mxu0 %v7956_v39  ;;  %v760_v2 = vmax.f32 %v684_v54, 0.0  ;;  %v2516_v55 = vshrl.u32 %v8701_v52, 16 }
 0x1b5   : > { %v2510_v3 = vrot.slane %v2508_v56, 3  ;;  %v2519_v6 = vshll.u32 %v8701_v52, 16  ;;  %v784_v7 = vpack.c.bf16 %v762_v60, %v761_v44  ;;  %v2513_v10 = vrot.slane %v2511_v0, 4  ;;  %v1321_v5 = vld [vmem:[#allocation2 + $0x60] sm:$0xf0]  ;;  %v7959_v37 = vld [vmem:[#allocation8 + $0x30] sm:$0xff]  }
 0x1b6   : > { %v2505_v8 = vor.u32 %v2504_v63, %v2501_v61  ;;  %v1379_v11 = vrot.slane %v1320_v4, 4  ;;  %v783_v12 = vpack.c.bf16 %v760_v2, %v759_v53  ;;  %v2518_v13 = vrot.slane %v2516_v55, 3  ;;  %v6956_v19 = vpop.f32.mrb[20].mxu0  ;;  %v2432_v27 = vld [vmem:[#allocation2 + $0x50] sm:$0xf8]  ;;  %v7952_v49 = vld [vmem:[#allocation8 + $0x120] sm:$0xff]  }
 0x1b7   : > { %v2521_v15 = vrot.slane %v2519_v6, 4  ;;  %7161 = vmatpush3.bf16.msra.mxu1 %v7947_v32  ;;  %v1380_v18 = vrot.slane %v8705_v1, 4  ;;  %7023 = vmatpush3.bf16.msra.mxu0 %v7956_v39  ;;  %v816_v22 = vrot.slane %v784_v7, 4  ;;  %v2514_v24 = vor.u32 %v2513_v10, %v2510_v3  ;;  %v696_v26 = vpop.f32.mrb[21].mxu0  ;;  %v8715_v36 = vld [vmem:[#allocation2 + $0x58] sm:$0xf] }
 0x1b8   : > { %v2506_v23 = vsel %vm929_vm4, %v2497_v45, %v2505_v8  ;;  %v705_v25 = vadd.f32 %v6956_v19, %v8642_v20  ;;  %7162 = vmatprep.subr.bf16.mxu1 %v7948_v58  ;;  %7024 = vmatprep.subr.bf16.mxu0 %v7957_v59  ;;  %v815_v31 = vrot.slane %v783_v12, 4  ;;  %v1382_v34 = vrot.slane %v1321_v5, 4  ;;  %v6957_v35 = vpop.f32.mrb[22].mxu0  ;;  %v2434_v48 = vld [vmem:[#allocation2 + $0x60] sm:$0xf8]  ;;  %v7960_v4 = vld [vmem:[#allocation8 + $0x38] sm:$0xff]  }
 0x1b9   : > { %7130 = vmatprep.mubr.bf16.mxu1 %v2506_v23  ;;  %v2522_v32 = vor.u32 %v2521_v15, %v2518_v13  ;;  %v1381_v33 = vsel %vm1363_vm3, %v1379_v11, %v1380_v18  ;;  %858 = vst [vmem:[#allocation2 + $0xa8] ss:$-4 sps:$4 sm:$0xff] %v816_v22   ;;  %v1383_v39 = vrot.slane %v8710_v21, 4  ;;  %v697_v40 = vadd.f32 %v8642_v20, %v696_v26  ;;  %v699_v42 = vpop.f32.mrb[23].mxu0  ;;  %v8724_v56 = vld [vmem:[#allocation2 + $0x68] sm:$0xf] }
 0x1ba   : > { %6991 = vmatmul.mubr.bf16.gmra.mrb[40].mxu0 %v1381_v33  ;;  %v765_v38 = vmax.f32 %v705_v25, 0.0  ;;  %v708_v41 = vadd.f32 %v6957_v35, %v8642_v20  ;;  %856 = vst [vmem:[#allocation2 + $0x98] ss:$-4 sps:$4 sm:$0xff] %v815_v31   ;;  %v700_v46 = vadd.f32 %v8642_v20, %v699_v42  ;;  %v2525_v44 = vshrl.u32 %v2432_v27, 16  ;;  %v1322_v6 = vld [vmem:[#allocation2 + $0x70] sm:$0xf0] }
 0x1bb   : > { %v2523_v43 = vsel %vm929_vm4, %v2514_v24, %v2522_v32  ;;  %v2528_v47 = vshll.u32 %v2432_v27, 16  ;;  %7163 = vmatpush3.bf16.msra.mxu1 %v7948_v58  ;;  %7025 = vmatpush3.bf16.msra.mxu0 %v7957_v59  ;;  %v1384_v51 = vsel %vm1363_vm3, %v1382_v34, %v1383_v39  ;;  %v763_v53 = vmax.f32 %v697_v40, 0.0  ;;  %v8727_v58 = vld [vmem:[#allocation2 + $0x78] sm:$0xf]  ;;  %v8729_v7 = vld [vmem:[#allocation2 + $0x88] sm:$0xf] }
 0x1bc   : > { %7131 = vmatmul.mubr.bf16.gmra.mrb[4].mxu1 %v2523_v43  ;;  %v766_v54 = vmax.f32 %v708_v41, 0.0  ;;  %v2533_v45 = vshrl.u32 %v8715_v36, 16  ;;  %7164 = vmatprep.subr.bf16.mxu1 %v7949_v29  ;;  %v764_v60 = vmax.f32 %v700_v46, 0.0  ;;  %v2527_v61 = vrot.slane %v2525_v44, 3  ;;  %v1323_v13 = vld [vmem:[#allocation2 + $0x80] sm:$0xf0] }
 0x1bd   : > { %6994 = vmatprep.mubr.bf16.mxu0 %v1384_v51  ;;  %v2530_v63 = vrot.slane %v2528_v47, 4  ;;  %v2536_v0 = vshll.u32 %v8715_v36, 16  ;;  %7026 = vmatprep.subr.bf16.mxu0 %v7959_v37  ;;  %v2542_v3 = vshrl.u32 %v2434_v48, 16  ;;  %v2545_v55 = vshll.u32 %v2434_v48, 16  ;;  %v7955_v24 = vld [vmem:[#allocation8 + $0x128] sm:$0xff]   ;;  %v8733_v33 = vld [vmem:[#allocation8 + $0x80] sm:$0xff]  }
 0x1be   : > { %v786_v59 = vpack.c.bf16 %v766_v54, %v765_v38  ;;  %v2535_v2 = vrot.slane %v2533_v45, 3  ;;  %v785_v8 = vpack.c.bf16 %v764_v60, %v763_v53  ;;  %v2550_v5 = vshrl.u32 %v8724_v56, 16  ;;  %v6960_v12 = vpop.f32.mrb[24].mxu0  ;;  %v2436_v39 = vld [vmem:[#allocation2 + $0x70] sm:$0xf8] }
 0x1bf   : > { %v2531_v10 = vor.u32 %v2530_v63, %v2527_v61  ;;  %v2538_v11 = vrot.slane %v2536_v0, 4  ;;  %7165 = vmatpush3.bf16.msra.mxu1 %v7949_v29  ;;  %7027 = vmatpush3.bf16.msra.mxu0 %v7959_v37  ;;  %v2544_v18 = vrot.slane %v2542_v3, 3  ;;  %v2547_v19 = vrot.slane %v2545_v55, 4  ;;  %v712_v23 = vpop.f32.mrb[25].mxu0  ;;  %v8740_v46 = vld [vmem:[#allocation2 + $0x78] sm:$0xf] }
 0x1c0   : > { %v818_v15 = vrot.slane %v786_v59, 4  ;;  %v2553_v22 = vshll.u32 %v8724_v56, 16  ;;  %7166 = vmatprep.subr.bf16.mxu1 %v7952_v49  ;;  %7028 = vmatprep.subr.bf16.mxu0 %v7960_v4  ;;  %v817_v25 = vrot.slane %v785_v8, 4  ;;  %v2552_v27 = vrot.slane %v2550_v5, 3  ;;  %v6961_v32 = vpop.f32.mrb[26].mxu0  ;;  %v7958_v63 = vld [vmem:[#allocation8 + $0x130] sm:$0xff]  }
 0x1c1   : > { %v2539_v26 = vor.u32 %v2538_v11, %v2535_v2  ;;  %v1385_v31 = vrot.slane %v1322_v6, 4  ;;  %v2548_v34 = vor.u32 %v2547_v19, %v2544_v18  ;;  %v1386_v35 = vrot.slane %v8727_v58, 4  ;;  %v715_v38 = vpop.f32.mrb[27].mxu0  ;;  %v2438_v53 = vld [vmem:[#allocation2 + $0x80] sm:$0xf8]  ;;  %v7961_v11 = vld [vmem:[#allocation8 + $0x138] sm:$0xff]  }
 0x1c2   : > { %862 = vst [vmem:[#allocation2 + $0xc8] ss:$-4 sps:$4 sm:$0xff] %v818_v15   ;;  %v2555_v29 = vrot.slane %v2553_v22, 4  ;;  %v721_v37 = vadd.f32 %v6960_v12, %v8642_v20  ;;  %860 = vst [vmem:[#allocation2 + $0xb8] ss:$-4 sps:$4 sm:$0xff] %v817_v25   ;;  %v1388_v41 = vrot.slane %v1323_v13, 4  ;;  %v713_v43 = vadd.f32 %v8642_v20, %v712_v23 }
 0x1c3   : > { %v2540_v40 = vsel %vm929_vm4, %v2531_v10, %v2539_v26  ;;  %v1389_v42 = vrot.slane %v8729_v7, 4  ;;  %7167 = vmatpush3.bf16.msra.mxu1 %v7952_v49  ;;  %7029 = vmatpush3.bf16.msra.mxu0 %v7960_v4  ;;  %v1387_v47 = vsel %vm1363_vm3, %v1385_v31, %v1386_v35  ;;  %v724_v51 = vadd.f32 %v6961_v32, %v8642_v20  ;;  %v8749_v2 = vld [vmem:[#allocation2 + $0x88] sm:$0xf]  ;;  %v1324_v18 = vld [vmem:[#allocation2 + $0x90] sm:$0xf0] }
 0x1c4   : > { %7134 = vmatprep.mubr.bf16.mxu1 %v2540_v40  ;;  %v2556_v44 = vor.u32 %v2555_v29, %v2552_v27  ;;  %v769_v48 = vmax.f32 %v721_v37, 0.0  ;;  %7168 = vmatprep.subr.bf16.mxu1 %v7955_v24  ;;  %v767_v45 = vmax.f32 %v713_v43, 0.0  ;;  %v716_v60 = vadd.f32 %v8642_v20, %v715_v38  ;;  %v8752_v19 = vld [vmem:[#allocation2 + $0xa8] sm:$0xf]  ;;  %v8755_v31 = vld [vmem:[#allocation2 + $0x98] sm:$0xf] }
 0x1c5   : > { %6995 = vmatmul.mubr.bf16.gmra.mrb[44].mxu0 %v1387_v47  ;;  %v1390_v54 = vsel %vm1363_vm3, %v1388_v41, %v1389_v42  ;;  %v2559_v61 = vshrl.u32 %v2436_v39, 16  ;;  %7062 = vmatprep.subr.bf16.mxu0 %v8733_v33  ;;  %v770_v4 = vmax.f32 %v724_v51, 0.0  ;;  %v2562_v0 = vshll.u32 %v2436_v39, 16  ;;  %v1325_v38 = vld [vmem:[#allocation2 + $0xa0] sm:$0xf0] }
 0x1c6   : > { %v2557_v49 = vsel %vm929_vm4, %v2548_v34, %v2556_v44  ;;  %6998 = vmatprep.mubr.bf16.mxu0 %v1390_v54  ;;  %v2567_v59 = vshrl.u32 %v8740_v46, 16  ;;  %v768_v3 = vmax.f32 %v716_v60, 0.0  ;;  %v2570_v6 = vshll.u32 %v8740_v46, 16  ;;  %v6964_v10 = vpop.f32.mrb[28].mxu0  ;;  %v2440_v51 = vld [vmem:[#allocation2 + $0x90] sm:$0xf8] }
 0x1c7   : > { %7135 = vmatmul.mubr.bf16.gmra.mrb[8].mxu1 %v2557_v49  ;;  %v2561_v55 = vrot.slane %v2559_v61, 3  ;;  %v2576_v8 = vshrl.u32 %v2438_v53, 16  ;;  %v788_v5 = vpack.c.bf16 %v770_v4, %v769_v48  ;;  %v2564_v12 = vrot.slane %v2562_v0, 4  ;;  %v728_v22 = vpop.f32.mrb[29].mxu0  ;;  %v8763_v61 = vld [vmem:[#allocation2 + $0x98] sm:$0xf] }
 0x1c8   : > { %v2569_v13 = vrot.slane %v2567_v59, 3  ;;  %v2579_v15 = vshll.u32 %v2438_v53, 16  ;;  %7169 = vmatpush3.bf16.msra.mxu1 %v7955_v24  ;;  %v787_v23 = vpack.c.bf16 %v768_v3, %v767_v45  ;;  %v2572_v25 = vrot.slane %v2570_v6, 4  ;;  %v6965_v32 = vpop.f32.mrb[30].mxu0  ;;  %v8765_v49 = vld [vmem:[#allocation8 + $0x140] sm:$0xff]  }
 0x1c9   : > { %v2578_v26 = vrot.slane %v2576_v8, 3  ;;  %v2584_v27 = vshrl.u32 %v8749_v2, 16  ;;  %7170 = vmatprep.subr.bf16.mxu1 %v7958_v63  ;;  %v820_v34 = vrot.slane %v788_v5, 4  ;;  %v2565_v29 = vor.u32 %v2564_v12, %v2561_v55  ;;  %v731_v39 = vpop.f32.mrb[31].mxu0  ;;  %v2442_v3 = vld [vmem:[#allocation2 + $0xa0] sm:$0xf8] }
 0x1ca   : > { %v2581_v35 = vrot.slane %v2579_v15, 4  ;;  %v2587_v37 = vshll.u32 %v8749_v2, 16  ;;  %v819_v40 = vrot.slane %v787_v23, 4  ;;  %v2573_v41 = vor.u32 %v2572_v25, %v2569_v13 }
 0x1cb   : > { %v2586_v42 = vrot.slane %v2584_v27, 3  ;;  %v1391_v24 = vrot.slane %v1324_v18, 4  ;;  %866 = vst [vmem:[#allocation2 + $0xe8] ss:$-4 sps:$4 sm:$0xff] %v820_v34   ;;  %v1392_v47 = vrot.slane %v8755_v31, 4  ;;  %v737_v48 = vadd.f32 %v6964_v10, %v8642_v20 }
 0x1cc   : > { %v2582_v43 = vor.u32 %v2581_v35, %v2578_v26  ;;  %v2589_v44 = vrot.slane %v2587_v37, 4  ;;  %7171 = vmatpush3.bf16.msra.mxu1 %v7958_v63  ;;  %864 = vst [vmem:[#allocation2 + $0xd8] ss:$-4 sps:$4 sm:$0xff] %v819_v40   ;;  %v2574_v53 = vsel %vm929_vm4, %v2565_v29, %v2573_v41  ;;  %v1394_v54 = vrot.slane %v1325_v38, 4  ;;  %v8773_v18 = vld [vmem:[#allocation2 + $0xa8] sm:$0xf] }
 0x1cd   : > { %v1395_v45 = vrot.slane %v8752_v19, 4  ;;  %v729_v60 = vadd.f32 %v8642_v20, %v728_v22  ;;  %7172 = vmatprep.subr.bf16.mxu1 %v7961_v11  ;;  %7138 = vmatprep.mubr.bf16.mxu1 %v2574_v53  ;;  %v1393_v0 = vsel %vm1363_vm3, %v1391_v24, %v1392_v47  ;;  %v773_v59 = vmax.f32 %v737_v48, 0.0  ;;  %v8776_v27 = vld [vmem:[#allocation2 + $0xb8] sm:$0xf]  ;;  %v1326_v35 = vld [vmem:[#allocation2 + $0xb0] sm:$0xf0] }
 0x1ce   : > { %v2590_v4 = vor.u32 %v2589_v44, %v2586_v42  ;;  %v740_v63 = vadd.f32 %v6965_v32, %v8642_v20  ;;  %6999 = vmatmul.mubr.bf16.gmra.mrb[48].mxu0 %v1393_v0  ;;  %v732_v8 = vadd.f32 %v8642_v20, %v731_v39  ;;  %v2593_v10 = vshrl.u32 %v2440_v51, 16  ;;  %v8779_v37 = vld [vmem:[#allocation2 + $0xc8] sm:$0xf]  ;;  %v1327_v41 = vld [vmem:[#allocation2 + $0xc0] sm:$0xf0] }
 0x1cf   : > { %v1396_v55 = vsel %vm1363_vm3, %v1394_v54, %v1395_v45  ;;  %v771_v6 = vmax.f32 %v729_v60, 0.0  ;;  %v2596_v13 = vshll.u32 %v2440_v51, 16  ;;  %v2601_v15 = vshrl.u32 %v8763_v61, 16  ;;  %v2444_v47 = vld [vmem:[#allocation2 + $0xb0] sm:$0xf8] }
 0x1d0   : > { %v2591_v5 = vsel %vm929_vm4, %v2582_v43, %v2590_v4  ;;  %7002 = vmatprep.mubr.bf16.mxu0 %v1396_v55  ;;  %v774_v12 = vmax.f32 %v740_v63, 0.0  ;;  %7173 = vmatpush3.bf16.msra.mxu1 %v7961_v11  ;;  %v772_v22 = vmax.f32 %v732_v8, 0.0  ;;  %v2595_v23 = vrot.slane %v2593_v10, 3  ;;  %v8783_v45 = vld [vmem:[#allocation2 + $0xb8] sm:$0xf] }
 0x1d1   : > { %7139 = vmatmul.mubr.bf16.gmra.mrb[12].mxu1 %v2591_v5  ;;  %v2604_v25 = vshll.u32 %v8763_v61, 16  ;;  %v2610_v26 = vshrl.u32 %v2442_v3, 16  ;;  %7206 = vmatprep.subr.bf16.mxu1 %v8765_v49  ;;  %v2598_v32 = vrot.slane %v2596_v13, 4  ;;  %v2603_v34 = vrot.slane %v2601_v15, 3  ;;  %v2446_v63 = vld [vmem:[#allocation2 + $0xc0] sm:$0xf8] }
 0x1d2   : > { %v790_v20 = vpack.c.bf16 %v774_v12, %v773_v59  ;;  %v2613_v29 = vshll.u32 %v2442_v3, 16  ;;  %v789_v38 = vpack.c.bf16 %v772_v22, %v771_v6  ;;  %v2618_v40 = vshrl.u32 %v8773_v18, 16  ;;  %v8788_v10 = vld [vmem:[#allocation2 + $0xc8] sm:$0xf] }
 0x1d3   : > { %v2606_v39 = vrot.slane %v2604_v25, 4  ;;  %v2612_v11 = vrot.slane %v2610_v26, 3  ;;  %v2599_v24 = vor.u32 %v2598_v32, %v2595_v23  ;;  %v2621_v44 = vshll.u32 %v8773_v18, 16  ;;  %v8793_v22 = vld [vmem:[#allocation2 + $0xd8] sm:$0xf] }
 0x1d4   : > { %v822_v42 = vrot.slane %v790_v20, 4  ;;  %v2615_v43 = vrot.slane %v2613_v29, 4  ;;  %v821_v48 = vrot.slane %v789_v38, 4  ;;  %v2620_v53 = vrot.slane %v2618_v40, 3  ;;  %v8795_v23 = vld [vmem:[#allocation2 + $0xe8] sm:$0xf] }
 0x1d5   : > { %v2607_v51 = vor.u32 %v2606_v39, %v2603_v34  ;;  %v1397_v54 = vrot.slane %v1326_v35, 4  ;;  %v2623_v4 = vrot.slane %v2621_v44, 4  ;;  %v1398_v0 = vrot.slane %v8776_v27, 4  ;;  %v1328_v34 = vld [vmem:[#allocation2 + $0xd0] sm:$0xf0] }
 0x1d6   : > { %870 = vst [vmem:[#allocation2 + $0x108] ss:$-4 sps:$4 sm:$0xff] %v822_v42   ;;  %v2616_v60 = vor.u32 %v2615_v43, %v2612_v11  ;;  %v1400_v59 = vrot.slane %v1327_v41, 4  ;;  %868 = vst [vmem:[#allocation2 + $0xf8] ss:$-4 sps:$4 sm:$0xff] %v821_v48   ;;  %v1401_v55 = vrot.slane %v8779_v37, 4 }
 0x1d7   : > { %v2608_v3 = vsel %vm929_vm4, %v2599_v24, %v2607_v51  ;;  %v2627_v6 = vshrl.u32 %v2444_v47, 16  ;;  %v2630_v8 = vshll.u32 %v2444_v47, 16  ;;  %v2624_v5 = vor.u32 %v2623_v4, %v2620_v53  ;;  %v1329_v11 = vld [vmem:[#allocation2 + $0xe0] sm:$0xf0]  ;;  %v2448_v43 = vld [vmem:[#allocation2 + $0xd0] sm:$0xf8] }
 0x1d8   : > { %7142 = vmatprep.mubr.bf16.mxu1 %v2608_v3  ;;  %v1399_v12 = vsel %vm1363_vm3, %v1397_v54, %v1398_v0  ;;  %v2635_v13 = vshrl.u32 %v8783_v45, 16  ;;  %v2638_v15 = vshll.u32 %v8783_v45, 16  ;;  %v1402_v25 = vsel %vm1363_vm3, %v1400_v59, %v1401_v55  ;;  %v8802_v53 = vld [vmem:[#allocation2 + $0xd8] sm:$0xf]  ;;  %v2450_v59 = vld [vmem:[#allocation2 + $0xe0] sm:$0xf8] }
 0x1d9   : > { %7003 = vmatmul.mubr.bf16.gmra.mrb[52].mxu0 %v1399_v12  ;;  %v2629_v26 = vrot.slane %v2627_v6, 3  ;;  %v2632_v20 = vrot.slane %v2630_v8, 4  ;;  %v2644_v32 = vshrl.u32 %v2446_v63, 16  ;;  %v2625_v29 = vsel %vm929_vm4, %v2616_v60, %v2624_v5  ;;  %v8807_v8 = vld [vmem:[#allocation2 + $0xe8] sm:$0xf] }
 0x1da   : > { %7006 = vmatprep.mubr.bf16.mxu0 %v1402_v25  ;;  %v2637_v35 = vrot.slane %v2635_v13, 3  ;;  %v2640_v38 = vrot.slane %v2638_v15, 4  ;;  %v2647_v39 = vshll.u32 %v2446_v63, 16  ;;  %7143 = vmatmul.mubr.bf16.gmra.mrb[16].mxu1 %v2625_v29  ;;  %v2652_v42 = vshrl.u32 %v8788_v10, 16 }
 0x1db   : > { %v2633_v40 = vor.u32 %v2632_v20, %v2629_v26  ;;  %v2646_v41 = vrot.slane %v2644_v32, 3  ;;  %v2655_v24 = vshll.u32 %v8788_v10, 16  ;;  %v1403_v48 = vrot.slane %v1328_v34, 4 }
 0x1dc   : > { %v2641_v44 = vor.u32 %v2640_v38, %v2637_v35  ;;  %v2649_v47 = vrot.slane %v2647_v39, 4  ;;  %v1404_v51 = vrot.slane %v8793_v22, 4  ;;  %v2654_v54 = vrot.slane %v2652_v42, 3 }
 0x1dd   : > { %v2657_v60 = vrot.slane %v2655_v24, 4  ;;  %v1406_v4 = vrot.slane %v1329_v11, 4  ;;  %v1407_v0 = vrot.slane %v8795_v23, 4  ;;  %v2661_v6 = vshrl.u32 %v2448_v43, 16  ;;  %v8811_v25 = vld [vmem:[#allocation2 + $0xf8] sm:$0xf] }
 0x1de   : > { %v2642_v63 = vsel %vm929_vm4, %v2633_v40, %v2641_v44  ;;  %v2650_v3 = vor.u32 %v2649_v47, %v2646_v41  ;;  %v1405_v55 = vsel %vm1363_vm3, %v1403_v48, %v1404_v51  ;;  %v2664_v13 = vshll.u32 %v2448_v43, 16  ;;  %v1330_v29 = vld [vmem:[#allocation2 + $0xf0] sm:$0xf0]  ;;  %v8817_v44 = vld [vmem:[#allocation2 + $0xf8] sm:$0xf] }
 0x1df   : > { %7146 = vmatprep.mubr.bf16.mxu1 %v2642_v63  ;;  %v2658_v5 = vor.u32 %v2657_v60, %v2654_v54  ;;  %v1408_v12 = vsel %vm1363_vm3, %v1406_v4, %v1407_v0  ;;  %v2669_v15 = vshrl.u32 %v8802_v53, 16  ;;  %v2663_v26 = vrot.slane %v2661_v6, 3  ;;  %v2452_v40 = vld [vmem:[#allocation2 + $0xf0] sm:$0xf8]  ;;  %v2454_v60 = vld [vmem:[#allocation2 + $0x100] sm:$0xf8] }
 0x1e0   : > { %v2672_v20 = vshll.u32 %v8802_v53, 16  ;;  %v2678_v32 = vshrl.u32 %v2450_v59, 16  ;;  %v2681_v34 = vshll.u32 %v2450_v59, 16  ;;  %v2666_v38 = vrot.slane %v2664_v13, 4 }
 0x1e1   : > { %v2659_v35 = vsel %vm929_vm4, %v2650_v3, %v2658_v5  ;;  %7007 = vmatmul.mubr.bf16.gmra.mrb[56].mxu0 %v1405_v55  ;;  %v2671_v39 = vrot.slane %v2669_v15, 3  ;;  %v2686_v11 = vshrl.u32 %v8807_v8, 16  ;;  %v2689_v43 = vshll.u32 %v8807_v8, 16 }
 0x1e2   : > { %7010 = vmatprep.mubr.bf16.mxu0 %v1408_v12  ;;  %v2674_v41 = vrot.slane %v2672_v20, 4  ;;  %v2680_v42 = vrot.slane %v2678_v32, 3  ;;  %v2683_v24 = vrot.slane %v2681_v34, 4  ;;  %7147 = vmatmul.mubr.bf16.gmra.mrb[20].mxu1 %v2659_v35  ;;  %v2667_v47 = vor.u32 %v2666_v38, %v2663_v26  ;;  %v8823_v12 = vld [vmem:[#allocation2 + $0x108] sm:$0xf] }
 0x1e3   : > { %v2688_v48 = vrot.slane %v2686_v11, 3  ;;  %v1409_v51 = vrot.slane %v1330_v29, 4  ;;  %v1410_v54 = vrot.slane %v8811_v25, 4  ;;  %v2691_v59 = vrot.slane %v2689_v43, 4  ;;  %v8826_v32 = vld [vmem:[#allocation2 + $0x10] sm:$0xf0] }
 0x1e4   : > { %v2675_v4 = vor.u32 %v2674_v41, %v2671_v39  ;;  %v2684_v0 = vor.u32 %v2683_v24, %v2680_v42  ;;  %v2695_v63 = vshrl.u32 %v2452_v40, 16  ;;  %v2698_v55 = vshll.u32 %v2452_v40, 16  ;;  %v981_v39 = vld [vmem:[#allocation2 + $0x10] sm:$0xf8] }
 0x1e5   : > { %v1411_v3 = vsel %vm1363_vm3, %v1409_v51, %v1410_v54  ;;  %v2703_v6 = vshrl.u32 %v8817_v44, 16  ;;  %v2706_v5 = vshll.u32 %v8817_v44, 16  ;;  %v2692_v15 = vor.u32 %v2691_v59, %v2688_v48 }
 0x1e6   : > { %v2676_v13 = vsel %vm929_vm4, %v2667_v47, %v2675_v4  ;;  %v2697_v26 = vrot.slane %v2695_v63, 3  ;;  %v2712_v20 = vshrl.u32 %v2454_v60, 16  ;;  %v2700_v34 = vrot.slane %v2698_v55, 4 }
 0x1e7   : > { %7150 = vmatprep.mubr.bf16.mxu1 %v2676_v13  ;;  %v2705_v29 = vrot.slane %v2703_v6, 3  ;;  %v2708_v35 = vrot.slane %v2706_v5, 4  ;;  %v2715_v38 = vshll.u32 %v2454_v60, 16  ;;  %v2720_v40 = vshrl.u32 %v8823_v12, 16  ;;  %v983_v60 = vld [vmem:[#allocation2 + $0x20] sm:$0xf8] }
 0x1e8   : > { %v2714_v11 = vrot.slane %v2712_v20, 3  ;;  %v2723_v41 = vshll.u32 %v8823_v12, 16  ;;  %v2693_v42 = vsel %vm929_vm4, %v2684_v0, %v2692_v15  ;;  %v2701_v24 = vor.u32 %v2700_v34, %v2697_v26  ;;  %v8837_v34 = vld [vmem:[#allocation2 + $0x20] sm:$0xf0] }
 0x1e9   : > { %7011 = vmatmul.mubr.bf16.gmra.mrb[60].mxu0 %v1411_v3  ;;  %v2709_v43 = vor.u32 %v2708_v35, %v2705_v29  ;;  %v2717_v47 = vrot.slane %v2715_v38, 4  ;;  %v2722_v48 = vrot.slane %v2720_v40, 3  ;;  %v3049_v54 = vrot.slane %v8826_v32, 4  ;;  %v985_v38 = vld [vmem:[#allocation2 + $0x30] sm:$0xf8] }
 0x1ea   : > { %v2725_v51 = vrot.slane %v2723_v41, 4  ;;  %7030 = vmatprep.mubr.bf16.mxu0 %v8664_v16  ;;  %v1029_v4 = vshrl.u32 %v981_v39, 16  ;;  %7151 = vmatmul.mubr.bf16.gmra.mrb[24].mxu1 %v2693_v42  ;;  %v3050_v63 = vrot.slane %v8669_v28, 4  ;;  %v1032_v55 = vshll.u32 %v981_v39, 16  ;;  %v8842_v42 = vld [vmem:[#allocation2 + $0x30] sm:$0xf0] }
 0x1eb   : > { %v2710_v59 = vsel %vm929_vm4, %v2701_v24, %v2709_v43  ;;  %v1037_v0 = vshrl.u32 %v8661_v14, 16  ;;  %v2718_v3 = vor.u32 %v2717_v47, %v2714_v11  ;;  %v1040_v13 = vshll.u32 %v8661_v14, 16 }
 0x1ec   : > { %7154 = vmatprep.mubr.bf16.mxu1 %v2710_v59  ;;  %v2726_v6 = vor.u32 %v2725_v51, %v2722_v48  ;;  %v1031_v5 = vrot.slane %v1029_v4, 3  ;;  %v1034_v15 = vrot.slane %v1032_v55, 4  ;;  %v1046_v20 = vshrl.u32 %v983_v60, 16  ;;  %v7967_v59 = vld [vmem:[#allocation8 + $0x88] sm:$0xff]  }
 0x1ed   : > { %v1039_v26 = vrot.slane %v1037_v0, 3  ;;  %v1049_v16 = vshll.u32 %v983_v60, 16  ;;  %v1042_v29 = vrot.slane %v1040_v13, 4  ;;  %v1054_v35 = vshrl.u32 %v8658_v9, 16 }
 0x1ee   : > { %v1057_v28 = vshll.u32 %v8658_v9, 16  ;;  %v3051_v39 = vsel %vm1363_vm3, %v3049_v54, %v3050_v63  ;;  %v1035_v40 = vor.u32 %v1034_v15, %v1031_v5  ;;  %v1048_v11 = vrot.slane %v1046_v20, 3  ;;  %v987_v9 = vld [vmem:[#allocation2 + $0x40] sm:$0xf8] }
 0x1ef   : > { %v1051_v41 = vrot.slane %v1049_v16, 4  ;;  %v2727_v14 = vsel %vm929_vm4, %v2718_v3, %v2726_v6  ;;  %v1043_v24 = vor.u32 %v1042_v29, %v1039_v26  ;;  %v1056_v43 = vrot.slane %v1054_v35, 3  ;;  %v8853_v16 = vld [vmem:[#allocation2 + $0x40] sm:$0xf0]  ;;  %v7969_v29 = vld [vmem:[#allocation8 + $0x90] sm:$0xff]  }
 0x1f0   : > { %v1059_v47 = vrot.slane %v1057_v28, 4  ;;  %v3052_v51 = vrot.slane %v8837_v34, 4  ;;  %v3053_v4 = vrot.slane %v8677_v50, 4  ;;  %v1063_v60 = vshrl.u32 %v985_v38, 16 }
 0x1f1   : > { %v1052_v48 = vor.u32 %v1051_v41, %v1048_v11  ;;  %v1044_v54 = vsel %vm929_vm4, %v1035_v40, %v1043_v24  ;;  %v3055_v55 = vrot.slane %v8842_v42, 4  ;;  %v1066_v0 = vshll.u32 %v985_v38, 16  ;;  %v989_v40 = vld [vmem:[#allocation2 + $0x50] sm:$0xf8] }
 0x1f2   : > { %v1060_v63 = vor.u32 %v1059_v47, %v1056_v43  ;;  %7155 = vmatmul.mubr.bf16.gmra.mrb[28].mxu1 %v2727_v14  ;;  %7031 = vmatmul.mubr.bf16.vlgmr.msra.gmra.mrb[32].mxu0 %v1044_v54  ;;  %v3056_v3 = vrot.slane %v8692_v30, 4  ;;  %v1065_v6 = vrot.slane %v1063_v60, 3  ;;  %v1071_v5 = vshrl.u32 %v8683_v62, 16  ;;  %v8859_v14 = vld [vmem:[#allocation2 + $0x50] sm:$0xf0] }
 0x1f3   : > { %v1074_v13 = vshll.u32 %v8683_v62, 16  ;;  %7174 = vmatprep.mubr.bf16.mxu1 %v3051_v39  ;;  %v1068_v15 = vrot.slane %v1066_v0, 4  ;;  %v1080_v26 = vshrl.u32 %v987_v9, 16  ;;  %v1083_v20 = vshll.u32 %v987_v9, 16  ;;  %7063 = vmatpush3.bf16.msra.mxu0 %v8733_v33  ;;  %v991_v54 = vld [vmem:[#allocation2 + $0x60] sm:$0xf8] }
 0x1f4   : > { %v1061_v50 = vsel %vm929_vm4, %v1052_v48, %v1060_v63  ;;  %v1073_v35 = vrot.slane %v1071_v5, 3  ;;  %v1088_v30 = vshrl.u32 %v8680_v57, 16  ;;  %v1091_v38 = vshll.u32 %v8680_v57, 16  ;;  %7064 = vmatprep.subr.bf16.mxu0 %v7967_v59 }
 0x1f5   : > { %7034 = vmatprep.mubr.bf16.mxu0 %v1061_v50  ;;  %v1076_v28 = vrot.slane %v1074_v13, 4  ;;  %v3054_v62 = vsel %vm1363_vm3, %v3052_v51, %v3053_v4  ;;  %v1069_v39 = vor.u32 %v1068_v15, %v1065_v6  ;;  %v1082_v11 = vrot.slane %v1080_v26, 3  ;;  %v7963_v51 = vld [vmem:[#allocation8 + $0x148] sm:$0xff]   ;;  %v8870_v26 = vld [vmem:[#allocation2 + $0x60] sm:$0xf0] }
 0x1f6   : > { %v1085_v41 = vrot.slane %v1083_v20, 4  ;;  %v3057_v24 = vsel %vm1363_vm3, %v3055_v55, %v3056_v3  ;;  %v1090_v43 = vrot.slane %v1088_v30, 3  ;;  %v1093_v47 = vrot.slane %v1091_v38, 4  ;;  %v7970_v20 = vld [vmem:[#allocation8 + $0x98] sm:$0xff]  }
 0x1f7   : > { %v1077_v33 = vor.u32 %v1076_v28, %v1073_v35  ;;  %v3058_v60 = vrot.slane %v8853_v16, 4  ;;  %v3059_v9 = vrot.slane %v8701_v52, 4  ;;  %v1097_v57 = vshrl.u32 %v989_v40, 16  ;;  %7065 = vmatpush3.bf16.msra.mxu0 %v7967_v59 }
 0x1f8   : > { %v1086_v48 = vor.u32 %v1085_v41, %v1082_v11  ;;  %v1094_v63 = vor.u32 %v1093_v47, %v1090_v43  ;;  %v3061_v4 = vrot.slane %v8859_v14, 4  ;;  %v3062_v0 = vrot.slane %v8715_v36, 4  ;;  %7066 = vmatprep.subr.bf16.mxu0 %v7969_v29  ;;  %v7964_v11 = vld [vmem:[#allocation8 + $0x150] sm:$0xff]  }
 0x1f9   : > { %v1100_v6 = vshll.u32 %v989_v40, 16  ;;  %v1078_v55 = vsel %vm929_vm4, %v1069_v39, %v1077_v33  ;;  %v1099_v3 = vrot.slane %v1097_v57, 3  ;;  %v1105_v5 = vshrl.u32 %v8705_v1, 16  ;;  %v8876_v41 = vld [vmem:[#allocation2 + $0x70] sm:$0xf0] }
 0x1fa   : > { %v1108_v13 = vshll.u32 %v8705_v1, 16  ;;  %7175 = vmatmul.mubr.bf16.vlgmr.msra.gmra.mrb[0].mxu1 %v3054_v62  ;;  %7035 = vmatmul.mubr.bf16.gmra.mrb[36].mxu0 %v1078_v55  ;;  %v1095_v52 = vsel %vm929_vm4, %v1086_v48, %v1094_v63  ;;  %v1114_v50 = vshrl.u32 %v991_v54, 16  ;;  %v1117_v15 = vshll.u32 %v991_v54, 16  ;;  %v993_v1 = vld [vmem:[#allocation2 + $0x70] sm:$0xf8] }
 0x1fb   : > { %v1102_v59 = vrot.slane %v1100_v6, 4  ;;  %7207 = vmatpush3.bf16.msra.mxu1 %v8765_v49  ;;  %7178 = vmatprep.mubr.bf16.mxu1 %v3057_v24  ;;  %v1107_v36 = vrot.slane %v1105_v5, 3  ;;  %v1122_v28 = vshrl.u32 %v8710_v21, 16  ;;  %v1125_v30 = vshll.u32 %v8710_v21, 16  ;;  %v995_v54 = vld [vmem:[#allocation2 + $0x80] sm:$0xf8] }
 0x1fc   : > { %v1110_v35 = vrot.slane %v1108_v13, 4  ;;  %7038 = vmatprep.mubr.bf16.mxu0 %v1095_v52  ;;  %7208 = vmatprep.subr.bf16.mxu1 %v7963_v51  ;;  %v3060_v38 = vsel %vm1363_vm3, %v3058_v60, %v3059_v9  ;;  %v1116_v62 = vrot.slane %v1114_v50, 3  ;;  %v1119_v39 = vrot.slane %v1117_v15, 4 }
 0x1fd   : > { %v1103_v40 = vor.u32 %v1102_v59, %v1099_v3  ;;  %v3063_v49 = vsel %vm1363_vm3, %v3061_v4, %v3062_v0  ;;  %v1124_v33 = vrot.slane %v1122_v28, 3  ;;  %v1127_v43 = vrot.slane %v1125_v30, 4  ;;  %7067 = vmatpush3.bf16.msra.mxu0 %v7969_v29  ;;  %v7965_v3 = vld [vmem:[#allocation8 + $0x158] sm:$0xff]   ;;  %v8887_v59 = vld [vmem:[#allocation2 + $0x80] sm:$0xf0] }
 0x1fe   : > { %v1111_v24 = vor.u32 %v1110_v35, %v1107_v36  ;;  %v1120_v47 = vor.u32 %v1119_v39, %v1116_v62  ;;  %v3064_v21 = vrot.slane %v8870_v26, 4  ;;  %v3065_v48 = vrot.slane %v8724_v56, 4  ;;  %7068 = vmatprep.subr.bf16.mxu0 %v7970_v20  ;;  %v7972_v56 = vld [vmem:[#allocation8 + $0xa0] sm:$0xff]  }
 0x1ff   : > { %v1131_v57 = vshrl.u32 %v993_v1, 16  ;;  %7209 = vmatpush3.bf16.msra.mxu1 %v7963_v51  ;;  %v1128_v60 = vor.u32 %v1127_v43, %v1124_v33  ;;  %v3067_v9 = vrot.slane %v8876_v41, 4  ;;  %v3068_v63 = vrot.slane %v8740_v46, 4  ;;  %v7973_v46 = vld [vmem:[#allocation8 + $0xa8] sm:$0xff]   ;;  %v999_v43 = vld [vmem:[#allocation2 + $0xa0] sm:$0xf8] }
 0x200   : > { %v1134_v6 = vshll.u32 %v993_v1, 16  ;;  %v1112_v4 = vsel %vm929_vm4, %v1103_v40, %v1111_v24  ;;  %7210 = vmatprep.subr.bf16.mxu1 %v7964_v11  ;;  %v1139_v29 = vshrl.u32 %v8727_v58, 16  ;;  %v1142_v55 = vshll.u32 %v8727_v58, 16  ;;  %v997_v58 = vld [vmem:[#allocation2 + $0x90] sm:$0xf8] }
 0x201   : > { %v1133_v0 = vrot.slane %v1131_v57, 3  ;;  %v1129_v5 = vsel %vm929_vm4, %v1120_v47, %v1128_v60  ;;  %v1148_v51 = vshrl.u32 %v995_v54, 16  ;;  %v1151_v52 = vshll.u32 %v995_v54, 16  ;;  %7069 = vmatpush3.bf16.msra.mxu0 %v7970_v20  ;;  %v8892_v40 = vld [vmem:[#allocation2 + $0x90] sm:$0xf0]  ;;  %v7968_v47 = vld [vmem:[#allocation8 + $0x160] sm:$0xff]  }
 0x202   : > { %v1136_v13 = vrot.slane %v1134_v6, 4  ;;  %7179 = vmatmul.mubr.bf16.gmra.mrb[4].mxu1 %v3060_v38  ;;  %7039 = vmatmul.mubr.bf16.gmra.mrb[40].mxu0 %v1112_v4  ;;  %v1141_v50 = vrot.slane %v1139_v29, 3  ;;  %v1144_v15 = vrot.slane %v1142_v55, 4  ;;  %v1156_v36 = vshrl.u32 %v8729_v7, 16  ;;  %v7971_v6 = vld [vmem:[#allocation8 + $0x168] sm:$0xff]  }
 0x203   : > { %v1159_v35 = vshll.u32 %v8729_v7, 16  ;;  %7182 = vmatprep.mubr.bf16.mxu1 %v3063_v49  ;;  %7042 = vmatprep.mubr.bf16.mxu0 %v1129_v5  ;;  %v3066_v28 = vsel %vm1363_vm3, %v3064_v21, %v3065_v48  ;;  %v1150_v30 = vrot.slane %v1148_v51, 3  ;;  %v1153_v1 = vrot.slane %v1151_v52, 4  ;;  %v8902_v55 = vld [vmem:[#allocation2 + $0xa0] sm:$0xf0] }
 0x204   : > { %7211 = vmatpush3.bf16.msra.mxu1 %v7964_v11  ;;  %v1137_v20 = vor.u32 %v1136_v13, %v1133_v0  ;;  %v1145_v62 = vor.u32 %v1144_v15, %v1141_v50  ;;  %v1158_v38 = vrot.slane %v1156_v36, 3  ;;  %7070 = vmatprep.subr.bf16.mxu0 %v7972_v56  ;;  %v3069_v24 = vsel %vm1363_vm3, %v3067_v9, %v3068_v63  ;;  %v1001_v52 = vld [vmem:[#allocation2 + $0xb0] sm:$0xf8] }
 0x205   : > { %v1161_v39 = vrot.slane %v1159_v35, 4  ;;  %7212 = vmatprep.subr.bf16.mxu1 %v7965_v3  ;;  %v3070_v7 = vrot.slane %v8887_v59, 4  ;;  %v3071_v49 = vrot.slane %v8749_v2, 4  ;;  %v1165_v33 = vshrl.u32 %v997_v58, 16  ;;  %7071 = vmatpush3.bf16.msra.mxu0 %v7972_v56  ;;  %v7975_v56 = vld [vmem:[#allocation8 + $0xb0] sm:$0xff]   ;;  %v7976_v35 = vld [vmem:[#allocation8 + $0xb8] sm:$0xff]  }
 0x206   : > { %v1154_v21 = vor.u32 %v1153_v1, %v1150_v30  ;;  %v3073_v11 = vrot.slane %v8892_v40, 4  ;;  %v1168_v57 = vshll.u32 %v997_v58, 16  ;;  %7072 = vmatprep.subr.bf16.mxu0 %v7973_v46  ;;  %v3074_v54 = vrot.slane %v8763_v61, 4  ;;  %v8908_v36 = vld [vmem:[#allocation2 + $0xb0] sm:$0xf0] }
 0x207   : > { %v1162_v48 = vor.u32 %v1161_v39, %v1158_v38  ;;  %v1167_v60 = vrot.slane %v1165_v33, 3  ;;  %v1173_v9 = vshrl.u32 %v8755_v31, 16  ;;  %v1176_v63 = vshll.u32 %v8755_v31, 16  ;;  %v1003_v38 = vld [vmem:[#allocation2 + $0xc0] sm:$0xf8]  ;;  %v7974_v33 = vld [vmem:[#allocation8 + $0x170] sm:$0xff]  }
 0x208   : > { %v1146_v2 = vsel %vm929_vm4, %v1137_v20, %v1145_v62  ;;  %7213 = vmatpush3.bf16.msra.mxu1 %v7965_v3  ;;  %v1170_v4 = vrot.slane %v1168_v57, 4  ;;  %v1182_v0 = vshrl.u32 %v999_v43, 16  ;;  %v1185_v29 = vshll.u32 %v999_v43, 16 }
 0x209   : > { %v1175_v5 = vrot.slane %v1173_v9, 3  ;;  %v1178_v13 = vrot.slane %v1176_v63, 4  ;;  %v1190_v51 = vshrl.u32 %v8752_v19, 16  ;;  %v1193_v61 = vshll.u32 %v8752_v19, 16  ;;  %7214 = vmatprep.subr.bf16.mxu1 %v7968_v47  ;;  %7073 = vmatpush3.bf16.msra.mxu0 %v7973_v46 }
 0x20a   : > { %7183 = vmatmul.mubr.bf16.gmra.mrb[8].mxu1 %v3066_v28  ;;  %7043 = vmatmul.mubr.bf16.gmra.mrb[44].mxu0 %v1146_v2  ;;  %v1163_v31 = vsel %vm929_vm4, %v1154_v21, %v1162_v48  ;;  %v3072_v3 = vsel %vm1363_vm3, %v3070_v7, %v3071_v49  ;;  %v1184_v50 = vrot.slane %v1182_v0, 3  ;;  %v1187_v15 = vrot.slane %v1185_v29, 4 }
 0x20b   : > { %7186 = vmatprep.mubr.bf16.mxu1 %v3069_v24  ;;  %7046 = vmatprep.mubr.bf16.mxu0 %v1163_v31  ;;  %v1171_v58 = vor.u32 %v1170_v4, %v1167_v60  ;;  %v1179_v30 = vor.u32 %v1178_v13, %v1175_v5  ;;  %v1192_v1 = vrot.slane %v1190_v51, 3  ;;  %v1195_v19 = vrot.slane %v1193_v61, 4  ;;  %v8918_v60 = vld [vmem:[#allocation2 + $0xc0] sm:$0xf0]  ;;  %v1005_v4 = vld [vmem:[#allocation2 + $0xd0] sm:$0xf8] }
 0x20c   : > { %v3075_v20 = vsel %vm1363_vm3, %v3073_v11, %v3074_v54  ;;  %v3076_v46 = vrot.slane %v8902_v55, 4  ;;  %v3077_v28 = vrot.slane %v8773_v18, 4  ;;  %7215 = vmatpush3.bf16.msra.mxu1 %v7968_v47  ;;  %v1199_v62 = vshrl.u32 %v1001_v52, 16  ;;  %7074 = vmatprep.subr.bf16.mxu0 %v7975_v56  ;;  %v8923_v5 = vld [vmem:[#allocation2 + $0xd0] sm:$0xf0]  ;;  %v7977_v13 = vld [vmem:[#allocation8 + $0x178] sm:$0xff]  }
 0x20d   : > { %v1188_v39 = vor.u32 %v1187_v15, %v1184_v50  ;;  %v3079_v7 = vrot.slane %v8908_v36, 4  ;;  %v3080_v24 = vrot.slane %v8783_v45, 4  ;;  %v1202_v49 = vshll.u32 %v1001_v52, 16  ;;  %7216 = vmatprep.subr.bf16.mxu1 %v7971_v6  ;;  %7075 = vmatpush3.bf16.msra.mxu0 %v7975_v56 }
 0x20e   : > { %v1196_v43 = vor.u32 %v1195_v19, %v1192_v1  ;;  %v1201_v21 = vrot.slane %v1199_v62, 3  ;;  %v1207_v48 = vshrl.u32 %v8776_v27, 16  ;;  %v1210_v11 = vshll.u32 %v8776_v27, 16  ;;  %7076 = vmatprep.subr.bf16.mxu0 %v7976_v35  ;;  %v8934_v62 = vld [vmem:[#allocation2 + $0xe0] sm:$0xf0] }
 0x20f   : > { %v1180_v18 = vsel %vm929_vm4, %v1171_v58, %v1179_v30  ;;  %v1204_v47 = vrot.slane %v1202_v49, 4  ;;  %v1216_v57 = vshrl.u32 %v1003_v38, 16  ;;  %v1219_v54 = vshll.u32 %v1003_v38, 16  ;;  %v1007_v58 = vld [vmem:[#allocation2 + $0xe0] sm:$0xf8] }
 0x210   : > { %v1209_v9 = vrot.slane %v1207_v48, 3  ;;  %v1212_v45 = vrot.slane %v1210_v11, 4  ;;  %v1224_v63 = vshrl.u32 %v8779_v37, 16  ;;  %v1227_v2 = vshll.u32 %v8779_v37, 16  ;;  %7217 = vmatpush3.bf16.msra.mxu1 %v7971_v6  ;;  %v8938_v49 = vld [vmem:[#allocation2 + $0xf0] sm:$0xf0] }
 0x211   : > { %v3078_v0 = vsel %vm1363_vm3, %v3076_v46, %v3077_v28  ;;  %v1205_v29 = vor.u32 %v1204_v47, %v1201_v21  ;;  %v1218_v27 = vrot.slane %v1216_v57, 3  ;;  %v1221_v56 = vrot.slane %v1219_v54, 4  ;;  %7218 = vmatprep.subr.bf16.mxu1 %v7974_v33  ;;  %7077 = vmatpush3.bf16.msra.mxu0 %v7976_v35  ;;  %v1009_v48 = vld [vmem:[#allocation2 + $0xf0] sm:$0xf8] }
 0x212   : > { %7187 = vmatmul.mubr.bf16.gmra.mrb[12].mxu1 %v3072_v3  ;;  %7047 = vmatmul.mubr.bf16.gmra.mrb[48].mxu0 %v1180_v18  ;;  %v1197_v51 = vsel %vm929_vm4, %v1188_v39, %v1196_v43  ;;  %v1213_v61 = vor.u32 %v1212_v45, %v1209_v9  ;;  %v1226_v52 = vrot.slane %v1224_v63, 3  ;;  %v1229_v31 = vrot.slane %v1227_v2, 4 }
 0x213   : > { %7190 = vmatprep.mubr.bf16.mxu1 %v3075_v20  ;;  %7050 = vmatprep.mubr.bf16.mxu0 %v1197_v51  ;;  %v3081_v37 = vsel %vm1363_vm3, %v3079_v7, %v3080_v24  ;;  %v3082_v6 = vrot.slane %v8918_v60, 4  ;;  %v3083_v50 = vrot.slane %v8788_v10, 4  ;;  %v1233_v15 = vshrl.u32 %v1005_v4, 16  ;;  %v8936_v10 = vld [vmem:[#allocation8 + $0x180] sm:$0xff]  }
 0x214   : > { %v1222_v30 = vor.u32 %v1221_v56, %v1218_v27  ;;  %v3085_v35 = vrot.slane %v8923_v5, 4  ;;  %v3086_v3 = vrot.slane %v8802_v53, 4  ;;  %v1236_v1 = vshll.u32 %v1005_v4, 16  ;;  %7219 = vmatpush3.bf16.msra.mxu1 %v7974_v33 }
 0x215   : > { %v1214_v19 = vsel %vm929_vm4, %v1205_v29, %v1213_v61  ;;  %v1235_v46 = vrot.slane %v1233_v15, 3  ;;  %v1241_v20 = vshrl.u32 %v8793_v22, 16  ;;  %v1244_v28 = vshll.u32 %v8793_v22, 16  ;;  %7220 = vmatprep.subr.bf16.mxu1 %v7977_v13 }
 0x216   : > { %v1230_v38 = vor.u32 %v1229_v31, %v1226_v52  ;;  %v1238_v39 = vrot.slane %v1236_v1, 4  ;;  %v1250_v7 = vshrl.u32 %v1007_v58, 16  ;;  %v1253_v24 = vshll.u32 %v1007_v58, 16  ;;  %v3370_v52 = vld [vmem:[#allocation2 + $0x18] sm:$0x1f] }
 0x217   : > { %v1243_v53 = vrot.slane %v1241_v20, 3  ;;  %v1246_v33 = vrot.slane %v1244_v28, 4  ;;  %v1258_v43 = vshrl.u32 %v8795_v23, 16  ;;  %v1261_v21 = vshll.u32 %v8795_v23, 16 }
 0x218   : > { %v1239_v11 = vor.u32 %v1238_v39, %v1235_v46  ;;  %v1252_v22 = vrot.slane %v1250_v7, 3  ;;  %v1255_v18 = vrot.slane %v1253_v24, 4  ;;  %v3088_v47 = vrot.slane %v8934_v62, 4  ;;  %7221 = vmatpush3.bf16.msra.mxu1 %v7977_v13  ;;  %v8018_v39 = vld [vmem:[#allocation2] sm:$0xf0] }
 0x219   : > { %v1247_v57 = vor.u32 %v1246_v33, %v1243_v53  ;;  %v1260_v54 = vrot.slane %v1258_v43, 3  ;;  %v1263_v9 = vrot.slane %v1261_v21, 4  ;;  %v3089_v45 = vrot.slane %v8807_v8, 4  ;;  %7254 = vmatprep.subr.bf16.mxu1 %v8936_v10  ;;  %v1863_v43 = vld [vmem:[#allocation2 + $0x18] sm:$0x1f] }
 0x21a   : > { %7191 = vmatmul.mubr.bf16.gmra.mrb[16].mxu1 %v3078_v0  ;;  %7051 = vmatmul.mubr.bf16.gmra.mrb[52].mxu0 %v1214_v19  ;;  %v1231_v63 = vsel %vm929_vm4, %v1222_v30, %v1230_v38  ;;  %v3091_v23 = vrot.slane %v8938_v49, 4  ;;  %v3092_v2 = vrot.slane %v8817_v44, 4  ;;  %v1267_v4 = vshrl.u32 %v1009_v48, 16 }
 0x21b   : > { %7194 = vmatprep.mubr.bf16.mxu1 %v3081_v37  ;;  %7054 = vmatprep.mubr.bf16.mxu0 %v1231_v63  ;;  %v3084_v29 = vsel %vm1363_vm3, %v3082_v6, %v3083_v50  ;;  %v1256_v27 = vor.u32 %v1255_v18, %v1252_v22  ;;  %v1264_v56 = vor.u32 %v1263_v9, %v1260_v54  ;;  %v1270_v13 = vshll.u32 %v1009_v48, 16  ;;  %v8959_v50 = vld [vmem:[#allocation2 + $0x100] sm:$0xf0]  ;;  %v8019_v54 = vld [vmem:[#allocation2 + $0x10] sm:$0xf0] }
 0x21c   : > { %v3087_v8 = vsel %vm1363_vm3, %v3085_v35, %v3086_v3  ;;  %v1269_v51 = vrot.slane %v1267_v4, 3  ;;  %v1275_v0 = vshrl.u32 %v8811_v25, 16  ;;  %v1278_v61 = vshll.u32 %v8811_v25, 16  ;;  %v1862_v3 = vld [vmem:[#allocation2 + $0x8] sm:$0x1f] }
 0x21d   : > { %v1248_v31 = vsel %vm929_vm4, %v1239_v11, %v1247_v57  ;;  %v8954_v44 = vsel %vm1363_vm3, %v3088_v47, %v3089_v45  ;;  %v8957_v37 = vsel %vm1363_vm3, %v3091_v23, %v3092_v2  ;;  %v1272_v6 = vrot.slane %v1270_v13, 4  ;;  %v1864_v4 = vld [vmem:[#allocation2 + $0x28] sm:$0x1f]  ;;  %v8020_v13 = vld [vmem:[#allocation2 + $0x20] sm:$0xf0] }
 0x21e   : > { %v1277_v15 = vrot.slane %v1275_v0, 3  ;;  %v1280_v58 = vrot.slane %v1278_v61, 4  ;;  %v3387_v30 = vshrl.u32 %v8826_v32, 16  ;;  %v3390_v35 = vshll.u32 %v8826_v32, 16 }
 0x21f   : > { %v1265_v25 = vsel %vm929_vm4, %v1256_v27, %v1264_v56  ;;  %v1273_v1 = vor.u32 %v1272_v6, %v1269_v51  ;;  %v3395_v19 = vshrl.u32 %v3370_v52, 16  ;;  %v3398_v46 = vshll.u32 %v3370_v52, 16 }
 0x220   : > { %v1281_v20 = vor.u32 %v1280_v58, %v1277_v15  ;;  %v3094_v28 = vrot.slane %v8959_v50, 4  ;;  %v3095_v38 = vrot.slane %v8823_v12, 4  ;;  %v1880_v7 = vshrl.u32 %v8018_v39, 16 }
 0x221   : > { %v8966_v24 = vrot.slane %v3387_v30, 4  ;;  %v8968_v53 = vrot.slane %v3390_v35, 5  ;;  %v1883_v33 = vshll.u32 %v8018_v39, 16  ;;  %v1888_v32 = vshrl.u32 %v1862_v3, 16  ;;  %v3371_v30 = vld [vmem:[#allocation2 + $0x28] sm:$0x1f] }
 0x222   : > { %7195 = vmatmul.mubr.bf16.gmra.mrb[20].mxu1 %v3084_v29  ;;  %7055 = vmatmul.mubr.bf16.gmra.mrb[56].mxu0 %v1248_v31  ;;  %v8970_v21 = vrot.slane %v3395_v19, 4  ;;  %v8972_v48 = vrot.slane %v3398_v46, 5  ;;  %v1882_v11 = vrot.slane %v1880_v7, 4  ;;  %v1891_v22 = vshll.u32 %v1862_v3, 16  ;;  %v937_v19 = vld [vmem:[#allocation2 + $0x38] sm:$0x10] }
 0x223   : > { %7198 = vmatprep.mubr.bf16.mxu1 %v3087_v8  ;;  %7058 = vmatprep.mubr.bf16.mxu0 %v1265_v25  ;;  %v1282_v18 = vsel %vm929_vm4, %v1273_v1, %v1281_v20  ;;  %v1885_v47 = vrot.slane %v1883_v33, 5  ;;  %v1890_v57 = vrot.slane %v1888_v32, 4  ;;  %v1897_v9 = vshrl.u32 %v8019_v54, 16 }
 0x224   : > { %v1893_v45 = vrot.slane %v1891_v22, 5  ;;  %v1900_v63 = vshll.u32 %v8019_v54, 16  ;;  %v1905_v23 = vshrl.u32 %v1863_v43, 16  ;;  %v1908_v2 = vshll.u32 %v1863_v43, 16  ;;  %v940_v22 = vld [vmem:[#allocation2 + $0x48] sm:$0x10] }
 0x225   : > { %v3393_v29 = vor.u32 %v8968_v53, %v8966_v24  ;;  %v1886_v27 = vor.u32 %v1885_v47, %v1882_v11  ;;  %v1899_v56 = vrot.slane %v1897_v9, 4  ;;  %v1914_v51 = vshrl.u32 %v8020_v13, 16  ;;  %v8021_v54 = vld [vmem:[#allocation2 + $0x30] sm:$0xf0] }
 0x226   : > { %v1894_v8 = vor.u32 %v1893_v45, %v1890_v57  ;;  %v1902_v0 = vrot.slane %v1900_v63, 5  ;;  %v1907_v61 = vrot.slane %v1905_v23, 4  ;;  %v1910_v52 = vrot.slane %v1908_v2, 5 }
 0x227   : > { %v1916_v31 = vrot.slane %v1914_v51, 4  ;;  %v1917_v6 = vshll.u32 %v8020_v13, 16  ;;  %v1922_v15 = vshrl.u32 %v1864_v4, 16  ;;  %v1925_v58 = vshll.u32 %v1864_v4, 16 }
 0x228   : > { %v3401_v35 = vor.u32 %v8972_v48, %v8970_v21  ;;  %v1895_v3 = vsel %vm1878_vm7, %v1886_v27, %v1894_v8  ;;  %v1903_v25 = vor.u32 %v1902_v0, %v1899_v56  ;;  %v3404_v1 = vshrl.u32 %v8837_v34, 16  ;;  %v943_v27 = vld [vmem:[#allocation2 + $0x58] sm:$0x10]  ;;  %v8022_v56 = vld [vmem:[#allocation2 + $0x40] sm:$0xf0] }
 0x229   : > { %v1919_v46 = vrot.slane %v1917_v6, 5  ;;  %v1924_v20 = vrot.slane %v1922_v15, 4  ;;  %v1927_v39 = vrot.slane %v1925_v58, 5  ;;  %v3407_v7 = vshll.u32 %v8837_v34, 16 }
 0x22a   : > { %7199 = vmatmul.mubr.bf16.gmra.mrb[24].mxu1 %v8954_v44  ;;  %7059 = vmatmul.mubr.bf16.gmra.mrb[60].mxu0 %v1282_v18  ;;  %v1911_v24 = vor.u32 %v1910_v52, %v1907_v61  ;;  %v3406_v53 = vrot.slane %v3404_v1, 4  ;;  %v3412_v33 = vshrl.u32 %v3371_v30, 16  ;;  %v3415_v32 = vshll.u32 %v3371_v30, 16  ;;  %v8023_v1 = vld [vmem:[#allocation2 + $0x50] sm:$0xf0] }
 0x22b   : > { %7202 = vmatprep.mubr.bf16.mxu1 %v8957_v37  ;;  %7078 = vmatprep.mubr.bf16.mxu0 %v1895_v3  ;;  %v1920_v43 = vor.u32 %v1919_v46, %v1916_v31  ;;  %v1928_v21 = vor.u32 %v1927_v39, %v1924_v20  ;;  %v3409_v48 = vrot.slane %v3407_v7, 5  ;;  %v938_v11 = vsel %vm8633_vm6, 0, %v937_v19 }
 0x22c   : > { %v3414_v47 = vrot.slane %v3412_v33, 4  ;;  %v3417_v57 = vrot.slane %v3415_v32, 5  ;;  %939 = vst [vmem:[#allocation2 + $0x38] sm:$0x10] %v938_v11  ;;  %v3421_v34 = vshrl.u32 %v8842_v42, 16  ;;  %v3424_v44 = vshll.u32 %v8842_v42, 16 }
 0x22d   : > { %v3096_v37 = vsel %vm1363_vm3, %v3094_v28, %v3095_v38  ;;  %v3410_v18 = vor.u32 %v3409_v48, %v3406_v53  ;;  %v1931_v9 = vshrl.u32 %v8021_v54, 16  ;;  %v1934_v45 = vshll.u32 %v8021_v54, 16 }
 0x22e   : > { %v3418_v63 = vor.u32 %v3417_v57, %v3414_v47  ;;  %v8993_v23 = vrot.slane %v3421_v34, 4  ;;  %v8995_v2 = vrot.slane %v3424_v44, 5  ;;  %v941_v4 = vsel %vm8633_vm6, 0, %v940_v22 }
 0x22f   : > { %v8999_v42 = vrot.slane %v1931_v9, 4  ;;  %v9001_v12 = vrot.slane %v1934_v45, 5  ;;  %942 = vst [vmem:[#allocation2 + $0x48] sm:$0x10] %v941_v4  ;;  %v1948_v28 = vshrl.u32 %v8022_v56, 16  ;;  %v1951_v38 = vshll.u32 %v8022_v56, 16 }
 0x230   : > { %v3402_v13 = vsel %vm1878_vm7, %v3393_v29, %v3401_v35  ;;  %v1912_v51 = vsel %vm1878_vm7, %v1903_v25, %v1911_v24  ;;  %v1929_v8 = vsel %vm1878_vm7, %v1920_v43, %v1928_v21  ;;  %v3438_v0 = vshrl.u32 %v8853_v16, 16  ;;  %v7979_v9 = vld [vmem:[#allocation8 + $0x188] sm:$0xff]  }
 0x231   : > { %v9007_v61 = vrot.slane %v1948_v28, 4  ;;  %v9009_v52 = vrot.slane %v1951_v38, 5  ;;  %v3441_v31 = vshll.u32 %v8853_v16, 16  ;;  %v944_v6 = vsel %vm8633_vm6, 0, %v943_v27 }
 0x232   : > { %7203 = vmatmul.mubr.bf16.gmra.mrb[28].mxu1 %v3096_v37  ;;  %7079 = vmatmul.mubr.bf16.vlgmr.msra.gmra.mrb[32].mxu0 %v1912_v51  ;;  %v3419_v15 = vsel %vm1878_vm7, %v3410_v18, %v3418_v63  ;;  %v9015_v29 = vrot.slane %v3438_v0, 4  ;;  %945 = vst [vmem:[#allocation2 + $0x58] sm:$0x10] %v944_v6  ;;  %v3455_v58 = vshrl.u32 %v8859_v14, 16  ;;  %v3458_v30 = vshll.u32 %v8859_v14, 16 }
 0x233   : > { %7222 = vmatprep.mubr.bf16.mxu1 %v3402_v13  ;;  %7082 = vmatprep.mubr.bf16.mxu0 %v1929_v8  ;;  %v3372_v35 = vld [vmem:[#allocation2 + $0x38] sm:$0x1f]  ;;  %v3427_v16 = vor.u32 %v8995_v2, %v8993_v23  ;;  %v1937_v25 = vor.u32 %v9001_v12, %v8999_v42  ;;  %v1965_v19 = vshrl.u32 %v8023_v1, 16  ;;  %v1968_v46 = vshll.u32 %v8023_v1, 16  ;;  %v946_v23 = vld [vmem:[#allocation2 + $0x68] sm:$0x10] }
 0x234   : > { %v1865_v3 = vld [vmem:[#allocation2 + $0x38] sm:$0x1f]  ;;  %v3429_v20 = vshrl.u32 %v3372_v35, 16  ;;  %v3432_v39 = vshll.u32 %v3372_v35, 16  ;;  %v1954_v14 = vor.u32 %v9009_v52, %v9007_v61  ;;  %v9025_v53 = vrot.slane %v3441_v31, 5 }
 0x235   : > { %v1939_v7 = vshrl.u32 %v1865_v3, 16  ;;  %v1942_v24 = vshll.u32 %v1865_v3, 16  ;;  %v9027_v33 = vrot.slane %v3455_v58, 4  ;;  %v9029_v32 = vrot.slane %v3458_v30, 5  ;;  %v7980_v30 = vld [vmem:[#allocation8 + $0x190] sm:$0xff]  }
 0x236   : > { %v3431_v43 = vrot.slane %v3429_v20, 4  ;;  %v3434_v21 = vrot.slane %v3432_v39, 5  ;;  %v1866_v22 = vld [vmem:[#allocation2 + $0x48] sm:$0x1f]  ;;  %v9031_v44 = vrot.slane %v1965_v19, 4  ;;  %v9033_v37 = vrot.slane %v1968_v46, 5 }
 0x237   : > { %v1941_v48 = vrot.slane %v1939_v7, 4  ;;  %v1944_v11 = vrot.slane %v1942_v24, 5  ;;  %v1956_v47 = vshrl.u32 %v1866_v22, 16  ;;  %v1959_v57 = vshll.u32 %v1866_v22, 16  ;;  %v3373_v34 = vld [vmem:[#allocation2 + $0x48] sm:$0x1f] }
 0x238   : > { %v3435_v18 = vor.u32 %v3434_v21, %v3431_v43  ;;  %v3446_v45 = vshrl.u32 %v3373_v34, 16  ;;  %v3449_v63 = vshll.u32 %v3373_v34, 16  ;;  %v3444_v27 = vor.u32 %v9025_v53, %v9015_v29  ;;  %v8024_v29 = vld [vmem:[#allocation2 + $0x60] sm:$0xf0]  ;;  %v949_v35 = vld [vmem:[#allocation2 + $0x78] sm:$0x10] }
 0x239   : > { %v1945_v54 = vor.u32 %v1944_v11, %v1941_v48  ;;  %v1958_v2 = vrot.slane %v1956_v47, 4  ;;  %v1961_v4 = vrot.slane %v1959_v57, 5  ;;  %v3374_v42 = vld [vmem:[#allocation2 + $0x58] sm:$0x1f]  ;;  %v3461_v12 = vor.u32 %v9029_v32, %v9027_v33  ;;  %v952_v21 = vld [vmem:[#allocation2 + $0x88] sm:$0x10] }
 0x23a   : > { %v1867_v56 = vld [vmem:[#allocation2 + $0x58] sm:$0x1f]  ;;  %7223 = vmatmul.mubr.bf16.vlgmr.msra.gmra.mrb[0].mxu1 %v3419_v15  ;;  %v3436_v28 = vsel %vm1878_vm7, %v3427_v16, %v3435_v18  ;;  %v3448_v13 = vrot.slane %v3446_v45, 4  ;;  %v3451_v51 = vrot.slane %v3449_v63, 5  ;;  %v3463_v0 = vshrl.u32 %v3374_v42, 16  ;;  %v7982_v63 = vld [vmem:[#allocation8 + $0x1a0] sm:$0xff]  }
 0x23b   : > { %v1946_v38 = vsel %vm1878_vm7, %v1937_v25, %v1945_v54  ;;  %7255 = vmatpush3.bf16.msra.mxu1 %v8936_v10  ;;  %7226 = vmatprep.mubr.bf16.mxu1 %v3436_v28  ;;  %v1962_v8 = vor.u32 %v1961_v4, %v1958_v2  ;;  %v3466_v61 = vshll.u32 %v3374_v42, 16  ;;  %v1973_v52 = vshrl.u32 %v1867_v56, 16  ;;  %v7981_v48 = vld [vmem:[#allocation8 + $0x198] sm:$0xff]   ;;  %v8025_v57 = vld [vmem:[#allocation2 + $0x70] sm:$0xf0] }
 0x23c   : > { %7083 = vmatmul.mubr.bf16.gmra.mrb[36].mxu0 %v1946_v38  ;;  %7256 = vmatprep.subr.bf16.mxu1 %v7979_v9  ;;  %v3452_v31 = vor.u32 %v3451_v51, %v3448_v13  ;;  %v1976_v6 = vshll.u32 %v1867_v56, 16  ;;  %v947_v15 = vsel %vm8633_vm6, 0, %v946_v23  ;;  %v1982_v58 = vshrl.u32 %v8024_v29, 16  ;;  %v8026_v42 = vld [vmem:[#allocation2 + $0x80] sm:$0xf0] }
 0x23d   : > { %v1963_v16 = vsel %vm1878_vm7, %v1954_v14, %v1962_v8  ;;  %v3465_v3 = vrot.slane %v3463_v0, 4  ;;  %v3468_v10 = vrot.slane %v3466_v61, 5  ;;  %v1975_v25 = vrot.slane %v1973_v52, 4  ;;  %948 = vst [vmem:[#allocation2 + $0x68] sm:$0x10] %v947_v15 }
 0x23e   : > { %7086 = vmatprep.mubr.bf16.mxu0 %v1963_v16  ;;  %v1971_v1 = vor.u32 %v9033_v37, %v9031_v44  ;;  %v1978_v19 = vrot.slane %v1976_v6, 5  ;;  %v9047_v46 = vrot.slane %v1982_v58, 4  ;;  %v1985_v20 = vshll.u32 %v8024_v29, 16 }
 0x23f   : > { %7257 = vmatpush3.bf16.msra.mxu1 %v7979_v9  ;;  %v3469_v39 = vor.u32 %v3468_v10, %v3465_v3  ;;  %v3472_v7 = vshrl.u32 %v8870_v26, 16  ;;  %v3475_v24 = vshll.u32 %v8870_v26, 16  ;;  %v950_v14 = vsel %vm8633_vm6, 0, %v949_v35 }
 0x240   : > { %v1979_v53 = vor.u32 %v1978_v19, %v1975_v25  ;;  %v9053_v33 = vrot.slane %v1985_v20, 5  ;;  %7258 = vmatprep.subr.bf16.mxu1 %v7980_v30  ;;  %951 = vst [vmem:[#allocation2 + $0x78] sm:$0x10] %v950_v14  ;;  %v3489_v32 = vshrl.u32 %v8876_v41, 16  ;;  %v3492_v43 = vshll.u32 %v8876_v41, 16  ;;  %v7983_v20 = vld [vmem:[#allocation8 + $0x1a8] sm:$0xff]  }
 0x241   : > { %v3453_v11 = vsel %vm1878_vm7, %v3444_v27, %v3452_v31  ;;  %v3474_v22 = vrot.slane %v3472_v7, 4  ;;  %v3477_v47 = vrot.slane %v3475_v24, 5  ;;  %v1999_v26 = vshrl.u32 %v8025_v57, 16 }
 0x242   : > { %7227 = vmatmul.mubr.bf16.gmra.mrb[4].mxu1 %v3453_v11  ;;  %v3470_v34 = vsel %vm1878_vm7, %v3461_v12, %v3469_v39  ;;  %v1980_v44 = vsel %vm1878_vm7, %v1971_v1, %v1979_v53  ;;  %v9060_v37 = vrot.slane %v3489_v32, 4  ;;  %v9062_v18 = vrot.slane %v3492_v43, 5  ;;  %v955_v53 = vld [vmem:[#allocation2 + $0x98] sm:$0x10] }
 0x243   : > { %7230 = vmatprep.mubr.bf16.mxu1 %v3470_v34  ;;  %v1988_v41 = vor.u32 %v9053_v33, %v9047_v46  ;;  %7259 = vmatpush3.bf16.msra.mxu1 %v7980_v30  ;;  %v9066_v54 = vrot.slane %v1999_v26, 4  ;;  %v2002_v9 = vshll.u32 %v8025_v57, 16  ;;  %v953_v45 = vsel %vm8633_vm6, 0, %v952_v21  ;;  %v7984_v34 = vld [vmem:[#allocation8 + $0x1b0] sm:$0xff]  }
 0x244   : > { %7087 = vmatmul.mubr.bf16.gmra.mrb[40].mxu0 %v1980_v44  ;;  %v1868_v23 = vld [vmem:[#allocation2 + $0x68] sm:$0x1f]  ;;  %v3478_v4 = vor.u32 %v3477_v47, %v3474_v22  ;;  %v3495_v27 = vor.u32 %v9062_v18, %v9060_v37  ;;  %954 = vst [vmem:[#allocation2 + $0x88] sm:$0x10] %v953_v45  ;;  %v2016_v12 = vshrl.u32 %v8026_v42, 16  ;;  %v2019_v56 = vshll.u32 %v8026_v42, 16  ;;  %7260 = vmatprep.subr.bf16.mxu1 %v7981_v48 }
 0x245   : > { %v3375_v2 = vld [vmem:[#allocation2 + $0x68] sm:$0x1f]  ;;  %v1990_v28 = vshrl.u32 %v1868_v23, 16  ;;  %v1993_v38 = vshll.u32 %v1868_v23, 16  ;;  %v2004_v8 = vrot.slane %v2002_v9, 5  ;;  %v3506_v52 = vshrl.u32 %v8887_v59, 16 }
 0x246   : > { %v3480_v13 = vshrl.u32 %v3375_v2, 16  ;;  %v3483_v51 = vshll.u32 %v3375_v2, 16  ;;  %v9072_v0 = vrot.slane %v2016_v12, 4  ;;  %v9074_v61 = vrot.slane %v2019_v56, 5 }
 0x247   : > { %v1992_v31 = vrot.slane %v1990_v28, 4  ;;  %v1995_v6 = vrot.slane %v1993_v38, 5  ;;  %v3376_v58 = vld [vmem:[#allocation2 + $0x78] sm:$0x1f]  ;;  %7261 = vmatpush3.bf16.msra.mxu1 %v7981_v48  ;;  %v2005_v3 = vor.u32 %v2004_v8, %v9066_v54  ;;  %v3508_v24 = vrot.slane %v3506_v52, 4 }
 0x248   : > { %v3482_v15 = vrot.slane %v3480_v13, 4  ;;  %v3485_v29 = vrot.slane %v3483_v51, 5  ;;  %v3497_v30 = vshrl.u32 %v3376_v58, 16  ;;  %v3500_v35 = vshll.u32 %v3376_v58, 16  ;;  %v1869_v16 = vld [vmem:[#allocation2 + $0x78] sm:$0x1f]  ;;  %7262 = vmatprep.subr.bf16.mxu1 %v7982_v63 }
 0x249   : > { %v2022_v10 = vor.u32 %v9074_v61, %v9072_v0  ;;  %v1996_v25 = vor.u32 %v1995_v6, %v1992_v31  ;;  %v2007_v19 = vshrl.u32 %v1869_v16, 16  ;;  %v2010_v46 = vshll.u32 %v1869_v16, 16  ;;  %v8027_v28 = vld [vmem:[#allocation2 + $0x90] sm:$0xf0]  ;;  %v7985_v13 = vld [vmem:[#allocation8 + $0x1b8] sm:$0xff]  }
 0x24a   : > { %v3486_v1 = vor.u32 %v3485_v29, %v3482_v15  ;;  %v3499_v39 = vrot.slane %v3497_v30, 4  ;;  %v3502_v7 = vrot.slane %v3500_v35, 5  ;;  %v3509_v14 = vshll.u32 %v8887_v59, 16  ;;  %v8028_v61 = vld [vmem:[#allocation2 + $0xa0] sm:$0xf0] }
 0x24b   : > { %v1997_v33 = vsel %vm1878_vm7, %v1988_v41, %v1996_v25  ;;  %v2009_v43 = vrot.slane %v2007_v19, 4  ;;  %v2012_v21 = vrot.slane %v2010_v46, 5  ;;  %v1870_v48 = vld [vmem:[#allocation2 + $0x88] sm:$0x1f]  ;;  %7263 = vmatpush3.bf16.msra.mxu1 %v7982_v63  ;;  %v956_v18 = vsel %vm8633_vm6, 0, %v955_v53 }
 0x24c   : > { %v3487_v32 = vsel %vm1878_vm7, %v3478_v4, %v3486_v1  ;;  %v3377_v11 = vld [vmem:[#allocation2 + $0x88] sm:$0x1f]  ;;  %7090 = vmatprep.mubr.bf16.mxu0 %v1997_v33  ;;  %v3503_v22 = vor.u32 %v3502_v7, %v3499_v39  ;;  %v2024_v47 = vshrl.u32 %v1870_v48, 16  ;;  %v2027_v57 = vshll.u32 %v1870_v48, 16  ;;  %7264 = vmatprep.subr.bf16.mxu1 %v7983_v20  ;;  %957 = vst [vmem:[#allocation2 + $0x98] sm:$0x10] %v956_v18 }
 0x24d   : > { %7231 = vmatmul.mubr.bf16.gmra.mrb[8].mxu1 %v3487_v32  ;;  %v3511_v26 = vrot.slane %v3509_v14, 5  ;;  %v2013_v44 = vor.u32 %v2012_v21, %v2009_v43  ;;  %v3514_v37 = vshrl.u32 %v3377_v11, 16  ;;  %v3517_v59 = vshll.u32 %v3377_v11, 16  ;;  %v958_v63 = vld [vmem:[#allocation2 + $0xa8] sm:$0x10] }
 0x24e   : > { %v3504_v41 = vsel %vm1878_vm7, %v3495_v27, %v3503_v22  ;;  %v2026_v54 = vrot.slane %v2024_v47, 4  ;;  %v2029_v9 = vrot.slane %v2027_v57, 5  ;;  %v3523_v42 = vshrl.u32 %v8892_v40, 16  ;;  %v961_v31 = vld [vmem:[#allocation2 + $0xb8] sm:$0x10] }
 0x24f   : > { %v3512_v45 = vor.u32 %v3511_v26, %v3508_v24  ;;  %7234 = vmatprep.mubr.bf16.mxu1 %v3504_v41  ;;  %v2014_v23 = vsel %vm1878_vm7, %v2005_v3, %v2013_v44  ;;  %v3516_v2 = vrot.slane %v3514_v37, 4  ;;  %v3519_v4 = vrot.slane %v3517_v59, 5  ;;  %7265 = vmatpush3.bf16.msra.mxu1 %v7983_v20 }
 0x250   : > { %7091 = vmatmul.mubr.bf16.gmra.mrb[44].mxu0 %v2014_v23  ;;  %v2030_v12 = vor.u32 %v2029_v9, %v2026_v54  ;;  %v3526_v56 = vshll.u32 %v8892_v40, 16  ;;  %v2033_v38 = vshrl.u32 %v8027_v28, 16  ;;  %v2036_v27 = vshll.u32 %v8027_v28, 16  ;;  %7266 = vmatprep.subr.bf16.mxu1 %v7984_v34 }
 0x251   : > { %v3520_v51 = vor.u32 %v3519_v4, %v3516_v2  ;;  %v3525_v8 = vrot.slane %v3523_v42, 4  ;;  %v959_v0 = vsel %vm8633_vm6, 0, %v958_v63  ;;  %v2050_v52 = vshrl.u32 %v8028_v61, 16  ;;  %v8029_v63 = vld [vmem:[#allocation2 + $0xb0] sm:$0xf0] }
 0x252   : > { %v2031_v6 = vsel %vm1878_vm7, %v2022_v10, %v2030_v12  ;;  %v3528_v15 = vrot.slane %v3526_v56, 5  ;;  %v2035_v29 = vrot.slane %v2033_v38, 4  ;;  %960 = vst [vmem:[#allocation2 + $0xa8] sm:$0x10] %v959_v0  ;;  %v2038_v58 = vrot.slane %v2036_v27, 5  ;;  %v9099_v10 = vld [vmem:[#allocation8 + $0x1c0] sm:$0xff]  }
 0x253   : > { %7094 = vmatprep.mubr.bf16.mxu0 %v2031_v6  ;;  %v3521_v40 = vsel %vm1878_vm7, %v3512_v45, %v3520_v51  ;;  %v2053_v30 = vshll.u32 %v8028_v61, 16  ;;  %v3540_v35 = vshrl.u32 %v8902_v55, 16  ;;  %7267 = vmatpush3.bf16.msra.mxu1 %v7984_v34  ;;  %v9094_v16 = vrot.slane %v2050_v52, 4  ;;  %v3378_v1 = vld [vmem:[#allocation2 + $0x98] sm:$0x1f] }
 0x254   : > { %v3543_v3 = vshll.u32 %v8902_v55, 16  ;;  %v962_v25 = vsel %vm8633_vm6, 0, %v961_v31  ;;  %7268 = vmatprep.subr.bf16.mxu1 %v7985_v13  ;;  %v3529_v19 = vor.u32 %v3528_v15, %v3525_v8  ;;  %v1871_v46 = vld [vmem:[#allocation2 + $0x98] sm:$0x1f]  ;;  %v3531_v7 = vshrl.u32 %v3378_v1, 16 }
 0x255   : > { %7235 = vmatmul.mubr.bf16.gmra.mrb[12].mxu1 %v3521_v40  ;;  %v2055_v20 = vrot.slane %v2053_v30, 5  ;;  %v3542_v39 = vrot.slane %v3540_v35, 4  ;;  %963 = vst [vmem:[#allocation2 + $0xb8] sm:$0x10] %v962_v25  ;;  %v3534_v24 = vshll.u32 %v3378_v1, 16  ;;  %v2041_v14 = vshrl.u32 %v1871_v46, 16 }
 0x256   : > { %v2044_v53 = vshll.u32 %v1871_v46, 16  ;;  %v2039_v33 = vor.u32 %v2038_v58, %v2035_v29  ;;  %v3545_v32 = vrot.slane %v3543_v3, 5  ;;  %v3557_v55 = vshrl.u32 %v8908_v36, 16  ;;  %v964_v8 = vld [vmem:[#allocation2 + $0xc8] sm:$0x10] }
 0x257   : > { %v3560_v43 = vshll.u32 %v8908_v36, 16  ;;  %7269 = vmatpush3.bf16.msra.mxu1 %v7985_v13  ;;  %v3533_v21 = vrot.slane %v3531_v7, 4  ;;  %v3536_v48 = vrot.slane %v3534_v24, 5  ;;  %v2043_v11 = vrot.slane %v2041_v14, 4  ;;  %v967_v3 = vld [vmem:[#allocation2 + $0xd8] sm:$0x10] }
 0x258   : > { %v2046_v22 = vrot.slane %v2044_v53, 5  ;;  %7302 = vmatprep.subr.bf16.mxu1 %v9099_v10  ;;  %v2056_v57 = vor.u32 %v2055_v20, %v9094_v16  ;;  %v3546_v34 = vor.u32 %v3545_v32, %v3542_v39  ;;  %v3559_v44 = vrot.slane %v3557_v55, 4  ;;  %v8030_v46 = vld [vmem:[#allocation2 + $0xc0] sm:$0xf0] }
 0x259   : > { %v1872_v47 = vld [vmem:[#allocation2 + $0xa8] sm:$0x1f]  ;;  %v3562_v37 = vrot.slane %v3560_v43, 5  ;;  %v3537_v59 = vor.u32 %v3536_v48, %v3533_v21  ;;  %v2067_v23 = vshrl.u32 %v8029_v63, 16  ;;  %v2070_v52 = vshll.u32 %v8029_v63, 16 }
 0x25a   : > { %v3379_v26 = vld [vmem:[#allocation2 + $0xa8] sm:$0x1f]  ;;  %v2047_v18 = vor.u32 %v2046_v22, %v2043_v11  ;;  %v2058_v41 = vshrl.u32 %v1872_v47, 16  ;;  %v2061_v54 = vshll.u32 %v1872_v47, 16  ;;  %v965_v16 = vsel %vm8633_vm6, 0, %v964_v8 }
 0x25b   : > { %v3548_v9 = vshrl.u32 %v3379_v26, 16  ;;  %v3551_v36 = vshll.u32 %v3379_v26, 16  ;;  %v3563_v45 = vor.u32 %v3562_v37, %v3559_v44  ;;  %v3538_v2 = vsel %vm1878_vm7, %v3529_v19, %v3537_v59  ;;  %966 = vst [vmem:[#allocation2 + $0xc8] sm:$0x10] %v965_v16  ;;  %v970_v43 = vld [vmem:[#allocation2 + $0xe8] sm:$0x10] }
 0x25c   : > { %v2048_v4 = vsel %vm1878_vm7, %v2039_v33, %v2047_v18  ;;  %v2060_v42 = vrot.slane %v2058_v41, 4  ;;  %v2063_v12 = vrot.slane %v2061_v54, 5  ;;  %v3380_v56 = vld [vmem:[#allocation2 + $0xb8] sm:$0x1f]  ;;  %7238 = vmatprep.mubr.bf16.mxu1 %v3538_v2  ;;  %v2069_v61 = vrot.slane %v2067_v23, 4 }
 0x25d   : > { %v1873_v28 = vld [vmem:[#allocation2 + $0xb8] sm:$0x1f]  ;;  %7095 = vmatmul.mubr.bf16.gmra.mrb[48].mxu0 %v2048_v4  ;;  %v3550_v38 = vrot.slane %v3548_v9, 4  ;;  %v3553_v27 = vrot.slane %v3551_v36, 5  ;;  %v3565_v13 = vshrl.u32 %v3380_v56, 16  ;;  %v3568_v51 = vshll.u32 %v3380_v56, 16 }
 0x25e   : > { %v2064_v0 = vor.u32 %v2063_v12, %v2060_v42  ;;  %v2075_v31 = vshrl.u32 %v1873_v28, 16  ;;  %v2078_v40 = vshll.u32 %v1873_v28, 16  ;;  %v2072_v30 = vrot.slane %v2070_v52, 5  ;;  %v8032_v18 = vld [vmem:[#allocation2 + $0xe0] sm:$0xf0] }
 0x25f   : > { %v3554_v6 = vor.u32 %v3553_v27, %v3550_v38  ;;  %v3567_v15 = vrot.slane %v3565_v13, 4  ;;  %v3570_v29 = vrot.slane %v3568_v51, 5  ;;  %v2084_v20 = vshrl.u32 %v8030_v46, 16 }
 0x260   : > { %v2065_v58 = vsel %vm1878_vm7, %v2056_v57, %v2064_v0  ;;  %v2077_v35 = vrot.slane %v2075_v31, 4  ;;  %v2080_v19 = vrot.slane %v2078_v40, 5  ;;  %v2073_v39 = vor.u32 %v2072_v30, %v2069_v61 }
 0x261   : > { %7098 = vmatprep.mubr.bf16.mxu0 %v2065_v58  ;;  %v3555_v25 = vsel %vm1878_vm7, %v3546_v34, %v3554_v6  ;;  %v3571_v1 = vor.u32 %v3570_v29, %v3567_v15  ;;  %v2087_v7 = vshll.u32 %v8030_v46, 16  ;;  %v3574_v24 = vshrl.u32 %v8918_v60, 16 }
 0x262   : > { %7239 = vmatmul.mubr.bf16.gmra.mrb[16].mxu1 %v3555_v25  ;;  %v3577_v14 = vshll.u32 %v8918_v60, 16  ;;  %v2081_v33 = vor.u32 %v2080_v19, %v2077_v35  ;;  %v2086_v32 = vrot.slane %v2084_v20, 4  ;;  %v968_v55 = vsel %vm8633_vm6, 0, %v967_v3  ;;  %v8031_v60 = vld [vmem:[#allocation2 + $0xd0] sm:$0xf0] }
 0x263   : > { %v3572_v53 = vsel %vm1878_vm7, %v3563_v45, %v3571_v1  ;;  %v2089_v21 = vrot.slane %v2087_v7, 5  ;;  %v3576_v48 = vrot.slane %v3574_v24, 4  ;;  %969 = vst [vmem:[#allocation2 + $0xd8] sm:$0x10] %v968_v55  ;;  %v3591_v22 = vshrl.u32 %v8923_v5, 16 }
 0x264   : > { %7242 = vmatprep.mubr.bf16.mxu1 %v3572_v53  ;;  %v3579_v11 = vrot.slane %v3577_v14, 5  ;;  %v2082_v47 = vsel %vm1878_vm7, %v2073_v39, %v2081_v33  ;;  %v3594_v57 = vshll.u32 %v8923_v5, 16  ;;  %v2101_v26 = vshrl.u32 %v8031_v60, 16  ;;  %v1874_v54 = vld [vmem:[#allocation2 + $0xc8] sm:$0x1f] }
 0x265   : > { %7099 = vmatmul.mubr.bf16.gmra.mrb[52].mxu0 %v2082_v47  ;;  %v2104_v34 = vshll.u32 %v8031_v60, 16  ;;  %v971_v44 = vsel %vm8633_vm6, 0, %v970_v43  ;;  %v3593_v37 = vrot.slane %v3591_v22, 4  ;;  %v2118_v41 = vshrl.u32 %v8032_v18, 16  ;;  %v3381_v36 = vld [vmem:[#allocation2 + $0xc8] sm:$0x1f] }
 0x266   : > { %v3596_v59 = vrot.slane %v3594_v57, 5  ;;  %972 = vst [vmem:[#allocation2 + $0xe8] sm:$0x10] %v971_v44  ;;  %v2090_v9 = vor.u32 %v2089_v21, %v2086_v32  ;;  %v3580_v45 = vor.u32 %v3579_v11, %v3576_v48  ;;  %v2121_v63 = vshll.u32 %v8032_v18, 16  ;;  %v973_v35 = vld [vmem:[#allocation2 + $0xf8] sm:$0x10] }
 0x267   : > { %v3608_v23 = vshrl.u32 %v8934_v62, 16  ;;  %v2092_v5 = vshrl.u32 %v1874_v54, 16  ;;  %v2095_v2 = vshll.u32 %v1874_v54, 16  ;;  %v3582_v4 = vshrl.u32 %v3381_v36, 16  ;;  %v976_v60 = vld [vmem:[#allocation2 + $0x108] sm:$0x10] }
 0x268   : > { %v3585_v42 = vshll.u32 %v3381_v36, 16  ;;  %v2103_v12 = vrot.slane %v2101_v26, 4  ;;  %v2106_v56 = vrot.slane %v2104_v34, 5  ;;  %v2120_v28 = vrot.slane %v2118_v41, 4  ;;  %v8033_v41 = vld [vmem:[#allocation2 + $0xf0] sm:$0xf0] }
 0x269   : > { %v2123_v38 = vrot.slane %v2121_v63, 5  ;;  %v2094_v27 = vrot.slane %v2092_v5, 4  ;;  %v2097_v13 = vrot.slane %v2095_v2, 5  ;;  %v3584_v51 = vrot.slane %v3582_v4, 4  ;;  %v9133_v5 = vld [vmem:[#allocation2 + $0x28] sm:$0xf] }
 0x26a   : > { %v3587_v8 = vrot.slane %v3585_v42, 5  ;;  %v3382_v0 = vld [vmem:[#allocation2 + $0xd8] sm:$0x1f]  ;;  %v3597_v61 = vor.u32 %v3596_v59, %v3593_v37  ;;  %v3610_v15 = vrot.slane %v3608_v23, 4  ;;  %v2107_v25 = vor.u32 %v2106_v56, %v2103_v12 }
 0x26b   : > { %v3599_v52 = vshrl.u32 %v3382_v0, 16  ;;  %v3602_v31 = vshll.u32 %v3382_v0, 16  ;;  %v1875_v6 = vld [vmem:[#allocation2 + $0xd8] sm:$0x1f]  ;;  %v2098_v29 = vor.u32 %v2097_v13, %v2094_v27  ;;  %v2124_v19 = vor.u32 %v2123_v38, %v2120_v28 }
 0x26c   : > { %v3588_v40 = vor.u32 %v3587_v8, %v3584_v51  ;;  %v2109_v58 = vshrl.u32 %v1875_v6, 16  ;;  %v2112_v30 = vshll.u32 %v1875_v6, 16  ;;  %v3611_v32 = vshll.u32 %v8934_v62, 16 }
 0x26d   : > { %v3601_v16 = vrot.slane %v3599_v52, 4  ;;  %v3604_v3 = vrot.slane %v3602_v31, 5  ;;  %v1876_v1 = vld [vmem:[#allocation2 + $0xe8] sm:$0x1f]  ;;  %v2099_v20 = vsel %vm1878_vm7, %v2090_v9, %v2098_v29  ;;  %v974_v48 = vsel %vm8633_vm6, 0, %v973_v35 }
 0x26e   : > { %v3383_v46 = vld [vmem:[#allocation2 + $0xe8] sm:$0x1f]  ;;  %v3589_v39 = vsel %vm1878_vm7, %v3580_v45, %v3588_v40  ;;  %v2111_v7 = vrot.slane %v2109_v58, 4  ;;  %v2114_v24 = vrot.slane %v2112_v30, 5  ;;  %7102 = vmatprep.mubr.bf16.mxu0 %v2099_v20  ;;  %v2126_v53 = vshrl.u32 %v1876_v1, 16 }
 0x26f   : > { %7243 = vmatmul.mubr.bf16.gmra.mrb[20].mxu1 %v3589_v39  ;;  %v3605_v14 = vor.u32 %v3604_v3, %v3601_v16  ;;  %v2129_v33 = vshll.u32 %v1876_v1, 16  ;;  %v3616_v43 = vshrl.u32 %v3383_v46, 16  ;;  %v3619_v21 = vshll.u32 %v3383_v46, 16  ;;  %975 = vst [vmem:[#allocation2 + $0xf8] sm:$0x10] %v974_v48 }
 0x270   : > { %v2115_v55 = vor.u32 %v2114_v24, %v2111_v7  ;;  %v2128_v22 = vrot.slane %v2126_v53, 4  ;;  %v3613_v57 = vrot.slane %v3611_v32, 5  ;;  %v3625_v62 = vshrl.u32 %v8938_v49, 16  ;;  %v3932_v9 = vld [vmem:[#allocation2 + $0x20] sm:$0xf8] }
 0x271   : > { %v3606_v11 = vsel %vm1878_vm7, %v3597_v61, %v3605_v14  ;;  %v2131_v47 = vrot.slane %v2129_v33, 5  ;;  %v3618_v34 = vrot.slane %v3616_v43, 4  ;;  %v3621_v44 = vrot.slane %v3619_v21, 5  ;;  %v3934_v40 = vld [vmem:[#allocation2 + $0x30] sm:$0xf8] }
 0x272   : > { %7246 = vmatprep.mubr.bf16.mxu1 %v3606_v11  ;;  %v2116_v26 = vsel %vm1878_vm7, %v2107_v25, %v2115_v55  ;;  %v3614_v59 = vor.u32 %v3613_v57, %v3610_v15  ;;  %v3628_v18 = vshll.u32 %v8938_v49, 16  ;;  %v2135_v54 = vshrl.u32 %v8033_v41, 16  ;;  %v3936_v48 = vld [vmem:[#allocation2 + $0x40] sm:$0xf8]  ;;  %v9144_v11 = vld [vmem:[#allocation2 + $0x48] sm:$0xf] }
 0x273   : > { %7103 = vmatmul.mubr.bf16.gmra.mrb[56].mxu0 %v2116_v26  ;;  %v2132_v37 = vor.u32 %v2131_v47, %v2128_v22  ;;  %v3622_v36 = vor.u32 %v3621_v44, %v3618_v34  ;;  %v3627_v45 = vrot.slane %v3625_v62, 4  ;;  %v2138_v63 = vshll.u32 %v8033_v41, 16 }
 0x274   : > { %v977_v23 = vsel %vm8633_vm6, 0, %v976_v60  ;;  %v3630_v4 = vrot.slane %v3628_v18, 5  ;;  %v2137_v42 = vrot.slane %v2135_v54, 4  ;;  %v3642_v12 = vshrl.u32 %v8959_v50, 16 }
 0x275   : > { %v2133_v2 = vsel %vm1878_vm7, %v2124_v19, %v2132_v37  ;;  %978 = vst [vmem:[#allocation2 + $0x108] sm:$0x10] %v977_v23  ;;  %v3623_v49 = vsel %vm1878_vm7, %v3614_v59, %v3622_v36  ;;  %v2140_v56 = vrot.slane %v2138_v63, 5  ;;  %v3645_v28 = vshll.u32 %v8959_v50, 16  ;;  %v9141_v19 = vld [vmem:[#allocation2 + $0x38] sm:$0xf] }
 0x276   : > { %7106 = vmatprep.mubr.bf16.mxu0 %v2133_v2  ;;  %v3965_v38 = vshrl.u32 %v3932_v9, 16  ;;  %v3968_v27 = vshll.u32 %v3932_v9, 16  ;;  %v3973_v17 = vshrl.u32 %v9133_v5, 16  ;;  %v3384_v13 = vld [vmem:[#allocation2 + $0xf8] sm:$0x1f]  ;;  %v3631_v51 = vor.u32 %v3630_v4, %v3627_v45 }
 0x277   : > { %7247 = vmatmul.mubr.bf16.gmra.mrb[24].mxu1 %v3623_v49  ;;  %v1877_v8 = vld [vmem:[#allocation2 + $0xf8] sm:$0x1f]  ;;  %v2141_v0 = vor.u32 %v2140_v56, %v2137_v42  ;;  %v3644_v61 = vrot.slane %v3642_v12, 4  ;;  %v3647_v52 = vrot.slane %v3645_v28, 5  ;;  %v3633_v31 = vshrl.u32 %v3384_v13, 16 }
 0x278   : > { %v3636_v6 = vshll.u32 %v3384_v13, 16  ;;  %v2143_v15 = vshrl.u32 %v1877_v8, 16  ;;  %v2146_v29 = vshll.u32 %v1877_v8, 16  ;;  %v3967_v58 = vrot.slane %v3965_v38, 3  ;;  %v3938_v63 = vld [vmem:[#allocation2 + $0x50] sm:$0xf8] }
 0x279   : > { %v3970_v30 = vrot.slane %v3968_v27, 4  ;;  %v3975_v35 = vrot.slane %v3973_v17, 3  ;;  %v3976_v50 = vshll.u32 %v9133_v5, 16  ;;  %v3635_v16 = vrot.slane %v3633_v31, 4  ;;  %v3940_v23 = vld [vmem:[#allocation2 + $0x60] sm:$0xf8] }
 0x27a   : > { %v3638_v3 = vrot.slane %v3636_v6, 5  ;;  %v2145_v25 = vrot.slane %v2143_v15, 4  ;;  %v2148_v1 = vrot.slane %v2146_v29, 5  ;;  %v3648_v20 = vor.u32 %v3647_v52, %v3644_v61  ;;  %v9153_v49 = vld [vmem:[#allocation2 + $0x58] sm:$0xf]  ;;  %v7987_v29 = vld [vmem:[#allocation8 + $0x1c8] sm:$0xff]  }
 0x27b   : > { %v3978_v39 = vrot.slane %v3976_v50, 4  ;;  %v3982_v7 = vshrl.u32 %v3934_v40, 16  ;;  %v3971_v32 = vor.u32 %v3970_v30, %v3967_v58  ;;  %v3985_v43 = vshll.u32 %v3934_v40, 16  ;;  %v9155_v56 = vld [vmem:[#allocation2 + $0x68] sm:$0xf] }
 0x27c   : > { %v3385_v46 = vld [vmem:[#allocation2 + $0x108] sm:$0x1f]  ;;  %v3639_v24 = vor.u32 %v3638_v3, %v3635_v16  ;;  %v2149_v14 = vor.u32 %v2148_v1, %v2145_v25  ;;  %v3990_v21 = vshrl.u32 %v9141_v19, 16  ;;  %v3993_v34 = vshll.u32 %v9141_v19, 16  ;;  %v3942_v30 = vld [vmem:[#allocation2 + $0x70] sm:$0xf8] }
 0x27d   : > { %v3650_v53 = vshrl.u32 %v3385_v46, 16  ;;  %v3653_v33 = vshll.u32 %v3385_v46, 16  ;;  %v3979_v55 = vor.u32 %v3978_v39, %v3975_v35  ;;  %v3984_v26 = vrot.slane %v3982_v7, 3  ;;  %v9162_v25 = vld [vmem:[#allocation2 + $0x78] sm:$0xf] }
 0x27e   : > { %v3640_v22 = vsel %vm1878_vm7, %v3631_v51, %v3639_v24  ;;  %v2150_v47 = vsel %vm1878_vm7, %v2141_v0, %v2149_v14  ;;  %v3999_v62 = vshrl.u32 %v3936_v48, 16  ;;  %v4002_v37 = vshll.u32 %v3936_v48, 16  ;;  %v3944_v39 = vld [vmem:[#allocation2 + $0x80] sm:$0xf8]  ;;  %v9166_v14 = vld [vmem:[#allocation2 + $0x88] sm:$0xf] }
 0x27f   : > { %v3652_v57 = vrot.slane %v3650_v53, 4  ;;  %v3655_v60 = vrot.slane %v3653_v33, 5  ;;  %7250 = vmatprep.mubr.bf16.mxu1 %v3640_v22  ;;  %7107 = vmatmul.mubr.bf16.gmra.mrb[60].mxu0 %v2150_v47  ;;  %v4007_v59 = vshrl.u32 %v9144_v11, 16  ;;  %v3987_v18 = vrot.slane %v3985_v43, 4  ;;  %v7988_v53 = vld [vmem:[#allocation8 + $0x1d0] sm:$0xff]  }
 0x280   : > { %v3992_v41 = vrot.slane %v3990_v21, 3  ;;  %v3995_v54 = vrot.slane %v3993_v34, 4  ;;  %v4010_v9 = vshll.u32 %v9144_v11, 16  ;;  %v3980_v45 = vsel %vm929_vm4, %v3971_v32, %v3979_v55 }
 0x281   : > { %v3656_v44 = vor.u32 %v3655_v60, %v3652_v57  ;;  %v4001_v2 = vrot.slane %v3999_v62, 3  ;;  %v4004_v4 = vrot.slane %v4002_v37, 4  ;;  %v4009_v42 = vrot.slane %v4007_v59, 3  ;;  %v7989_v62 = vld [vmem:[#allocation8 + $0x1d8] sm:$0xff]   ;;  %v3946_v37 = vld [vmem:[#allocation2 + $0x90] sm:$0xf8] }
 0x282   : > { %v4012_v12 = vrot.slane %v4010_v9, 4  ;;  %v3988_v28 = vor.u32 %v3987_v18, %v3984_v26  ;;  %v3996_v38 = vor.u32 %v3995_v54, %v3992_v41  ;;  %v4016_v27 = vshrl.u32 %v3938_v63, 16  ;;  %v9173_v41 = vld [vmem:[#allocation2 + $0x98] sm:$0xf]  ;;  %v3948_v54 = vld [vmem:[#allocation2 + $0xa0] sm:$0xf8] }
 0x283   : > { %v3657_v36 = vsel %vm1878_vm7, %v3648_v20, %v3656_v44  ;;  %v4019_v17 = vshll.u32 %v3938_v63, 16  ;;  %v4024_v13 = vshrl.u32 %v9153_v49, 16  ;;  %v4027_v51 = vshll.u32 %v9153_v49, 16 }
 0x284   : > { %7251 = vmatmul.mubr.bf16.gmra.mrb[28].mxu1 %v3657_v36  ;;  %v4033_v8 = vshrl.u32 %v3940_v23, 16  ;;  %v4036_v0 = vshll.u32 %v3940_v23, 16  ;;  %v4005_v61 = vor.u32 %v4004_v4, %v4001_v2  ;;  %v4013_v52 = vor.u32 %v4012_v12, %v4009_v42  ;;  %v9176_v23 = vld [vmem:[#allocation2 + $0xa8] sm:$0xf] }
 0x285   : > { %7270 = vmatprep.mubr.bf16.mxu1 %v3980_v45  ;;  %v4041_v31 = vshrl.u32 %v9155_v56, 16  ;;  %v4044_v6 = vshll.u32 %v9155_v56, 16  ;;  %v3997_v15 = vsel %vm929_vm4, %v3988_v28, %v3996_v38  ;;  %v4018_v40 = vrot.slane %v4016_v27, 3  ;;  %v7990_v27 = vld [vmem:[#allocation8 + $0x1e0] sm:$0xff]  }
 0x286   : > { %v4021_v58 = vrot.slane %v4019_v17, 4  ;;  %v4026_v35 = vrot.slane %v4024_v13, 3  ;;  %v4029_v50 = vrot.slane %v4027_v51, 4  ;;  %v4035_v16 = vrot.slane %v4033_v8, 3 }
 0x287   : > { %v4038_v3 = vrot.slane %v4036_v0, 4  ;;  %v4014_v1 = vsel %vm929_vm4, %v4005_v61, %v4013_v52  ;;  %v4043_v46 = vrot.slane %v4041_v31, 3  ;;  %v4046_v20 = vrot.slane %v4044_v6, 4  ;;  %v3950_v31 = vld [vmem:[#allocation2 + $0xb0] sm:$0xf8] }
 0x288   : > { %v4050_v7 = vshrl.u32 %v3942_v30, 16  ;;  %v4053_v24 = vshll.u32 %v3942_v30, 16  ;;  %v4058_v33 = vshrl.u32 %v9162_v25, 16  ;;  %v4061_v32 = vshll.u32 %v9162_v25, 16  ;;  %v7991_v30 = vld [vmem:[#allocation8 + $0x1e8] sm:$0xff]  }
 0x289   : > { %v4022_v55 = vor.u32 %v4021_v58, %v4018_v40  ;;  %v4030_v43 = vor.u32 %v4029_v50, %v4026_v35  ;;  %v4039_v21 = vor.u32 %v4038_v3, %v4035_v16  ;;  %v4067_v48 = vshrl.u32 %v3944_v39, 16  ;;  %v9183_v58 = vld [vmem:[#allocation2 + $0xb8] sm:$0xf] }
 0x28a   : > { %v4047_v22 = vor.u32 %v4046_v20, %v4043_v46  ;;  %v4070_v47 = vshll.u32 %v3944_v39, 16  ;;  %v4075_v57 = vshrl.u32 %v9166_v14, 16  ;;  %v4052_v60 = vrot.slane %v4050_v7, 3  ;;  %v3952_v46 = vld [vmem:[#allocation2 + $0xc0] sm:$0xf8] }
 0x28b   : > { %v4055_v26 = vrot.slane %v4053_v24, 4  ;;  %v4060_v34 = vrot.slane %v4058_v33, 3  ;;  %v4063_v44 = vrot.slane %v4061_v32, 4  ;;  %v4031_v59 = vsel %vm929_vm4, %v4022_v55, %v4030_v43  ;;  %v7992_v33 = vld [vmem:[#allocation8 + $0x1f0] sm:$0xff]  }
 0x28c   : > { %7271 = vmatmul.mubr.bf16.vlgmr.msra.gmra.mrb[0].mxu1 %v3997_v15  ;;  %v4069_v18 = vrot.slane %v4067_v48, 3  ;;  %v4048_v9 = vsel %vm929_vm4, %v4039_v21, %v4047_v22  ;;  %v4072_v36 = vrot.slane %v4070_v47, 4  ;;  %v4077_v45 = vrot.slane %v4075_v57, 3 }
 0x28d   : > { %7303 = vmatpush3.bf16.msra.mxu1 %v9099_v10  ;;  %7274 = vmatprep.mubr.bf16.mxu1 %v4014_v1  ;;  %v4078_v10 = vshll.u32 %v9166_v14, 16  ;;  %v4056_v2 = vor.u32 %v4055_v26, %v4052_v60  ;;  %v4084_v4 = vshrl.u32 %v3946_v37, 16  ;;  %v4064_v42 = vor.u32 %v4063_v44, %v4060_v34  ;;  %v7993_v44 = vld [vmem:[#allocation8 + $0x1f8] sm:$0xff]  }
 0x28e   : > { %7304 = vmatprep.subr.bf16.mxu1 %v7987_v29  ;;  %v4087_v12 = vshll.u32 %v3946_v37, 16  ;;  %v4092_v28 = vshrl.u32 %v9173_v41, 16  ;;  %v4095_v38 = vshll.u32 %v9173_v41, 16  ;;  %v4101_v17 = vshrl.u32 %v3948_v54, 16 }
 0x28f   : > { %v4080_v63 = vrot.slane %v4078_v10, 4  ;;  %v4104_v13 = vshll.u32 %v3948_v54, 16  ;;  %v4109_v51 = vshrl.u32 %v9176_v23, 16  ;;  %v4112_v8 = vshll.u32 %v9176_v23, 16  ;;  %v3956_v54 = vld [vmem:[#allocation2 + $0xe0] sm:$0xf8] }
 0x290   : > { %v4073_v0 = vor.u32 %v4072_v36, %v4069_v18  ;;  %v4086_v52 = vrot.slane %v4084_v4, 3  ;;  %v4065_v6 = vsel %vm929_vm4, %v4056_v2, %v4064_v42  ;;  %v4089_v15 = vrot.slane %v4087_v12, 4  ;;  %v9194_v18 = vld [vmem:[#allocation2 + $0xd8] sm:$0xf]  ;;  %v9196_v2 = vld [vmem:[#allocation2 + $0xe8] sm:$0xf] }
 0x291   : > { %7305 = vmatpush3.bf16.msra.mxu1 %v7987_v29  ;;  %v4081_v61 = vor.u32 %v4080_v63, %v4077_v45  ;;  %v4094_v29 = vrot.slane %v4092_v28, 3  ;;  %v4097_v40 = vrot.slane %v4095_v38, 4  ;;  %v4103_v35 = vrot.slane %v4101_v17, 3  ;;  %v9200_v17 = vld [vmem:[#allocation8 + $0x200] sm:$0xff]  }
 0x292   : > { %7306 = vmatprep.subr.bf16.mxu1 %v7988_v53  ;;  %v4106_v50 = vrot.slane %v4104_v13, 4  ;;  %v4111_v16 = vrot.slane %v4109_v51, 3  ;;  %v4114_v3 = vrot.slane %v4112_v8, 4  ;;  %v4118_v20 = vshrl.u32 %v3950_v31, 16 }
 0x293   : > { %v4082_v1 = vsel %vm929_vm4, %v4073_v0, %v4081_v61  ;;  %v4121_v39 = vshll.u32 %v3950_v31, 16  ;;  %v4126_v7 = vshrl.u32 %v9183_v58, 16  ;;  %v4129_v24 = vshll.u32 %v9183_v58, 16 }
 0x294   : > { %7275 = vmatmul.mubr.bf16.gmra.mrb[4].mxu1 %v4031_v59  ;;  %v4090_v32 = vor.u32 %v4089_v15, %v4086_v52  ;;  %v4098_v55 = vor.u32 %v4097_v40, %v4094_v29  ;;  %v4107_v43 = vor.u32 %v4106_v50, %v4103_v35  ;;  %v4115_v21 = vor.u32 %v4114_v3, %v4111_v16  ;;  %v3954_v59 = vld [vmem:[#allocation2 + $0xd0] sm:$0xf8] }
 0x295   : > { %7278 = vmatprep.mubr.bf16.mxu1 %v4048_v9  ;;  %7307 = vmatpush3.bf16.msra.mxu1 %v7988_v53  ;;  %v9188_v53 = vld [vmem:[#allocation2 + $0xc8] sm:$0xf]  ;;  %v4135_v48 = vshrl.u32 %v3952_v46, 16  ;;  %v4138_v22 = vshll.u32 %v3952_v46, 16  ;;  %v4120_v10 = vrot.slane %v4118_v20, 3  ;;  %v4123_v60 = vrot.slane %v4121_v39, 4 }
 0x296   : > { %7308 = vmatprep.subr.bf16.mxu1 %v7989_v62  ;;  %v4143_v47 = vshrl.u32 %v9188_v53, 16  ;;  %v4146_v57 = vshll.u32 %v9188_v53, 16  ;;  %v4128_v26 = vrot.slane %v4126_v7, 3  ;;  %v4131_v34 = vrot.slane %v4129_v24, 4  ;;  %v3958_v3 = vld [vmem:[#allocation2 + $0xf0] sm:$0xf8] }
 0x297   : > { %v4116_v37 = vsel %vm929_vm4, %v4107_v43, %v4115_v21  ;;  %v4137_v9 = vrot.slane %v4135_v48, 3  ;;  %v4140_v36 = vrot.slane %v4138_v22, 4  ;;  %v4124_v4 = vor.u32 %v4123_v60, %v4120_v10  ;;  %v9207_v46 = vld [vmem:[#allocation2 + $0xf8] sm:$0xf]  ;;  %v3960_v20 = vld [vmem:[#allocation2 + $0x100] sm:$0xf8] }
 0x298   : > { %v4145_v45 = vrot.slane %v4143_v47, 3  ;;  %v4148_v63 = vrot.slane %v4146_v57, 4  ;;  %v4132_v42 = vor.u32 %v4131_v34, %v4128_v26  ;;  %v4152_v12 = vshrl.u32 %v3954_v59, 16  ;;  %v9209_v39 = vld [vmem:[#allocation2 + $0x108] sm:$0xf] }
 0x299   : > { %7309 = vmatpush3.bf16.msra.mxu1 %v7989_v62  ;;  %v4099_v62 = vsel %vm929_vm4, %v4090_v32, %v4098_v55  ;;  %v4155_v28 = vshll.u32 %v3954_v59, 16  ;;  %v4160_v38 = vshrl.u32 %v9194_v18, 16  ;;  %v4169_v13 = vshrl.u32 %v3956_v54, 16  ;;  %v3962_v34 = vld [vmem:[#allocation2 + $0x110] sm:$0xf8] }
 0x29a   : > { %7310 = vmatprep.subr.bf16.mxu1 %v7990_v27  ;;  %v4172_v51 = vshll.u32 %v3956_v54, 16  ;;  %v4177_v8 = vshrl.u32 %v9196_v2, 16  ;;  %v4180_v0 = vshll.u32 %v9196_v2, 16  ;;  %v4141_v61 = vor.u32 %v4140_v36, %v4137_v9 }
 0x29b   : > { %v4149_v52 = vor.u32 %v4148_v63, %v4145_v45  ;;  %v4133_v31 = vsel %vm929_vm4, %v4124_v4, %v4132_v42  ;;  %v4157_v15 = vrot.slane %v4155_v28, 4  ;;  %v4162_v29 = vrot.slane %v4160_v38, 3 }
 0x29c   : > { %7279 = vmatmul.mubr.bf16.gmra.mrb[8].mxu1 %v4065_v6  ;;  %v4154_v6 = vrot.slane %v4152_v12, 3  ;;  %v4174_v35 = vrot.slane %v4172_v51, 4  ;;  %v4179_v50 = vrot.slane %v4177_v8, 3  ;;  %v4182_v16 = vrot.slane %v4180_v0, 4 }
 0x29d   : > { %7282 = vmatprep.mubr.bf16.mxu1 %v4082_v1  ;;  %7311 = vmatpush3.bf16.msra.mxu1 %v7990_v27  ;;  %v4163_v27 = vshll.u32 %v9194_v18, 16  ;;  %v4150_v1 = vsel %vm929_vm4, %v4141_v61, %v4149_v52  ;;  %v4189_v32 = vshll.u32 %v3958_v3, 16  ;;  %v4194_v21 = vshrl.u32 %v9207_v46, 16 }
 0x29e   : > { %7312 = vmatprep.subr.bf16.mxu1 %v7991_v30  ;;  %v4158_v7 = vor.u32 %v4157_v15, %v4154_v6  ;;  %v4183_v43 = vor.u32 %v4182_v16, %v4179_v50  ;;  %v4197_v48 = vshll.u32 %v9207_v46, 16  ;;  %v4203_v22 = vshrl.u32 %v3960_v20, 16 }
 0x29f   : > { %v4165_v40 = vrot.slane %v4163_v27, 4  ;;  %v4206_v47 = vshll.u32 %v3960_v20, 16  ;;  %v4211_v57 = vshrl.u32 %v9209_v39, 16  ;;  %v4214_v10 = vshll.u32 %v9209_v39, 16 }
 0x2a0   : > { %v4196_v59 = vrot.slane %v4194_v21, 3  ;;  %v4199_v54 = vrot.slane %v4197_v48, 4  ;;  %v4205_v9 = vrot.slane %v4203_v22, 3  ;;  %v4220_v4 = vshrl.u32 %v3962_v34, 16  ;;  %v9242_v21 = vld [vmem:[#allocation2 + $0x60] sm:$0xf0] }
 0x2a1   : > { %7313 = vmatpush3.bf16.msra.mxu1 %v7991_v30  ;;  %v4171_v30 = vrot.slane %v4169_v13, 3  ;;  %v4166_v24 = vor.u32 %v4165_v40, %v4162_v29  ;;  %v4208_v36 = vrot.slane %v4206_v47, 4  ;;  %v4213_v45 = vrot.slane %v4211_v57, 3  ;;  %v9223_v40 = vld [vmem:[#allocation2 + $0x20] sm:$0xf0]  ;;  %v7996_v48 = vld [vmem:[#allocation8 + $0x210] sm:$0xff]  }
 0x2a2   : > { %7314 = vmatprep.subr.bf16.mxu1 %v7992_v33  ;;  %v4216_v63 = vrot.slane %v4214_v10, 4  ;;  %v4223_v42 = vshll.u32 %v3962_v34, 16  ;;  %v4200_v27 = vor.u32 %v4199_v54, %v4196_v59  ;;  %v4222_v8 = vrot.slane %v4220_v4, 3  ;;  %v7997_v57 = vld [vmem:[#allocation8 + $0x218] sm:$0xff]   ;;  %v8002_v34 = vld [vmem:[#allocation9] sm:$0xff]  }
 0x2a3   : > { %v4175_v55 = vor.u32 %v4174_v35, %v4171_v30  ;;  %v4167_v60 = vsel %vm929_vm4, %v4158_v7, %v4166_v24  ;;  %v4209_v13 = vor.u32 %v4208_v36, %v4205_v9  ;;  %v4557_v30 = vrot.slane %v9223_v40, 4  ;;  %7398 = vmatprep.subr.bf16.mxu0 %v8002_v34  ;;  %v7999_v9 = vld [vmem:[#allocation8 + $0x228] sm:$0xff]   ;;  %v9260_v4 = vld [vmem:[#allocation2 + $0x90] sm:$0xf0] }
 0x2a4   : > { %7283 = vmatmul.mubr.bf16.gmra.mrb[12].mxu1 %v4099_v62  ;;  %v4217_v51 = vor.u32 %v4216_v63, %v4213_v45  ;;  %v4225_v0 = vrot.slane %v4223_v42, 4  ;;  %v4558_v35 = vrot.slane %v9133_v5, 4  ;;  %v4561_v7 = vrot.slane %v9141_v19, 4  ;;  %7399 = vmatpush3.bf16.msra.mxu0 %v8002_v34  ;;  %v8004_v45 = vld [vmem:[#allocation9 + $0x10] sm:$0xff]  }
 0x2a5   : > { %7286 = vmatprep.mubr.bf16.mxu1 %v4116_v37  ;;  %7315 = vmatpush3.bf16.msra.mxu1 %v7992_v33  ;;  %v4186_v33 = vshrl.u32 %v3958_v3, 16  ;;  %v4184_v62 = vsel %vm929_vm4, %v4175_v55, %v4183_v43  ;;  %v4191_v37 = vrot.slane %v4189_v32, 4  ;;  %v9229_v3 = vld [vmem:[#allocation2 + $0x30] sm:$0xf0]  ;;  %v7995_v32 = vld [vmem:[#allocation8 + $0x208] sm:$0xff]   ;;  %v4567_v22 = vrot.slane %v9153_v49, 4 }
 0x2a6   : > { %7316 = vmatprep.subr.bf16.mxu1 %v7993_v44  ;;  %v4218_v6 = vsel %vm929_vm4, %v4209_v13, %v4217_v51  ;;  %v4226_v15 = vor.u32 %v4225_v0, %v4222_v8  ;;  %v4559_v16 = vsel %vm1363_vm3, %v4557_v30, %v4558_v35  ;;  %v4560_v20 = vrot.slane %v9229_v3, 4  ;;  %v9239_v43 = vld [vmem:[#allocation2 + $0x50] sm:$0xf0]  ;;  %v7998_v49 = vld [vmem:[#allocation8 + $0x220] sm:$0xff]   ;;  %v8001_v13 = vld [vmem:[#allocation8 + $0x238] sm:$0xff]  }
 0x2a7   : > { %v4188_v26 = vrot.slane %v4186_v33, 3  ;;  %v4564_v33 = vrot.slane %v9144_v11, 4  ;;  %v4566_v19 = vrot.slane %v9239_v43, 4  ;;  %v4569_v11 = vrot.slane %v9242_v21, 4  ;;  %v8006_v8 = vld [vmem:[#allocation9 + $0x20] sm:$0xff]   ;;  %v8008_v30 = vld [vmem:[#allocation9 + $0x30] sm:$0xff]  }
 0x2a8   : > { %v4562_v5 = vsel %vm1363_vm3, %v4560_v20, %v4561_v7  ;;  %v4570_v47 = vrot.slane %v9155_v56, 4  ;;  %v4576_v54 = vrot.slane %v9166_v14, 4  ;;  %v8000_v14 = vld [vmem:[#allocation8 + $0x230] sm:$0xff]   ;;  %v4578_v42 = vrot.slane %v9260_v4, 4 }
 0x2a9   : > { %7317 = vmatpush3.bf16.msra.mxu1 %v7993_v44  ;;  %v9216_v44 = vld [vmem:[#allocation2 + $0x118] sm:$0xf]  ;;  %v4192_v38 = vor.u32 %v4191_v37, %v4188_v26  ;;  %v4568_v10 = vsel %vm1363_vm3, %v4566_v19, %v4567_v22  ;;  %v9252_v26 = vld [vmem:[#allocation2 + $0x80] sm:$0xf0]  ;;  %v4573_v37 = vrot.slane %v9162_v25, 4  ;;  %v4591_v20 = vrot.slane %v9194_v18, 4 }
 0x2aa   : > { %7350 = vmatprep.subr.bf16.mxu1 %v9200_v17  ;;  %v4228_v12 = vshrl.u32 %v9216_v44, 16  ;;  %v4231_v28 = vshll.u32 %v9216_v44, 16  ;;  %v4575_v59 = vrot.slane %v9252_v26, 4  ;;  %v9262_v25 = vld [vmem:[#allocation2 + $0xa0] sm:$0xf0]  ;;  %v4594_v7 = vrot.slane %v9196_v2, 4 }
 0x2ab   : > { %v4597_v18 = vrot.slane %v9207_v46, 4  ;;  %v9296_v19 = vld [vmem:[#allocation2 + $0x110] sm:$0xf0]  ;;  %v4895_v2 = vshrl.u32 %v9223_v40, 16  ;;  %v4898_v22 = vshll.u32 %v9223_v40, 16 }
 0x2ac   : > { %7287 = vmatmul.mubr.bf16.gmra.mrb[16].mxu1 %v4133_v31  ;;  %v4230_v61 = vrot.slane %v4228_v12, 3  ;;  %v4233_v52 = vrot.slane %v4231_v28, 4  ;;  %v4201_v31 = vsel %vm929_vm4, %v4192_v38, %v4200_v27  ;;  %v4577_v63 = vsel %vm1363_vm3, %v4575_v59, %v4576_v54  ;;  %v8005_v28 = vld [vmem:[#allocation9 + $0x18] sm:$0xff]  }
 0x2ad   : > { %7290 = vmatprep.mubr.bf16.mxu1 %v4150_v1  ;;  %v9231_v1 = vld [vmem:[#allocation2 + $0x40] sm:$0xf0]  ;;  %v4579_v12 = vrot.slane %v9173_v41, 4  ;;  %v4581_v38 = vrot.slane %v9262_v25, 4  ;;  %v4582_v27 = vrot.slane %v9176_v23, 4  ;;  %v4897_v46 = vrot.slane %v4895_v2, 4 }
 0x2ae   : > { %v4234_v29 = vor.u32 %v4233_v52, %v4230_v61  ;;  %v4563_v24 = vrot.slane %v9231_v1, 4  ;;  %v9270_v61 = vld [vmem:[#allocation2 + $0xb0] sm:$0xf0]  ;;  %v9272_v41 = vld [vmem:[#allocation2 + $0xc0] sm:$0xf0]  ;;  %v4585_v52 = vrot.slane %v9183_v58, 4 }
 0x2af   : > { %v4580_v51 = vsel %vm1363_vm3, %v4578_v42, %v4579_v12  ;;  %v4583_v0 = vsel %vm1363_vm3, %v4581_v38, %v4582_v27  ;;  %v4584_v23 = vrot.slane %v9270_v61, 4  ;;  %v4912_v54 = vshrl.u32 %v9229_v3, 16 }
 0x2b0   : > { %v4235_v50 = vsel %vm929_vm4, %v4226_v15, %v4234_v29  ;;  %v4565_v55 = vsel %vm1363_vm3, %v4563_v24, %v4564_v33  ;;  %v4588_v15 = vrot.slane %v9188_v53, 4  ;;  %v4932_v12 = vshll.u32 %v9231_v1, 16 }
 0x2b1   : > { %v4586_v29 = vsel %vm1363_vm3, %v4584_v23, %v4585_v52  ;;  %v4914_v27 = vrot.slane %v4912_v54, 4  ;;  %v4881_v23 = vld [vmem:[#allocation2 + $0x58] sm:$0x1f] }
 0x2b2   : > { %v4934_v52 = vrot.slane %v4932_v12, 5  ;;  %v5000_v12 = vshll.u32 %v9252_v26, 16 }
 0x2b4   : > { %7291 = vmatmul.mubr.bf16.gmra.mrb[20].mxu1 %v4167_v60  ;;  %v9250_v60 = vld [vmem:[#allocation2 + $0x70] sm:$0xf0] }
 0x2b5   : > { %7294 = vmatprep.mubr.bf16.mxu1 %v4184_v62  ;;  %v8003_v62 = vld [vmem:[#allocation9 + $0x8] sm:$0xff]   ;;  %v4572_v56 = vrot.slane %v9250_v60, 4 }
 0x2b6   : > { %7400 = vmatprep.subr.bf16.mxu0 %v8003_v62 }
 0x2b7   : > { %v4574_v36 = vsel %vm1363_vm3, %v4572_v56, %v4573_v37  ;;  %7401 = vmatpush3.bf16.msra.mxu0 %v8003_v62  ;;  %v4603_v62 = vrot.slane %v9216_v44, 4  ;;  %v4900_v56 = vrot.slane %v4898_v22, 5  ;;  %v4929_v44 = vshrl.u32 %v9231_v1, 16 }
 0x2b8   : > { %7402 = vmatprep.subr.bf16.mxu0 %v8004_v45 }
 0x2bb   : > { %7403 = vmatpush3.bf16.msra.mxu0 %v8004_v45  ;;  %v4880_v45 = vld [vmem:[#allocation2 + $0x48] sm:$0x1f] }
 0x2bc   : > { %7295 = vmatmul.mubr.bf16.gmra.mrb[24].mxu1 %v4201_v31  ;;  %7404 = vmatprep.subr.bf16.mxu0 %v8005_v28  ;;  %v8007_v31 = vld [vmem:[#allocation9 + $0x28] sm:$0xff]   ;;  %v4940_v38 = vshll.u32 %v4880_v45, 16 }
 0x2bd   : > { %7298 = vmatprep.mubr.bf16.mxu1 %v4218_v6  ;;  %v4587_v6 = vrot.slane %v9272_v41, 4 }
 0x2bf   : > { %7405 = vmatpush3.bf16.msra.mxu0 %v8005_v28  ;;  %v4589_v35 = vsel %vm1363_vm3, %v4587_v6, %v4588_v15  ;;  %v4937_v28 = vshrl.u32 %v4880_v45, 16  ;;  %v4942_v6 = vrot.slane %v4940_v38, 5  ;;  %v4882_v15 = vld [vmem:[#allocation2 + $0x68] sm:$0x1f] }
 0x2c0   : > { %7406 = vmatprep.subr.bf16.mxu0 %v8006_v8 }
 0x2c3   : > { %7407 = vmatpush3.bf16.msra.mxu0 %v8006_v8 }
 0x2c4   : > { %7299 = vmatmul.mubr.bf16.gmra.mrb[28].mxu1 %v4235_v50  ;;  %7408 = vmatprep.subr.bf16.mxu0 %v8007_v31  ;;  %v9280_v50 = vld [vmem:[#allocation2 + $0xd0] sm:$0xf0] }
 0x2c5   : > { %7318 = vmatprep.mubr.bf16.mxu1 %v4559_v16  ;;  %v9282_v16 = vld [vmem:[#allocation2 + $0xe0] sm:$0xf0]  ;;  %v4590_v58 = vrot.slane %v9280_v50, 4 }
 0x2c6   : > { %v4593_v53 = vrot.slane %v9282_v16, 4 }
 0x2c7   : > { %7409 = vmatpush3.bf16.msra.mxu0 %v8007_v31  ;;  %v4592_v24 = vsel %vm1363_vm3, %v4590_v58, %v4591_v20  ;;  %v4939_v31 = vrot.slane %v4937_v28, 4  ;;  %v4946_v58 = vshrl.u32 %v9239_v43, 16  ;;  %v4949_v20 = vshll.u32 %v9239_v43, 16 }
 0x2c8   : > { %7410 = vmatprep.subr.bf16.mxu0 %v8008_v30  ;;  %v4595_v33 = vsel %vm1363_vm3, %v4593_v53, %v4594_v7  ;;  %v4954_v53 = vshrl.u32 %v4881_v23, 16  ;;  %v4957_v7 = vshll.u32 %v4881_v23, 16 }
 0x2ca   : > { %v4959_v43 = vrot.slane %v4957_v7, 5 }
 0x2cb   : > { %7411 = vmatpush3.bf16.msra.mxu0 %v8008_v30 }
 0x2cc   : > { %7319 = vmatmul.mubr.bf16.vlgmr.msra.gmra.mrb[0].mxu1 %v4562_v5  ;;  %v9292_v5 = vld [vmem:[#allocation2 + $0x100] sm:$0xf0] }
 0x2cd   : > { %7351 = vmatpush3.bf16.msra.mxu1 %v9200_v17  ;;  %7322 = vmatprep.mubr.bf16.mxu1 %v4565_v55  ;;  %v4571_v17 = vsel %vm1363_vm3, %v4569_v11, %v4570_v47  ;;  %v4878_v55 = vld [vmem:[#allocation2 + $0x28] sm:$0x1f]  ;;  %v4599_v11 = vrot.slane %v9292_v5, 4  ;;  %v4600_v47 = vrot.slane %v9209_v39, 4  ;;  %v4915_v39 = vshll.u32 %v9229_v3, 16 }
 0x2ce   : > { %7352 = vmatprep.subr.bf16.mxu1 %v7995_v32 }
 0x2cf   : > { %v4601_v37 = vsel %vm1363_vm3, %v4599_v11, %v4600_v47  ;;  %v4943_v11 = vor.u32 %v4942_v6, %v4939_v31  ;;  %v5002_v6 = vrot.slane %v5000_v12, 5 }
 0x2d1   : > { %7353 = vmatpush3.bf16.msra.mxu1 %v7995_v32  ;;  %v9290_v32 = vld [vmem:[#allocation2 + $0xf0] sm:$0xf0] }
 0x2d2   : > { %7354 = vmatprep.subr.bf16.mxu1 %v7996_v48 }
 0x2d4   : > { %7323 = vmatmul.mubr.bf16.gmra.mrb[4].mxu1 %v4568_v10  ;;  %v4906_v10 = vshll.u32 %v4878_v55, 16 }
 0x2d5   : > { %7326 = vmatprep.mubr.bf16.mxu1 %v4571_v17  ;;  %7355 = vmatpush3.bf16.msra.mxu1 %v7996_v48  ;;  %v4596_v48 = vrot.slane %v9290_v32, 4  ;;  %v4602_v17 = vrot.slane %v9296_v19, 4 }
 0x2d6   : > { %7356 = vmatprep.subr.bf16.mxu1 %v7997_v57  ;;  %v4908_v40 = vrot.slane %v4906_v10, 5  ;;  %v4951_v10 = vrot.slane %v4949_v20, 5  ;;  %v5014_v20 = vshrl.u32 %v9260_v4, 16 }
 0x2d7   : > { %v4598_v34 = vsel %vm1363_vm3, %v4596_v48, %v4597_v18  ;;  %v4971_v48 = vshrl.u32 %v4882_v15, 16  ;;  %v4974_v18 = vshll.u32 %v4882_v15, 16 }
 0x2d9   : > { %7357 = vmatpush3.bf16.msra.mxu1 %v7997_v57  ;;  %v4903_v57 = vshrl.u32 %v4878_v55, 16  ;;  %v4966_v55 = vshll.u32 %v9242_v21, 16 }
 0x2da   : > { %7358 = vmatprep.subr.bf16.mxu1 %v7998_v49 }
 0x2db   : > { %v4905_v59 = vrot.slane %v4903_v57, 4  ;;  %v4948_v57 = vrot.slane %v4946_v58, 4 }
 0x2dc   : > { %7327 = vmatmul.mubr.bf16.gmra.mrb[8].mxu1 %v4574_v36 }
 0x2dd   : > { %7330 = vmatprep.mubr.bf16.mxu1 %v4577_v63  ;;  %7359 = vmatpush3.bf16.msra.mxu1 %v7998_v49  ;;  %v4879_v49 = vld [vmem:[#allocation2 + $0x38] sm:$0x1f]  ;;  %v4604_v63 = vsel %vm1363_vm3, %v4602_v17, %v4603_v62  ;;  %v4909_v42 = vor.u32 %v4908_v40, %v4905_v59  ;;  %v4956_v17 = vrot.slane %v4954_v53, 4  ;;  %v4968_v62 = vrot.slane %v4966_v55, 5 }
 0x2de   : > { %7360 = vmatprep.subr.bf16.mxu1 %v7999_v9  ;;  %v4923_v36 = vshll.u32 %v4879_v49, 16  ;;  %v4983_v59 = vshll.u32 %v9250_v60, 16  ;;  %v5017_v53 = vshll.u32 %v9260_v4, 16  ;;  %v5016_v4 = vrot.slane %v5014_v20, 4 }
 0x2df   : > { %v4960_v45 = vor.u32 %v4959_v43, %v4956_v17 }
 0x2e0   : > { %v4925_v8 = vrot.slane %v4923_v36, 5  ;;  %v4952_v36 = vor.u32 %v4951_v10, %v4948_v57 }
 0x2e1   : > { %7361 = vmatpush3.bf16.msra.mxu1 %v7999_v9  ;;  %v4920_v9 = vshrl.u32 %v4879_v49, 16  ;;  %v4883_v49 = vld [vmem:[#allocation2 + $0x78] sm:$0x1f] }
 0x2e2   : > { %7362 = vmatprep.subr.bf16.mxu1 %v8000_v14  ;;  %v4988_v40 = vshrl.u32 %v4883_v49, 16  ;;  %v4991_v54 = vshll.u32 %v4883_v49, 16  ;;  %v4961_v23 = vsel %vm1878_vm7, %v4952_v36, %v4960_v45 }
 0x2e4   : > { %7331 = vmatmul.mubr.bf16.gmra.mrb[12].mxu1 %v4580_v51  ;;  %v4922_v51 = vrot.slane %v4920_v9, 4 }
 0x2e5   : > { %7334 = vmatprep.mubr.bf16.mxu1 %v4583_v0  ;;  %7363 = vmatpush3.bf16.msra.mxu1 %v8000_v14  ;;  %v4901_v14 = vor.u32 %v4900_v56, %v4897_v46  ;;  %v4931_v0 = vrot.slane %v4929_v44, 4  ;;  %v4973_v46 = vrot.slane %v4971_v48, 4  ;;  %v4976_v56 = vrot.slane %v4974_v18, 5 }
 0x2e6   : > { %7364 = vmatprep.subr.bf16.mxu1 %v8001_v13  ;;  %v4926_v1 = vor.u32 %v4925_v8, %v4922_v51  ;;  %v4990_v51 = vrot.slane %v4988_v40, 4  ;;  %v4993_v8 = vrot.slane %v4991_v54, 5  ;;  %v5031_v48 = vshrl.u32 %v9262_v25, 16 }
 0x2e7   : > { %v4910_v3 = vsel %vm1878_vm7, %v4901_v14, %v4909_v42  ;;  %v4935_v22 = vor.u32 %v4934_v52, %v4931_v0  ;;  %v4977_v14 = vor.u32 %v4976_v56, %v4973_v46  ;;  %v4997_v42 = vshrl.u32 %v9252_v26, 16  ;;  %v4885_v52 = vld [vmem:[#allocation2 + $0x98] sm:$0x1f] }
 0x2e8   : > { %v4994_v58 = vor.u32 %v4993_v8, %v4990_v51  ;;  %v5022_v7 = vshrl.u32 %v4885_v52, 16  ;;  %v5034_v18 = vshll.u32 %v9262_v25, 16  ;;  %v4887_v56 = vld [vmem:[#allocation2 + $0xb8] sm:$0x1f]  ;;  %v5048_v54 = vshrl.u32 %v9270_v61, 16 }
 0x2e9   : > { %7365 = vmatpush3.bf16.msra.mxu1 %v8001_v13  ;;  %v4917_v13 = vrot.slane %v4915_v39, 5  ;;  %v4884_v39 = vld [vmem:[#allocation2 + $0x88] sm:$0x1f]  ;;  %v4999_v31 = vrot.slane %v4997_v42, 4  ;;  %v5056_v36 = vshrl.u32 %v4887_v56, 16  ;;  %v5059_v45 = vshll.u32 %v4887_v56, 16 }
 0x2ea   : > { %v5005_v28 = vshrl.u32 %v4884_v39, 16  ;;  %v5008_v38 = vshll.u32 %v4884_v39, 16  ;;  %v5051_v39 = vshll.u32 %v9270_v61, 16  ;;  %v5050_v8 = vrot.slane %v5048_v54, 4 }
 0x2eb   : > { %v4918_v30 = vor.u32 %v4917_v13, %v4914_v27  ;;  %v4985_v13 = vrot.slane %v4983_v59, 5  ;;  %v5003_v57 = vor.u32 %v5002_v6, %v4999_v31 }
 0x2ec   : > { %7335 = vmatmul.mubr.bf16.gmra.mrb[16].mxu1 %v4586_v29  ;;  %v5007_v15 = vrot.slane %v5005_v28, 4  ;;  %v5010_v26 = vrot.slane %v5008_v38, 5  ;;  %v5065_v38 = vshrl.u32 %v9272_v41, 16 }
 0x2ed   : > { %7338 = vmatprep.mubr.bf16.mxu1 %v4589_v35  ;;  %v4927_v47 = vsel %vm1878_vm7, %v4918_v30, %v4926_v1  ;;  %v4886_v30 = vld [vmem:[#allocation2 + $0xa8] sm:$0x1f] }
 0x2ee   : > { %v5011_v10 = vor.u32 %v5010_v26, %v5007_v15  ;;  %v4889_v26 = vld [vmem:[#allocation2 + $0xd8] sm:$0x1f] }
 0x2f0   : > { %v5012_v40 = vsel %vm1878_vm7, %v5003_v57, %v5011_v10  ;;  %v5093_v57 = vshll.u32 %v4889_v26, 16  ;;  %v5099_v10 = vshrl.u32 %v9282_v16, 16 }
 0x2f4   : > { %7339 = vmatmul.mubr.bf16.gmra.mrb[20].mxu1 %v4592_v24 }
 0x2f5   : > { %7342 = vmatprep.mubr.bf16.mxu1 %v4595_v33  ;;  %v4963_v33 = vshrl.u32 %v9242_v21, 16  ;;  %v4944_v21 = vsel %vm1878_vm7, %v4935_v22, %v4943_v11  ;;  %v5039_v22 = vshrl.u32 %v4886_v30, 16  ;;  %v5042_v11 = vshll.u32 %v4886_v30, 16  ;;  %v4890_v30 = vld [vmem:[#allocation2 + $0xe8] sm:$0x1f] }
 0x2f7   : > { %v5041_v25 = vrot.slane %v5039_v22, 4  ;;  %v5044_v59 = vrot.slane %v5042_v11, 5  ;;  %v5085_v22 = vshll.u32 %v9280_v50, 16  ;;  %v5090_v11 = vshrl.u32 %v4889_v26, 16 }
 0x2f9   : > { %v5045_v28 = vor.u32 %v5044_v59, %v5041_v25  ;;  %v5092_v25 = vrot.slane %v5090_v11, 4  ;;  %v5095_v59 = vrot.slane %v5093_v57, 5  ;;  %v5150_v11 = vshrl.u32 %v9296_v19, 16 }
 0x2fa   : > { %v5153_v57 = vshll.u32 %v9296_v19, 16 }
 0x2fc   : > { %7343 = vmatmul.mubr.bf16.gmra.mrb[24].mxu1 %v4598_v34  ;;  %v4965_v34 = vrot.slane %v4963_v33, 4  ;;  %v5025_v33 = vshll.u32 %v4885_v52, 16  ;;  %v5061_v52 = vrot.slane %v5059_v45, 5  ;;  %v4891_v45 = vld [vmem:[#allocation2 + $0xf8] sm:$0x1f] }
 0x2fd   : > { %7346 = vmatprep.mubr.bf16.mxu1 %v4601_v37  ;;  %v4980_v37 = vshrl.u32 %v9250_v60, 16 }
 0x2fe   : > { %v5027_v46 = vrot.slane %v5025_v33, 5 }
 0x2ff   : > { %v4982_v60 = vrot.slane %v4980_v37, 4  ;;  %v5036_v37 = vrot.slane %v5034_v18, 5  ;;  %v5082_v18 = vshrl.u32 %v9280_v50, 16 }
 0x301   : > { %v4986_v1 = vor.u32 %v4985_v13, %v4982_v60  ;;  %v5068_v60 = vshll.u32 %v9272_v41, 16 }
 0x303   : > { %v4995_v43 = vsel %vm1878_vm7, %v4986_v1, %v4994_v58  ;;  %v5067_v1 = vrot.slane %v5065_v38, 4  ;;  %v5070_v58 = vrot.slane %v5068_v60, 5 }
 0x304   : > { %7347 = vmatmul.mubr.bf16.gmra.mrb[28].mxu1 %v4604_v63  ;;  %v4969_v63 = vor.u32 %v4968_v62, %v4965_v34  ;;  %v5019_v34 = vrot.slane %v5017_v53, 5  ;;  %v5024_v62 = vrot.slane %v5022_v7, 4 }
 0x305   : > { %v9312_v29 = vpop.f32.mrb[32].mxu0  ;;  %7366 = vmatprep.mubr.bf16.mxu1 %v4910_v3 }
 0x306   : > { %v9314_v35 = vpop.f32.mrb[33].mxu0  ;;  %v4978_v3 = vsel %vm1878_vm7, %v4969_v63, %v4977_v14  ;;  %v4888_v63 = vld [vmem:[#allocation2 + $0xc8] sm:$0x1f]  ;;  %v5020_v14 = vor.u32 %v5019_v34, %v5016_v4  ;;  %v5028_v42 = vor.u32 %v5027_v46, %v5024_v62  ;;  %v5107_v4 = vshrl.u32 %v4890_v30, 16 }
 0x307   : > { %v9318_v24 = vpop.f32.mrb[34].mxu0  ;;  %v5073_v13 = vshrl.u32 %v4888_v63, 16  ;;  %v5076_v51 = vshll.u32 %v4888_v63, 16  ;;  %v5110_v34 = vshll.u32 %v4890_v30, 16  ;;  %v5071_v62 = vor.u32 %v5070_v58, %v5067_v1  ;;  %v4893_v1 = vld [vmem:[#allocation2 + $0x118] sm:$0x1f] }
 0x308   : > { %v9322_v2 = vpop.f32.mrb[35].mxu0  ;;  %v5029_v61 = vsel %vm1878_vm7, %v5020_v14, %v5028_v42  ;;  %v5096_v14 = vor.u32 %v5095_v59, %v5092_v25  ;;  %v5116_v42 = vshrl.u32 %v9290_v32, 16  ;;  %v5155_v25 = vrot.slane %v5153_v57, 5 }
 0x309   : > { %v5075_v41 = vrot.slane %v5073_v13, 4  ;;  %v5078_v20 = vrot.slane %v5076_v51, 5  ;;  %v5112_v50 = vrot.slane %v5110_v34, 5  ;;  %v5124_v13 = vshrl.u32 %v4891_v45, 16 }
 0x30a   : > { %v5127_v51 = vshll.u32 %v4891_v45, 16  ;;  %v5118_v30 = vrot.slane %v5116_v42, 4 }
 0x30b   : > { %v5079_v46 = vor.u32 %v5078_v20, %v5075_v41  ;;  %v5126_v20 = vrot.slane %v5124_v13, 4 }
 0x30c   : > { %7367 = vmatmul.mubr.bf16.vlgmr.msra.gmra.mrb[0].mxu1 %v4927_v47 }
 0x30d   : > { %7370 = vmatprep.mubr.bf16.mxu1 %v4944_v21  ;;  %v5033_v21 = vrot.slane %v5031_v48, 4 }
 0x30f   : > { %v9328_v9 = vpop.f32.mrb[36].mxu0  ;;  %v5037_v12 = vor.u32 %v5036_v37, %v5033_v21  ;;  %v5084_v21 = vrot.slane %v5082_v18, 4  ;;  %v5087_v37 = vrot.slane %v5085_v22, 5 }
 0x310   : > { %v9330_v44 = vpop.f32.mrb[37].mxu0 }
 0x311   : > { %v9334_v27 = vpop.f32.mrb[38].mxu0  ;;  %v5046_v6 = vsel %vm1878_vm7, %v5037_v12, %v5045_v28  ;;  %v5088_v63 = vor.u32 %v5087_v37, %v5084_v21  ;;  %v5119_v12 = vshll.u32 %v9290_v32, 16  ;;  %v5152_v37 = vrot.slane %v5150_v11, 4 }
 0x312   : > { %v9336_v0 = vpop.f32.mrb[39].mxu0 }
 0x313   : > { %v5097_v26 = vsel %vm1878_vm7, %v5088_v63, %v5096_v14  ;;  %v5121_v41 = vrot.slane %v5119_v12, 5 }
 0x314   : > { %7371 = vmatmul.mubr.bf16.gmra.mrb[4].mxu1 %v4961_v23  ;;  %v5053_v23 = vrot.slane %v5051_v39, 5  ;;  %v5109_v39 = vrot.slane %v5107_v4, 4 }
 0x315   : > { %7374 = vmatprep.mubr.bf16.mxu1 %v4978_v3  ;;  %v5058_v3 = vrot.slane %v5056_v36, 4  ;;  %v5080_v36 = vsel %vm1878_vm7, %v5071_v62, %v5079_v46  ;;  %v5122_v4 = vor.u32 %v5121_v41, %v5118_v30 }
 0x316   : > { %v5054_v7 = vor.u32 %v5053_v23, %v5050_v8  ;;  %v5113_v38 = vor.u32 %v5112_v50, %v5109_v39  ;;  %v5133_v23 = vshrl.u32 %v9292_v5, 16 }
 0x317   : > { %v9342_v55 = vpop.f32.mrb[40].mxu0  ;;  %v5062_v33 = vor.u32 %v5061_v52, %v5058_v3  ;;  %v5136_v3 = vshll.u32 %v9292_v5, 16 }
 0x318   : > { %v9346_v47 = vpop.f32.mrb[41].mxu0 }
 0x319   : > { %v9348_v17 = vpop.f32.mrb[42].mxu0  ;;  %v5063_v56 = vsel %vm1878_vm7, %v5054_v7, %v5062_v33  ;;  %v5129_v7 = vrot.slane %v5127_v51, 5  ;;  %v5135_v33 = vrot.slane %v5133_v23, 4  ;;  %v5138_v18 = vrot.slane %v5136_v3, 5  ;;  %v8009_v23 = vld [vmem:[#allocation9 + $0x38] sm:$0xff]   ;;  %v8010_v3 = vld [vmem:[#allocation11] sm:$0xff]  }
 0x31a   : > { %v9351_v49 = vpop.f32.mrb[43].mxu0  ;;  %7412 = vmatprep.subr.bf16.mxu0 %v8009_v23 }
 0x31b   : > { %v5130_v34 = vor.u32 %v5129_v7, %v5126_v20  ;;  %v5139_v62 = vor.u32 %v5138_v18, %v5135_v33  ;;  %7413 = vmatpush3.bf16.msra.mxu0 %v8009_v23 }
 0x31c   : > { %7375 = vmatmul.mubr.bf16.gmra.mrb[8].mxu1 %v4995_v43  ;;  %v5102_v43 = vshll.u32 %v9282_v16, 16  ;;  %v4892_v16 = vld [vmem:[#allocation2 + $0x108] sm:$0x1f]  ;;  %7446 = vmatprep.subr.bf16.mxu0 %v8010_v3 }
 0x31d   : > { %7378 = vmatprep.mubr.bf16.mxu1 %v5012_v40  ;;  %v5101_v40 = vrot.slane %v5099_v10, 4  ;;  %v5141_v52 = vshrl.u32 %v4892_v16, 16  ;;  %v5158_v10 = vshrl.u32 %v4893_v1, 16  ;;  %v5131_v39 = vsel %vm1878_vm7, %v5122_v4, %v5130_v34 }
 0x31e   : > { %v5104_v54 = vrot.slane %v5102_v43, 5  ;;  %v5161_v43 = vshll.u32 %v4893_v1, 16 }
 0x31f   : > { %v5143_v22 = vrot.slane %v5141_v52, 4  ;;  %v5160_v59 = vrot.slane %v5158_v10, 4 }
 0x320   : > { %v5105_v28 = vor.u32 %v5104_v54, %v5101_v40  ;;  %v5163_v40 = vrot.slane %v5161_v43, 5 }
 0x322   : > { %v5114_v58 = vsel %vm1878_vm7, %v5105_v28, %v5113_v38  ;;  %v5164_v45 = vor.u32 %v5163_v40, %v5160_v59  ;;  %v8011_v59 = vld [vmem:[#allocation11 + $0x8] sm:$0xff]  }
 0x323   : > { %v9358_v31 = vpop.f32.mrb[44].mxu0 }
 0x324   : > { %v9362_v15 = vpop.f32.mrb[45].mxu0  ;;  %7379 = vmatmul.mubr.bf16.gmra.mrb[12].mxu1 %v5029_v61  ;;  %v5144_v61 = vshll.u32 %v4892_v16, 16 }
 0x325   : > { %v9364_v53 = vpop.f32.mrb[46].mxu0  ;;  %7382 = vmatprep.mubr.bf16.mxu1 %v5046_v6 }
 0x326   : > { %v9366_v48 = vpop.f32.mrb[47].mxu0  ;;  %v5146_v5 = vrot.slane %v5144_v61, 5  ;;  %v9420_v61 = vld [vmem:[%s9614_s4] ss:$0 sm:$0xff] }
 0x328   : > { %v5147_v46 = vor.u32 %v5146_v5, %v5143_v22 }
 0x32a   : > { %v5148_v19 = vsel %vm1878_vm7, %v5139_v62, %v5147_v46 }
 0x32c   : > { %7383 = vmatmul.mubr.bf16.gmra.mrb[16].mxu1 %v5063_v56 }
 0x32d   : > { %7386 = vmatprep.mubr.bf16.mxu1 %v5080_v36  ;;  %v5156_v36 = vor.u32 %v5155_v25, %v5152_v37 }
 0x32f   : > { %v5165_v16 = vsel %vm1878_vm7, %v5156_v36, %v5164_v45  ;;  %v8012_v45 = vld [vmem:[#allocation11 + $0x10] sm:$0xff]  }
 0x330   : > { %v9376_v60 = vpop.f32.mrb[48].mxu0 }
 0x331   : > { %v9378_v8 = vpop.f32.mrb[49].mxu0 }
 0x332   : > { %v9382_v6 = vpop.f32.mrb[50].mxu0 }
 0x333   : > { %v9385_v32 = vpop.f32.mrb[51].mxu0 }
 0x334   : > { %7387 = vmatmul.mubr.bf16.gmra.mrb[20].mxu1 %v5097_v26 }
 0x335   : > { %7390 = vmatprep.mubr.bf16.mxu1 %v5114_v58 }
 0x338   : > { %v9390_v56 = vpop.f32.mrb[52].mxu0 }
 0x339   : > { %v9392_v21 = vpop.f32.mrb[53].mxu0 }
 0x33a   : > { %v9394_v54 = vpop.f32.mrb[54].mxu0 }
 0x33b   : > { %v9397_v50 = vpop.f32.mrb[55].mxu0 }
 0x33c   : > { %7391 = vmatmul.mubr.bf16.gmra.mrb[24].mxu1 %v5131_v39 }
 0x33d   : > { %7394 = vmatprep.mubr.bf16.mxu1 %v5148_v19 }
 0x344   : > { %7395 = vmatmul.mubr.bf16.gmra.mrb[28].mxu1 %v5165_v16 }
 0x346   : > { %v9401_v63 = vpop.f32.mrb[56].mxu0 }
 0x347   : > { %v9403_v14 = vpop.f32.mrb[57].mxu0 }
 0x348   : > { %v9405_v42 = vpop.f32.mrb[58].mxu0 }
 0x349   : > { %v9407_v12 = vpop.f32.mrb[59].mxu0 }
 0x352   : > { %v9409_v28 = vpop.f32.mrb[60].mxu0 }
 0x353   : > { %v9411_v38 = vpop.f32.mrb[61].mxu0 }
 0x354   : > { %v9413_v13 = vpop.f32.mrb[62].mxu0 }
 0x355   : > { %v9415_v51 = vpop.f32.mrb[63].mxu0 }
 0x3df   : > { %v7368_v52 = vpop.f32.mrb[0].mxu1 }
 0x3e0   : > { %v7494_v26 = vadd.f32 %v7368_v52, %v9312_v29  ;;  %v5280_v30 = vpop.f32.mrb[1].mxu1 }
 0x3e1   : > { %v7495_v1 = vadd.f32 %v5280_v30, %v9314_v35  ;;  %v7369_v58 = vpop.f32.mrb[2].mxu1 }
 0x3e2   : > { %v5448_v41 = vadd.f32 %v7494_v26, %v9420_v61  ;;  %v7496_v20 = vadd.f32 %v7369_v58, %v9318_v24  ;;  %v5283_v7 = vpop.f32.mrb[3].mxu1 }
 0x3e3   : > { %v5446_v33 = vadd.f32 %v7495_v1, %v9420_v61  ;;  %v7497_v18 = vadd.f32 %v5283_v7, %v9322_v2  ;;  %v8013_v7 = vld [vmem:[#allocation11 + $0x18] sm:$0xff]  }
 0x3e4   : > { %v5449_v22 = vadd.f32 %v7496_v20, %v9420_v61  ;;  %v5480_v11 = vmax.f32 %v5448_v41, 0.0 }
 0x3e5   : > { %v5447_v5 = vadd.f32 %v7497_v18, %v9420_v61  ;;  %v5478_v29 = vmax.f32 %v5446_v33, 0.0 }
 0x3e6   : > { %v5481_v57 = vmax.f32 %v5449_v22, 0.0 }
 0x3e7   : > { %v5479_v10 = vmax.f32 %v5447_v5, 0.0  ;;  %v7372_v43 = vpop.f32.mrb[4].mxu1 }
 0x3e8   : > { %v5511_v35 = vpack.c.bf16 %v5481_v57, %v5480_v11  ;;  %v7498_v4 = vadd.f32 %v7372_v43, %v9328_v9  ;;  %v5296_v34 = vpop.f32.mrb[5].mxu1  ;;  %v8014_v11 = vld [vmem:[#allocation11 + $0x20] sm:$0xff]  }
 0x3e9   : > { %v7499_v24 = vadd.f32 %v5296_v34, %v9330_v44  ;;  %v7373_v62 = vpop.f32.mrb[6].mxu1  ;;  %v5510_v46 = vpack.c.bf16 %v5479_v10, %v5478_v29 }
 0x3ea   : > { %v5452_v37 = vadd.f32 %v7498_v4, %v9420_v61  ;;  %v7500_v2 = vadd.f32 %v7373_v62, %v9334_v27  ;;  %v5299_v25 = vpop.f32.mrb[7].mxu1 }
 0x3eb   : > { %v5450_v40 = vadd.f32 %v7499_v24, %v9420_v61  ;;  %v7501_v39 = vadd.f32 %v5299_v25, %v9336_v0  ;;  %7414 = vmatprep.mubr.bf16.mxu0 %v5510_v46 }
 0x3ec   : > { %v5453_v19 = vadd.f32 %v7500_v2, %v9420_v61  ;;  %7415 = vmatmul.mubr.bf16.vlgmr.msra.gmra.mrb[64].mxu0 %v5511_v35  ;;  %v5484_v44 = vmax.f32 %v5452_v37, 0.0  ;;  %v8015_v37 = vld [vmem:[#allocation11 + $0x28] sm:$0xff]  }
 0x3ed   : > { %v5451_v9 = vadd.f32 %v7501_v39, %v9420_v61  ;;  %7447 = vmatpush3.bf16.msra.mxu0 %v8010_v3  ;;  %v5482_v16 = vmax.f32 %v5450_v40, 0.0  ;;  %v8016_v39 = vld [vmem:[#allocation11 + $0x30] sm:$0xff]  }
 0x3ee   : > { %v5485_v36 = vmax.f32 %v5453_v19, 0.0  ;;  %7448 = vmatprep.subr.bf16.mxu0 %v8011_v59 }
 0x3ef   : > { %v5483_v23 = vmax.f32 %v5451_v9, 0.0  ;;  %v7376_v27 = vpop.f32.mrb[8].mxu1 }
 0x3f0   : > { %v7502_v52 = vadd.f32 %v7376_v27, %v9342_v55  ;;  %v5312_v26 = vpop.f32.mrb[9].mxu1  ;;  %v5513_v30 = vpack.c.bf16 %v5485_v36, %v5484_v44 }
 0x3f1   : > { %v7503_v0 = vadd.f32 %v5312_v26, %v9346_v47  ;;  %v7377_v1 = vpop.f32.mrb[10].mxu1  ;;  %v5512_v58 = vpack.c.bf16 %v5483_v23, %v5482_v16  ;;  %7449 = vmatpush3.bf16.msra.mxu0 %v8011_v59 }
 0x3f2   : > { %v5456_v41 = vadd.f32 %v7502_v52, %v9420_v61  ;;  %v7504_v3 = vadd.f32 %v7377_v1, %v9348_v17  ;;  %v5315_v20 = vpop.f32.mrb[11].mxu1  ;;  %7450 = vmatprep.subr.bf16.mxu0 %v8012_v45 }
 0x3f3   : > { %v5454_v33 = vadd.f32 %v7503_v0, %v9420_v61  ;;  %v7505_v18 = vadd.f32 %v5315_v20, %v9351_v49  ;;  %7418 = vmatprep.mubr.bf16.mxu0 %v5512_v58 }
 0x3f4   : > { %v5457_v55 = vadd.f32 %v7504_v3, %v9420_v61  ;;  %7419 = vmatmul.mubr.bf16.gmra.mrb[68].mxu0 %v5513_v30  ;;  %v5488_v22 = vmax.f32 %v5456_v41, 0.0  ;;  %v8017_v30 = vld [vmem:[#allocation11 + $0x38] sm:$0xff]  }
 0x3f5   : > { %v5455_v47 = vadd.f32 %v7505_v18, %v9420_v61  ;;  %7451 = vmatpush3.bf16.msra.mxu0 %v8012_v45  ;;  %v5486_v57 = vmax.f32 %v5454_v33, 0.0 }
 0x3f6   : > { %v5489_v5 = vmax.f32 %v5457_v55, 0.0  ;;  %7452 = vmatprep.subr.bf16.mxu0 %v8013_v7 }
 0x3f7   : > { %v5487_v17 = vmax.f32 %v5455_v47, 0.0  ;;  %v7380_v29 = vpop.f32.mrb[12].mxu1 }
 0x3f8   : > { %v7506_v10 = vadd.f32 %v7380_v29, %v9358_v31  ;;  %v5328_v43 = vpop.f32.mrb[13].mxu1  ;;  %v5515_v35 = vpack.c.bf16 %v5489_v5, %v5488_v22 }
 0x3f9   : > { %v7507_v49 = vadd.f32 %v5328_v43, %v9362_v15  ;;  %v7381_v4 = vpop.f32.mrb[14].mxu1  ;;  %v5514_v34 = vpack.c.bf16 %v5487_v17, %v5486_v57  ;;  %7453 = vmatpush3.bf16.msra.mxu0 %v8013_v7 }
 0x3fa   : > { %v5460_v24 = vadd.f32 %v7506_v10, %v9420_v61  ;;  %v7508_v62 = vadd.f32 %v7381_v4, %v9364_v53  ;;  %v5331_v46 = vpop.f32.mrb[15].mxu1  ;;  %7454 = vmatprep.subr.bf16.mxu0 %v8014_v11 }
 0x3fb   : > { %v5458_v2 = vadd.f32 %v7507_v49, %v9420_v61  ;;  %v7509_v25 = vadd.f32 %v5331_v46, %v9366_v48  ;;  %7422 = vmatprep.mubr.bf16.mxu0 %v5514_v34 }
 0x3fc   : > { %v5461_v31 = vadd.f32 %v7508_v62, %v9420_v61  ;;  %7423 = vmatmul.mubr.bf16.gmra.mrb[72].mxu0 %v5515_v35  ;;  %v5492_v59 = vmax.f32 %v5460_v24, 0.0 }
 0x3fd   : > { %v5459_v15 = vadd.f32 %v7509_v25, %v9420_v61  ;;  %7455 = vmatpush3.bf16.msra.mxu0 %v8014_v11  ;;  %v5490_v19 = vmax.f32 %v5458_v2, 0.0 }
 0x3fe   : > { %v5493_v40 = vmax.f32 %v5461_v31, 0.0  ;;  %7456 = vmatprep.subr.bf16.mxu0 %v8015_v37 }
 0x3ff   : > { %v5491_v53 = vmax.f32 %v5459_v15, 0.0  ;;  %v7384_v9 = vpop.f32.mrb[16].mxu1 }
 0x400   : > { %v7510_v44 = vadd.f32 %v7384_v9, %v9376_v60  ;;  %v5344_v36 = vpop.f32.mrb[17].mxu1  ;;  %v5517_v45 = vpack.c.bf16 %v5493_v40, %v5492_v59 }
 0x401   : > { %v7511_v48 = vadd.f32 %v5344_v36, %v9378_v8  ;;  %v7385_v16 = vpop.f32.mrb[18].mxu1  ;;  %v5516_v23 = vpack.c.bf16 %v5491_v53, %v5490_v19  ;;  %7457 = vmatpush3.bf16.msra.mxu0 %v8015_v37 }
 0x402   : > { %v5464_v27 = vadd.f32 %v7510_v44, %v9420_v61  ;;  %v7512_v52 = vadd.f32 %v7385_v16, %v9382_v6  ;;  %v5347_v26 = vpop.f32.mrb[19].mxu1  ;;  %7458 = vmatprep.subr.bf16.mxu0 %v8016_v39 }
 0x403   : > { %v5462_v0 = vadd.f32 %v7511_v48, %v9420_v61  ;;  %v7513_v1 = vadd.f32 %v5347_v26, %v9385_v32  ;;  %7426 = vmatprep.mubr.bf16.mxu0 %v5516_v23 }
 0x404   : > { %v5465_v60 = vadd.f32 %v7512_v52, %v9420_v61  ;;  %7427 = vmatmul.mubr.bf16.gmra.mrb[76].mxu0 %v5517_v45  ;;  %v5496_v58 = vmax.f32 %v5464_v27, 0.0 }
 0x405   : > { %v5463_v8 = vadd.f32 %v7513_v1, %v9420_v61  ;;  %7459 = vmatpush3.bf16.msra.mxu0 %v8016_v39  ;;  %v5494_v3 = vmax.f32 %v5462_v0, 0.0 }
 0x406   : > { %v5497_v41 = vmax.f32 %v5465_v60, 0.0  ;;  %7460 = vmatprep.subr.bf16.mxu0 %v8017_v30  ;;  %v8035_v60 = vld [vmem:[%s8556_s27 + $0x8] sm:$0xff]  }
 0x407   : > { %v5495_v20 = vmax.f32 %v5463_v8, 0.0  ;;  %v7388_v6 = vpop.f32.mrb[20].mxu1  ;;  %v8036_v8 = vld [vmem:[%s8556_s27 + $0x10] sm:$0xff]  }
 0x408   : > { %v7514_v7 = vadd.f32 %v7388_v6, %v9390_v56  ;;  %v5360_v33 = vpop.f32.mrb[21].mxu1  ;;  %v5519_v18 = vpack.c.bf16 %v5497_v41, %v5496_v58  ;;  %v8038_v58 = vld [vmem:[%s8556_s27 + $0x20] sm:$0xff]   ;;  %v8039_v41 = vld [vmem:[%s8556_s27 + $0x28] sm:$0xff]  }
 0x409   : > { %v7515_v55 = vadd.f32 %v5360_v33, %v9392_v21  ;;  %v7389_v32 = vpop.f32.mrb[22].mxu1  ;;  %v5518_v47 = vpack.c.bf16 %v5495_v20, %v5494_v3  ;;  %7461 = vmatpush3.bf16.msra.mxu0 %v8017_v30  ;;  %v8040_v3 = vld [vmem:[%s8556_s27 + $0x30] sm:$0xff]   ;;  %v8041_v20 = vld [vmem:[%s8556_s27 + $0x38] sm:$0xff]   ;;  %v8042_v6 = vld [vmem:[%s8556_s27 + $0x40] sm:$0xff]  }
 0x40a   : > { %v5468_v22 = vadd.f32 %v7514_v7, %v9420_v61  ;;  %v7516_v5 = vadd.f32 %v7389_v32, %v9394_v54  ;;  %v5363_v11 = vpop.f32.mrb[23].mxu1  ;;  %v8043_v7 = vld [vmem:[%s8556_s27 + $0x48] sm:$0xff]   ;;  %v8044_v33 = vld [vmem:[%s8556_s27 + $0x50] sm:$0xff]  }
 0x40b   : > { %v5466_v57 = vadd.f32 %v7515_v55, %v9420_v61  ;;  %v7517_v17 = vadd.f32 %v5363_v11, %v9397_v50  ;;  %7430 = vmatprep.mubr.bf16.mxu0 %v5518_v47  ;;  %v8046_v55 = vld [vmem:[%s8556_s27 + $0x60] sm:$0xff]   ;;  %v8047_v32 = vld [vmem:[%s8556_s27 + $0x68] sm:$0xff]   ;;  %v8048_v47 = vld [vmem:[%s8556_s27 + $0x70] sm:$0xff]  }
 0x40c   : > { %v5469_v29 = vadd.f32 %v7516_v5, %v9420_v61  ;;  %7431 = vmatmul.mubr.bf16.gmra.mrb[80].mxu0 %v5519_v18  ;;  %v5500_v10 = vmax.f32 %v5468_v22, 0.0  ;;  %v8045_v18 = vld [vmem:[%s8556_s27 + $0x58] sm:$0xff]   ;;  %v9505_v5 = vld [vmem:[%s9617_s7] ss:$0 sm:$0xff] }
 0x40d   : > { %v5467_v56 = vadd.f32 %v7517_v17, %v9420_v61  ;;  %v5498_v43 = vmax.f32 %v5466_v57, 0.0  ;;  %v8049_v22 = vld [vmem:[%s8556_s27 + $0x78] sm:$0xff]  }
 0x40e   : > { %v5501_v21 = vmax.f32 %v5469_v29, 0.0 }
 0x40f   : > { %v5499_v35 = vmax.f32 %v5467_v56, 0.0  ;;  %v7392_v49 = vpop.f32.mrb[24].mxu1 }
 0x410   : > { %v7518_v4 = vadd.f32 %v7392_v49, %v9401_v63  ;;  %v5376_v34 = vpop.f32.mrb[25].mxu1  ;;  %v5521_v54 = vpack.c.bf16 %v5501_v21, %v5500_v10 }
 0x411   : > { %v7519_v24 = vadd.f32 %v5376_v34, %v9403_v14  ;;  %v7393_v62 = vpop.f32.mrb[26].mxu1  ;;  %v5520_v46 = vpack.c.bf16 %v5499_v35, %v5498_v43 }
 0x412   : > { %v5472_v50 = vadd.f32 %v7518_v4, %v9420_v61  ;;  %v7520_v37 = vadd.f32 %v7393_v62, %v9405_v42  ;;  %v5379_v2 = vpop.f32.mrb[27].mxu1 }
 0x413   : > { %v5470_v25 = vadd.f32 %v7519_v24, %v9420_v61  ;;  %v7521_v31 = vadd.f32 %v5379_v2, %v9407_v12  ;;  %7434 = vmatprep.mubr.bf16.mxu0 %v5520_v46 }
 0x414   : > { %v5473_v15 = vadd.f32 %v7520_v37, %v9420_v61  ;;  %7435 = vmatmul.mubr.bf16.gmra.mrb[84].mxu0 %v5521_v54  ;;  %v5504_v59 = vmax.f32 %v5472_v50, 0.0 }
 0x415   : > { %v5471_v63 = vadd.f32 %v7521_v31, %v9420_v61  ;;  %v5502_v14 = vmax.f32 %v5470_v25, 0.0 }
 0x416   : > { %v5505_v40 = vmax.f32 %v5473_v15, 0.0 }
 0x417   : > { %v5503_v39 = vmax.f32 %v5471_v63, 0.0  ;;  %v7396_v19 = vpop.f32.mrb[28].mxu1 }
 0x418   : > { %v7522_v53 = vadd.f32 %v7396_v19, %v9409_v28  ;;  %v5392_v9 = vpop.f32.mrb[29].mxu1  ;;  %v5523_v42 = vpack.c.bf16 %v5505_v40, %v5504_v59 }
 0x419   : > { %v7523_v44 = vadd.f32 %v5392_v9, %v9411_v38  ;;  %v7397_v36 = vpop.f32.mrb[30].mxu1  ;;  %v5522_v45 = vpack.c.bf16 %v5503_v39, %v5502_v14 }
 0x41a   : > { %v5476_v12 = vadd.f32 %v7522_v53, %v9420_v61  ;;  %v7524_v48 = vadd.f32 %v7397_v36, %v9413_v13  ;;  %v5395_v16 = vpop.f32.mrb[31].mxu1 }
 0x41b   : > { %v5474_v23 = vadd.f32 %v7523_v44, %v9420_v61  ;;  %v7525_v27 = vadd.f32 %v5395_v16, %v9415_v51  ;;  %7438 = vmatprep.mubr.bf16.mxu0 %v5522_v45  ;;  %v8034_v51 = vld [vmem:[%s8556_s27] sm:$0xff]  }
 0x41c   : > { %v5477_v28 = vadd.f32 %v7524_v48, %v9420_v61  ;;  %7439 = vmatmul.mubr.bf16.gmra.mrb[88].mxu0 %v5523_v42  ;;  %v5508_v52 = vmax.f32 %v5476_v12, 0.0 }
 0x41d   : > { %v5475_v38 = vadd.f32 %v7525_v27, %v9420_v61  ;;  %v5506_v30 = vmax.f32 %v5474_v23, 0.0  ;;  %v8037_v61 = vld [vmem:[%s8556_s27 + $0x18] sm:$0xff]   ;;  %s8276_s27 = smov [#allocation12]  }
 0x41e   : > { %v5509_v26 = vmax.f32 %v5477_v28, 0.0  ;;  %s8196_s11 = sshll.u32 %s8276_s27, 4  ;;  %s8197_s11 = int_to_ptr.vmem [resolvable:$false] %s8196_s11 }
 0x41f   : > { %v5507_v13 = vmax.f32 %v5475_v38, 0.0  ;;  %s8198_s13 = scalar_lea.vmem %s8197_s11, 4096  ;;  %p8199_p12 = scmp.lt.s32.totalorder %s9564_s10, %s8197_s11 }
 0x420   : > { %v5525_v0 = vpack.c.bf16 %v5509_v26, %v5508_v52  ;;  %p8200_p1 = scmp.lt.s32.totalorder %s8198_s13, %s8192_s20 }
 0x421   : > { %v5524_v1 = vpack.c.bf16 %v5507_v13, %v5506_v30 }
 0x422   : > { %p8201_p2 = por %p8200_p1, %p8199_p12 }
 0x423   : > { %7442 = vmatprep.mubr.bf16.mxu0 %v5524_v1 }
 0x424   : > { %7443 = vmatmul.mubr.bf16.gmra.mrb[92].mxu0 %v5525_v0  ;;  %p8202_p13 = pnand %p8201_p2, %p8195_p7 }
 0x425   : > { %7462 = vmatprep.mubr.bf16.mxu0 %v8034_v51 }
 0x42c   : > { %7463 = vmatmul.mubr.bf16.vlgmr.msra.gmra.mrb[64].mxu0 %v8035_v60 }
 0x42d   : > { %7466 = vmatprep.mubr.bf16.mxu0 %v8036_v8 }
 0x434   : > { %7467 = vmatmul.mubr.bf16.gmra.mrb[68].mxu0 %v8037_v61 }
 0x435   : > { %7470 = vmatprep.mubr.bf16.mxu0 %v8038_v58 }
 0x43c   : > { %7471 = vmatmul.mubr.bf16.gmra.mrb[72].mxu0 %v8039_v41 }
 0x43d   : > { %7474 = vmatprep.mubr.bf16.mxu0 %v8040_v3 }
 0x444   : > { %7475 = vmatmul.mubr.bf16.gmra.mrb[76].mxu0 %v8041_v20 }
 0x445   : > { %7478 = vmatprep.mubr.bf16.mxu0 %v8042_v6 }
 0x44c   : > { %7479 = vmatmul.mubr.bf16.gmra.mrb[80].mxu0 %v8043_v7 }
 0x44d   : > { %7482 = vmatprep.mubr.bf16.mxu0 %v8044_v33 }
 0x454   : > { %7483 = vmatmul.mubr.bf16.gmra.mrb[84].mxu0 %v8045_v18 }
 0x455   : > { %7486 = vmatprep.mubr.bf16.mxu0 %v8046_v55 }
 0x45c   : > { %7487 = vmatmul.mubr.bf16.gmra.mrb[88].mxu0 %v8047_v32 }
 0x45d   : > { %7490 = vmatprep.mubr.bf16.mxu0 %v8048_v47 }
 0x464   : > { %7491 = vmatmul.mubr.bf16.gmra.mrb[92].mxu0 %v8049_v22 }
 0x4ff   : > { %v7464_v11 = vpop.f32.mrb[64].mxu0 }
 0x500   : > { %v7526_v57 = vadd.f32 %v7464_v11, %v9505_v5  ;;  %v5856_v17 = vpop.f32.mrb[65].mxu0 }
 0x501   : > { %v7527_v29 = vadd.f32 %v9505_v5, %v5856_v17  ;;  %v7465_v56 = vpop.f32.mrb[66].mxu0 }
 0x502   : > { %v7528_v10 = vadd.f32 %v7465_v56, %v9505_v5  ;;  %v5859_v21 = vpop.f32.mrb[67].mxu0  ;;  %v6017_v35 = vmax.f32 %v7526_v57, 0.0 }
 0x503   : > { %v7529_v43 = vadd.f32 %v9505_v5, %v5859_v21  ;;  %v6015_v4 = vmax.f32 %v7527_v29, 0.0 }
 0x504   : > { %v6018_v49 = vmax.f32 %v7528_v10, 0.0 }
 0x505   : > { %v6016_v34 = vmax.f32 %v7529_v43, 0.0 }
 0x506   : > { %v6543_v54 = vpack.c.bf16 %v6018_v49, %v6017_v35 }
 0x507   : > { %v6538_v24 = vpack.c.bf16 %v6016_v34, %v6015_v4  ;;  %v7468_v62 = vpop.f32.mrb[68].mxu0 }
 0x508   : > { %6615 = vst [vmem:[%s9513_s16 + $0x8] sm:$0xff] %v6543_v54   ;;  %v7530_v46 = vadd.f32 %v7468_v62, %v9505_v5  ;;  %v5872_v50 = vpop.f32.mrb[69].mxu0 }
 0x509   : > { %6539 = vst [vmem:[%s9513_s16] sm:$0xff] %v6538_v24   ;;  %v7531_v37 = vadd.f32 %v9505_v5, %v5872_v50  ;;  %v7469_v2 = vpop.f32.mrb[70].mxu0 }
 0x50a   : > { %v7532_v25 = vadd.f32 %v7469_v2, %v9505_v5  ;;  %v5875_v31 = vpop.f32.mrb[71].mxu0  ;;  %v6021_v63 = vmax.f32 %v7530_v46, 0.0 }
 0x50b   : > { %v7533_v15 = vadd.f32 %v9505_v5, %v5875_v31  ;;  %v6019_v40 = vmax.f32 %v7531_v37, 0.0 }
 0x50c   : > { %v6022_v59 = vmax.f32 %v7532_v25, 0.0 }
 0x50d   : > { %v6020_v14 = vmax.f32 %v7533_v15, 0.0 }
 0x50e   : > { %v6553_v39 = vpack.c.bf16 %v6022_v59, %v6021_v63 }
 0x50f   : > { %v6548_v19 = vpack.c.bf16 %v6020_v14, %v6019_v40  ;;  %v7472_v53 = vpop.f32.mrb[72].mxu0 }
 0x510   : > { %6617 = vst [vmem:[%s9513_s16 + $0x18] sm:$0xff] %v6553_v39   ;;  %v7534_v9 = vadd.f32 %v7472_v53, %v9505_v5  ;;  %v5888_v42 = vpop.f32.mrb[73].mxu0 }
 0x511   : > { %6616 = vst [vmem:[%s9513_s16 + $0x10] sm:$0xff] %v6548_v19   ;;  %v7535_v44 = vadd.f32 %v9505_v5, %v5888_v42  ;;  %v7473_v36 = vpop.f32.mrb[74].mxu0 }
 0x512   : > { %v7536_v45 = vadd.f32 %v7473_v36, %v9505_v5  ;;  %v5891_v12 = vpop.f32.mrb[75].mxu0  ;;  %v6025_v16 = vmax.f32 %v7534_v9, 0.0 }
 0x513   : > { %v7537_v48 = vadd.f32 %v9505_v5, %v5891_v12  ;;  %v6023_v27 = vmax.f32 %v7535_v44, 0.0 }
 0x514   : > { %v6026_v23 = vmax.f32 %v7536_v45, 0.0 }
 0x515   : > { %v6024_v28 = vmax.f32 %v7537_v48, 0.0 }
 0x516   : > { %v6563_v38 = vpack.c.bf16 %v6026_v23, %v6025_v16 }
 0x517   : > { %v6558_v52 = vpack.c.bf16 %v6024_v28, %v6023_v27  ;;  %v7476_v26 = vpop.f32.mrb[76].mxu0 }
 0x518   : > { %6619 = vst [vmem:[%s9513_s16 + $0x28] sm:$0xff] %v6563_v38   ;;  %v7538_v30 = vadd.f32 %v7476_v26, %v9505_v5  ;;  %v5904_v13 = vpop.f32.mrb[77].mxu0 }
 0x519   : > { %6618 = vst [vmem:[%s9513_s16 + $0x20] sm:$0xff] %v6558_v52   ;;  %v7539_v0 = vadd.f32 %v9505_v5, %v5904_v13  ;;  %v7477_v1 = vpop.f32.mrb[78].mxu0 }
 0x51a   : > { %v7540_v51 = vadd.f32 %v7477_v1, %v9505_v5  ;;  %v5907_v60 = vpop.f32.mrb[79].mxu0  ;;  %v6029_v61 = vmax.f32 %v7538_v30, 0.0 }
 0x51b   : > { %v7541_v8 = vadd.f32 %v9505_v5, %v5907_v60  ;;  %v6027_v41 = vmax.f32 %v7539_v0, 0.0 }
 0x51c   : > { %v6030_v58 = vmax.f32 %v7540_v51, 0.0 }
 0x51d   : > { %v6028_v3 = vmax.f32 %v7541_v8, 0.0 }
 0x51e   : > { %v6573_v20 = vpack.c.bf16 %v6030_v58, %v6029_v61 }
 0x51f   : > { %v6568_v6 = vpack.c.bf16 %v6028_v3, %v6027_v41  ;;  %v7480_v7 = vpop.f32.mrb[80].mxu0 }
 0x520   : > { %6621 = vst [vmem:[%s9513_s16 + $0x38] sm:$0xff] %v6573_v20   ;;  %v7542_v33 = vadd.f32 %v7480_v7, %v9505_v5  ;;  %v5920_v18 = vpop.f32.mrb[81].mxu0 }
 0x521   : > { %6620 = vst [vmem:[%s9513_s16 + $0x30] sm:$0xff] %v6568_v6   ;;  %v7543_v55 = vadd.f32 %v9505_v5, %v5920_v18  ;;  %v7481_v32 = vpop.f32.mrb[82].mxu0 }
 0x522   : > { %v7544_v47 = vadd.f32 %v7481_v32, %v9505_v5  ;;  %v5923_v22 = vpop.f32.mrb[83].mxu0  ;;  %v6033_v57 = vmax.f32 %v7542_v33, 0.0 }
 0x523   : > { %v7545_v11 = vadd.f32 %v9505_v5, %v5923_v22  ;;  %v6031_v29 = vmax.f32 %v7543_v55, 0.0 }
 0x524   : > { %v6034_v17 = vmax.f32 %v7544_v47, 0.0 }
 0x525   : > { %v6032_v56 = vmax.f32 %v7545_v11, 0.0 }
 0x526   : > { %v6583_v10 = vpack.c.bf16 %v6034_v17, %v6033_v57 }
 0x527   : > { %v6578_v21 = vpack.c.bf16 %v6032_v56, %v6031_v29  ;;  %v7484_v43 = vpop.f32.mrb[84].mxu0 }
 0x528   : > { %6623 = vst [vmem:[%s9513_s16 + $0x48] sm:$0xff] %v6583_v10   ;;  %v7546_v35 = vadd.f32 %v7484_v43, %v9505_v5  ;;  %v5936_v49 = vpop.f32.mrb[85].mxu0 }
 0x529   : > { %6622 = vst [vmem:[%s9513_s16 + $0x40] sm:$0xff] %v6578_v21   ;;  %v7547_v4 = vadd.f32 %v9505_v5, %v5936_v49  ;;  %v7485_v34 = vpop.f32.mrb[86].mxu0 }
 0x52a   : > { %v7548_v54 = vadd.f32 %v7485_v34, %v9505_v5  ;;  %v5939_v24 = vpop.f32.mrb[87].mxu0  ;;  %v6037_v46 = vmax.f32 %v7546_v35, 0.0 }
 0x52b   : > { %v7549_v62 = vadd.f32 %v9505_v5, %v5939_v24  ;;  %v6035_v37 = vmax.f32 %v7547_v4, 0.0 }
 0x52c   : > { %v6038_v50 = vmax.f32 %v7548_v54, 0.0 }
 0x52d   : > { %v6036_v2 = vmax.f32 %v7549_v62, 0.0 }
 0x52e   : > { %v6593_v25 = vpack.c.bf16 %v6038_v50, %v6037_v46 }
 0x52f   : > { %v6588_v31 = vpack.c.bf16 %v6036_v2, %v6035_v37  ;;  %v7488_v15 = vpop.f32.mrb[88].mxu0 }
 0x530   : > { %6625 = vst [vmem:[%s9513_s16 + $0x58] sm:$0xff] %v6593_v25   ;;  %v7550_v63 = vadd.f32 %v7488_v15, %v9505_v5  ;;  %v5952_v59 = vpop.f32.mrb[89].mxu0 }
 0x531   : > { %6624 = vst [vmem:[%s9513_s16 + $0x50] sm:$0xff] %v6588_v31   ;;  %v7551_v40 = vadd.f32 %v9505_v5, %v5952_v59  ;;  %v7489_v14 = vpop.f32.mrb[90].mxu0 }
 0x532   : > { %v7552_v39 = vadd.f32 %v7489_v14, %v9505_v5  ;;  %v5955_v19 = vpop.f32.mrb[91].mxu0  ;;  %v6041_v9 = vmax.f32 %v7550_v63, 0.0 }
 0x533   : > { %v7553_v53 = vadd.f32 %v9505_v5, %v5955_v19  ;;  %v6039_v44 = vmax.f32 %v7551_v40, 0.0 }
 0x534   : > { %v6042_v42 = vmax.f32 %v7552_v39, 0.0 }
 0x535   : > { %v6040_v36 = vmax.f32 %v7553_v53, 0.0 }
 0x536   : > { %v6603_v45 = vpack.c.bf16 %v6042_v42, %v6041_v9 }
 0x537   : > { %v6598_v12 = vpack.c.bf16 %v6040_v36, %v6039_v44  ;;  %v7492_v48 = vpop.f32.mrb[92].mxu0 }
 0x538   : > { %6627 = vst [vmem:[%s9513_s16 + $0x68] sm:$0xff] %v6603_v45   ;;  %v7554_v16 = vadd.f32 %v7492_v48, %v9505_v5  ;;  %v5968_v23 = vpop.f32.mrb[93].mxu0 }
 0x539   : > { %6626 = vst [vmem:[%s9513_s16 + $0x60] sm:$0xff] %v6598_v12   ;;  %v7555_v27 = vadd.f32 %v9505_v5, %v5968_v23  ;;  %v7493_v28 = vpop.f32.mrb[94].mxu0 }
 0x53a   : > { %v7556_v38 = vadd.f32 %v7493_v28, %v9505_v5  ;;  %v5971_v52 = vpop.f32.mrb[95].mxu0  ;;  %v6045_v30 = vmax.f32 %v7554_v16, 0.0 }
 0x53b   : > { %v7557_v26 = vadd.f32 %v9505_v5, %v5971_v52  ;;  %v6043_v0 = vmax.f32 %v7555_v27, 0.0 }
 0x53c   : > { %v6046_v13 = vmax.f32 %v7556_v38, 0.0 }
 0x53d   : > { %v6044_v1 = vmax.f32 %v7557_v26, 0.0 }
 0x53e   : > { %v6613_v51 = vpack.c.bf16 %v6046_v13, %v6045_v30 }
 0x53f   : > { %v6608_v60 = vpack.c.bf16 %v6044_v1, %v6043_v0 }
 0x540   : > { %6629 = vst [vmem:[%s9513_s16 + $0x78] sm:$0xff] %v6613_v51  }
 0x541   : > { %6628 = vst [vmem:[%s9513_s16 + $0x70] sm:$0xff] %v6608_v60  }
 0x542   : > { %8205 = shalt.err (!%p8202_p13)
}
 0x543   : > { %s8206_s19 = scalar_lea.hbm %s9562_s14, 2048  ;;  %s8210_s18 = scalar_lea.hbm %s9618_s8, 4096 }
 0x544   : > { %p8207_p9 = scmp.ne.s32.totalorder %s9562_s14, %s8206_s19  ;;  %p8211_p4 = scmp.lt.u32.totalorder %s9562_s14, %s9618_s8 }
 0x545   : > { %p8212_p8 = scmp.lt.u32.totalorder %s8210_s18, %s8206_s19  ;;  %p8214_p3 = scmp.lt.u32.totalorder %s8206_s19, %s9562_s14 }
 0x546   : > { %p8208_p0 = pnand %p8207_p9, %p8495_p10 }
 0x547   : > { %p8213_p6 = por %p8212_p8, %p8211_p4 }
 0x548   : > { %p8209_p11 = pneg %p8208_p0 }
 0x549   : > { %p8215_p5 = por %p8214_p3, %p8213_p6 }
 0x54b   : > { %p8216_p7 = pnand %p8215_p5, %p8209_p11 }
 0x54d   : > { %8219 = shalt.err (!%p8216_p7)
}
 0x54e   : > { %s8277_s22 = smov 64   ;;  %s8278_s17 = smov 4  }
 0x54f   : > { %7832 = dma.vmem_to_hbm [thread:$0]  (%p8495_p10), %s9564_s10, 2048, %s9562_s14, %s6208_s9, %s8277_s22, %s8277_s22, %s8278_s17  }
 0x550 PF: > { %s9644_s20 = sld [smem:[#allocation17_spill]]  ;;  %s9645_s27 = sld [smem:[#allocation18_spill]] }
 0x551   : > { %p9647_p1 = scmp.ge.s32.totalorder %s8266_s30, 2 }
 0x556   : > { %s6236_s11 = sand.u32 1, %s9644_s20   ;;  %p9646_p12 = scmp.ne.s32.totalorder %s9645_s27, 0 }
 0x557   : > { %s6237_s13 = scalar_lea.sflag [#allocation5], %s6236_s11 }
 0x558   : > { %p7852_p2 = pnand %p9647_p1, %p9646_p12 }
 0x55a   : > { %8249 = dma.done.wait (!%p7852_p2), %s6237_s13, 2048  }
 0x55b   : > { %8251 = vsyncadd (!%p7852_p2), %s6237_s13, 4294965248  ;;  %p23_p13 = scmp.ge.s32.totalorder %s8485_s26, 4   ;;  %s9648_s27 = smov %s8258_s28 }
 0x55c   : > { %s9649_s28 = smov %s8262_s29  ;;  %s9650_s29 = smov %s8501_s24 }
 0x55d   : > { %s9651_s30 = smov %s8485_s26  ;;  %25 = sbr.rel (!%p23_p13) target bundleno = 7 (0x7), region = 116 }
 0x564   :  { %6242 = vsyncpa [#allocation4], 1 }
 0x565   :  { %6244 = vsyncpa [#allocation4 + $0x1], 1 }
 0x566   :  { %6245 = vsyncpa [#allocation7], 1 }
 0x567   :  { %6246 = vsyncpa [#allocation10], 1 }
 0x568   :  { %6247 = vsyncpa [#allocation5], 1 }
 0x569   :  { %6249 = vsyncpa [#allocation5 + $0x1], 1 }

</bundles_post_ra>
